<compile_context>
chip_gen: v6e
topology: v6e:2x2x1
jax: 0.10.0
libtpu: 0.0.40
codegen_flags: <defaults>
</compile_context>

<pallas_src>
import math
from functools import partial

import numpy as np
import jax
import jax.numpy as jnp
from jax.experimental import pallas as pl
from jax.experimental.pallas import tpu as pltpu

_BBOX_XFORM_CLIP = math.log(1000.0 / 16.0)
_NEG_INF = -1e30


def _round_up(x, m):
    return (x + m - 1) // m * m


# ----------------------------------------------------------------------------
# Generation-aware tiling / VMEM defaults
# ----------------------------------------------------------------------------
def _tpu_config():
    kind = ""
    try:
        kind = jax.devices()[0].device_kind.lower()
    except Exception:
        pass

    # Row-tile cap: v5e MXU is 4x128^2 (M=128 native); v6e/v7x are 2x256^2.
    if ("v5 lite" in kind) or ("v5e" in kind) or ("v5lite" in kind) \
            or ("v2" in kind) or ("v3" in kind):
        r_cap = 128
    else:
        r_cap = 256

    # VMEM limit: prefer the hardware query, leave ~25% headroom for compiler
    # scratch / pipeline buffers (critical on v7x's 64 MiB per TensorCore).
    vmem_cap = None
    try:
        info = pltpu.get_tpu_info()
        vmem_cap = int(getattr(info, "vmem_capacity_bytes", 0)) or None
    except Exception:
        vmem_cap = None
    if vmem_cap is not None:
        vmem_limit = min(int(vmem_cap * 3 // 4), 96 * 2 ** 20)
    elif "v7" in kind:
        vmem_limit = 48 * 2 ** 20          # 64 MiB physical per TC
    elif ("v2" in kind) or ("v3" in kind):
        vmem_limit = None                  # leave compiler default
    else:
        vmem_limit = 64 * 2 ** 20          # v4 / v5e / v5p / v6e: 128 MiB physical
    return r_cap, vmem_limit


# ----------------------------------------------------------------------------
# Fused Pallas kernel:
#   box_head + box_predictor (MXU, bf16) -> decode + clip + softmax (VPU/EUP)
# ----------------------------------------------------------------------------
def _roi_box_kernel(x_ref, w1_ref, b1_ref, w2_ref, b2_ref, wh_ref, bh_ref,
                    prop_ref, scores_ref, boxes_ref, *, group):
    # ---- TwoMLPHead: FC -> ReLU -> FC -> ReLU (bf16 MXU, f32 accumulate) ----
    x = x_ref[...]                                                  # (RT, Fp) bf16
    h1 = jnp.dot(x, w1_ref[...], preferred_element_type=jnp.float32) + b1_ref[...]
    h1 = jnp.maximum(h1, 0.0)
    h2 = jnp.dot(h1.astype(jnp.bfloat16), w2_ref[...],
                 preferred_element_type=jnp.float32) + b2_ref[...]
    h2 = jnp.maximum(h2, 0.0)

    # ---- fused predictor head: one matmul -> [logits | dx | dy | dw | dh] ---
    # bbox_reg_weights (10,10,5,5) and the padded-lane logit mask are already
    # folded into wh / bh at weight-prep time.
    head = jnp.dot(h2.astype(jnp.bfloat16), wh_ref[...],
                   preferred_element_type=jnp.float32) + bh_ref[...]  # (RT, 5*group)
    logits = head[:, 0 * group:1 * group]
    dx = head[:, 1 * group:2 * group]
    dy = head[:, 2 * group:3 * group]
    dw = jnp.minimum(head[:, 3 * group:4 * group], _BBOX_XFORM_CLIP)
    dh = jnp.minimum(head[:, 4 * group:5 * group], _BBOX_XFORM_CLIP)

    # ---- BoxCoder.decode + clip_boxes_to_image ------------------------------
    p = prop_ref[...]                                                # (RT, 8) f32
    px1 = p[:, 0:1]
    py1 = p[:, 1:2]
    px2 = p[:, 2:3]
    py2 = p[:, 3:4]
    imh = p[:, 4:5]
    imw = p[:, 5:6]
    widths = px2 - px1
    heights = py2 - py1
    ctr_x = px1 + 0.5 * widths
    ctr_y = py1 + 0.5 * heights

    pred_ctr_x = dx * widths + ctr_x
    pred_ctr_y = dy * heights + ctr_y
    pred_w = jnp.exp(dw) * widths
    pred_h = jnp.exp(dh) * heights

    # lane-aligned slice stores into the (RT, 4*group) slab: [x1 | y1 | x2 | y2]
    boxes_ref[:, 0 * group:1 * group] = jnp.clip(pred_ctr_x - 0.5 * pred_w, 0.0, imw)
    boxes_ref[:, 1 * group:2 * group] = jnp.clip(pred_ctr_y - 0.5 * pred_h, 0.0, imh)
    boxes_ref[:, 2 * group:3 * group] = jnp.clip(pred_ctr_x + 0.5 * pred_w, 0.0, imw)
    boxes_ref[:, 3 * group:4 * group] = jnp.clip(pred_ctr_y + 0.5 * pred_h, 0.0, imh)

    # ---- softmax over class logits (padded lanes carry -1e30 via bh) --------
    m = jnp.max(logits, axis=-1, keepdims=True)
    e = jnp.exp(logits - m)
    denom = jnp.sum(e, axis=-1, keepdims=True)
    scores_ref[...] = e / denom          # exact divide: scores feed thresh / NMS


def roi_box_head_fused(x_bf16, prop_pack, w1, b1, w2, b2, wh, bh, *,
                       group, r_tile, vmem_limit):
    R_pad, Fp = x_bf16.shape
    Hdp = w1.shape[1]
    headp = wh.shape[1]
    grid = (R_pad // r_tile,)
    kernel = partial(_roi_box_kernel, group=group)

    cost = pl.CostEstimate(
        flops=int(2 * R_pad * (Fp * Hdp + Hdp * Hdp + Hdp * headp)),
        transcendentals=int(3 * R_pad * group),
        bytes_accessed=int(x_bf16.size * 2 + prop_pack.size * 4
                           + (w1.size + w2.size + wh.size) * 2
                           + (b1.size + b2.size + bh.size) * 4
                           + R_pad * group * 4 + R_pad * 4 * group * 4))

    def build(single_buffer_weights):
        row = lambda shape: pl.BlockSpec(shape, lambda i: (i, 0))   # tiled over RoIs
        if single_buffer_weights:
            # constant-index weights: fetch once, single-buffer (halves footprint)
            rep = lambda shape: pl.BlockSpec(shape, lambda i: (0, 0),
                                             pipeline_mode=pl.Buffered(1))
        else:
            rep = lambda shape: pl.BlockSpec(shape, lambda i: (0, 0))
        return pl.pallas_call(
            kernel,
            out_shape=(jax.ShapeDtypeStruct((R_pad, group), jnp.float32),
                       jax.ShapeDtypeStruct((R_pad, 4 * group), jnp.float32)),
            grid=grid,
            in_specs=[row((r_tile, Fp)),
                      rep((Fp, Hdp)), rep((1, Hdp)),
                      rep((Hdp, Hdp)), rep((1, Hdp)),
                      rep((Hdp, headp)), rep((1, headp)),
                      row((r_tile, 8))],
            out_specs=(row((r_tile, group)), row((r_tile, 4 * group))),
            compiler_params=pltpu.CompilerParams(
                dimension_semantics=("parallel",),
                vmem_limit_bytes=vmem_limit),
            cost_estimate=cost,
        )

    args = (x_bf16, w1, b1, w2, b2, wh, bh, prop_pack)
    try:
        return build(True)(*args)
    except Exception:
        # TODO(synk): pl.Buffered(1) rejected on this build — fall back to the
        # default 2-deep buffering of the invariant weight blocks.
        return build(False)(*args)


# ----------------------------------------------------------------------------
# Weight preparation: pad to 128-lane multiples, fuse wc|wb into one head,
# re-layout bbox columns to [all dx | all dy | all dw | all dh], fold the
# bbox_reg_weights (10,10,5,5) and padded-lane logit mask in, cast bf16.
# ----------------------------------------------------------------------------
def prepare_fused_params(params, *, feat, hd, nc):
    Fp = _round_up(feat, 128)
    Hdp = _round_up(hd, 128)
    group = _round_up(nc, 128)

    w1 = jnp.zeros((Fp, Hdp), jnp.float32).at[:feat, :hd].set(params['w1'])
    b1 = jnp.zeros((1, Hdp), jnp.float32).at[:, :hd].set(params['b1'].reshape(1, -1))
    w2 = jnp.zeros((Hdp, Hdp), jnp.float32).at[:hd, :hd].set(params['w2'])
    b2 = jnp.zeros((1, Hdp), jnp.float32).at[:, :hd].set(params['b2'].reshape(1, -1))

    wb_r = params['wb'].reshape(hd, nc, 4)      # class-major (dx, dy, dw, dh)
    bb_r = params['bb'].reshape(nc, 4)
    wh = jnp.zeros((Hdp, 5 * group), jnp.float32)
    bh = jnp.zeros((1, 5 * group), jnp.float32)
    # class logits
    wh = wh.at[:hd, 0:nc].set(params['wc'])
    bh = bh.at[:, 0:nc].set(params['bc'].reshape(1, -1))
    # bake the padded-lane softmax mask into the bias (padded wh columns are 0)
    bh = bh.at[:, nc:group].set(_NEG_INF)
    # bbox deltas, with bbox_reg_weights (10,10,5,5) folded in as 1/w scales
    reg_scale = (0.1, 0.1, 0.2, 0.2)
    for k in range(4):                          # groups: dx, dy, dw, dh
        lo = (k + 1) * group
        wh = wh.at[:hd, lo:lo + nc].set(wb_r[:, :, k] * reg_scale[k])
        bh = bh.at[:, lo:lo + nc].set(bb_r[:, k].reshape(1, -1) * reg_scale[k])

    return dict(w1=w1.astype(jnp.bfloat16), b1=b1,
                w2=w2.astype(jnp.bfloat16), b2=b2,
                wh=wh.astype(jnp.bfloat16), bh=bh,
                Fp=Fp, Hdp=Hdp, group=group)


# ----------------------------------------------------------------------------
# RoI-Align (MultiScaleRoIAlign, single level) — plain JAX glue (gather-heavy)
# ----------------------------------------------------------------------------
def roi_align(features, rois, batch_idx, spatial_scale, output_size, sampling_ratio):
    # features: (N, C, H, W) f32; rois: (R, 4) xyxy in original-image coords.
    N, C, H, W = features.shape
    ph, pw = output_size
    sr = sampling_ratio

    x1 = rois[:, 0] * spatial_scale
    y1 = rois[:, 1] * spatial_scale
    x2 = rois[:, 2] * spatial_scale
    y2 = rois[:, 3] * spatial_scale
    roi_w = jnp.maximum(x2 - x1, 1.0)
    roi_h = jnp.maximum(y2 - y1, 1.0)
    bin_w = roi_w / pw
    bin_h = roi_h / ph

    offs = (jnp.arange(sr, dtype=jnp.float32) + 0.5) / sr               # (sr,)
    gy = jnp.arange(ph, dtype=jnp.float32)[:, None] + offs[None, :]     # (ph, sr)
    gx = jnp.arange(pw, dtype=jnp.float32)[:, None] + offs[None, :]     # (pw, sr)
    ys = y1[:, None, None] + gy[None] * bin_h[:, None, None]            # (R, ph, sr)
    xs = x1[:, None, None] + gx[None] * bin_w[:, None, None]            # (R, pw, sr)

    def pool_one(feat, ys_r, xs_r):                                     # feat: (C,H,W)
        Y = jnp.broadcast_to(jnp.clip(ys_r[:, :, None, None], 0.0, H - 1.0),
                             (ph, sr, pw, sr))
        X = jnp.broadcast_to(jnp.clip(xs_r[None, None, :, :], 0.0, W - 1.0),
                             (ph, sr, pw, sr))
        y0 = jnp.floor(Y).astype(jnp.int32)
        x0 = jnp.floor(X).astype(jnp.int32)
        y1i = jnp.minimum(y0 + 1, H - 1)
        x1i = jnp.minimum(x0 + 1, W - 1)
        ly = Y - y0.astype(jnp.float32)
        lx = X - x0.astype(jnp.float32)
        hy = 1.0 - ly
        hx = 1.0 - lx
        v00 = feat[:, y0, x0]
        v01 = feat[:, y0, x1i]
        v10 = feat[:, y1i, x0]
        v11 = feat[:, y1i, x1i]
        val = hy * hx * v00 + hy * lx * v01 + ly * hx * v10 + ly * lx * v11
        return val.mean(axis=(2, 4))                                    # (C, ph, pw)

    return jax.vmap(pool_one)(features[batch_idx], ys, xs)              # (R,C,ph,pw)


# ----------------------------------------------------------------------------
# Host-side post-processing: threshold, remove small boxes, batched NMS, top-k
# ----------------------------------------------------------------------------
def _iou_np(a, b):
    area_a = (a[:, 2] - a[:, 0]) * (a[:, 3] - a[:, 1])
    area_b = (b[:, 2] - b[:, 0]) * (b[:, 3] - b[:, 1])
    lt = np.maximum(a[:, None, :2], b[None, :, :2])
    rb = np.minimum(a[:, None, 2:], b[None, :, 2:])
    wh = np.clip(rb - lt, 0.0, None)
    inter = wh[..., 0] * wh[..., 1]
    return inter / (area_a[:, None] + area_b[None, :] - inter + 1e-12)


def _nms_np(boxes, scores, thresh):
    if boxes.shape[0] == 0:
        return np.zeros((0,), dtype=np.int64)
    order = np.argsort(-scores)
    suppressed = np.zeros(len(scores), dtype=bool)
    keep = []
    for idx in order:
        if suppressed[idx]:
            continue
        keep.append(idx)
        ious = _iou_np(boxes[idx:idx + 1], boxes)[0]
        suppressed |= ious > thresh
        suppressed[idx] = True
    return np.asarray(keep, dtype=np.int64)


def _batched_nms_np(boxes, scores, labels, thresh):
    if boxes.shape[0] == 0:
        return np.zeros((0,), dtype=np.int64)
    max_coord = boxes.max()
    offsets = labels.astype(np.float32) * (max_coord + 1.0)
    return _nms_np(boxes + offsets[:, None], scores, thresh)


# ----------------------------------------------------------------------------
# RoIHeads forward (eval path)
# ----------------------------------------------------------------------------
def roi_heads_forward(features, proposals, image_shapes, params, *,
                      score_thresh=0.05, nms_thresh=0.5, detection_per_img=10,
                      output_size=(7, 7), sampling_ratio=2):
    """features: {'0': (B,C,H,W)}; proposals: list of (P_i,4); image_shapes: [(H,W)]."""
    feat = features['0']
    B, C, FH, FW = feat.shape
    num_per_img = [int(p.shape[0]) for p in proposals]
    rois = jnp.concatenate(proposals, axis=0)                      # (R, 4)
    batch_idx = jnp.concatenate([jnp.full((n,), i, jnp.int32)
                                 for i, n in enumerate(num_per_img)])
    R = rois.shape[0]
    # single-level MultiScaleRoIAlign; scale inferred from feature/image size
    # TODO(synk): torchvision canonicalizes to a power-of-two scale (setup_scales)
    spatial_scale = FH / float(image_shapes[0][0])

    # ---- box_roi_pool (glue) ----
    pooled = roi_align(feat, rois, batch_idx, spatial_scale,
                       output_size, sampling_ratio)                # (R,C,7,7)
    feat_dim = C * output_size[0] * output_size[1]
    # cast to bf16 BEFORE padding: halves HBM traffic on the only per-tile
    # stream that scales with Fp (bf16 MXU inputs, f32 accumulate in-kernel)
    x_bf16 = pooled.reshape(R, -1).astype(jnp.bfloat16)

    # ---- fused box_head + box_predictor + decode + clip + softmax (Pallas) ----
    hd = params['w1'].shape[1]
    nc = params['wc'].shape[1]
    fp = prepare_fused_params(params, feat=feat_dim, hd=hd, nc=nc)
    group = fp['group']

    r_cap, vmem_limit = _tpu_config()
    r_tile = min(_round_up(max(R, 1), 128), r_cap)       # never sub-128 row tiles
    R_pad = _round_up(max(R, 1), r_tile)

    x_pad = jnp.zeros((R_pad, fp['Fp']), jnp.bfloat16).at[:R, :feat_dim].set(x_bf16)
    img_h = jnp.concatenate([jnp.full((n,), float(s[0]), jnp.float32)
                             for n, s in zip(num_per_img, image_shapes)])
    img_w = jnp.concatenate([jnp.full((n,), float(s[1]), jnp.float32)
                             for n, s in zip(num_per_img, image_shapes)])
    prop_pack = jnp.zeros((R_pad, 8), jnp.float32)
    prop_pack = prop_pack.at[:R, 0:4].set(rois)
    prop_pack = prop_pack.at[:R, 4].set(img_h)
    prop_pack = prop_pack.at[:R, 5].set(img_w)

    scores_pad, boxes_pad = roi_box_head_fused(
        x_pad, prop_pack, fp['w1'], fp['b1'], fp['w2'], fp['b2'],
        fp['wh'], fp['bh'], group=group, r_tile=r_tile, vmem_limit=vmem_limit)
    jax.block_until_ready((scores_pad, boxes_pad))

    scores_np = np.asarray(scores_pad[:R, :nc])                    # (R, NC)
    bx = np.asarray(boxes_pad[:R])                                 # (R, 4*group)
    boxes_np = np.stack([bx[:, 0 * group:0 * group + nc],
                         bx[:, 1 * group:1 * group + nc],
                         bx[:, 2 * group:2 * group + nc],
                         bx[:, 3 * group:3 * group + nc]], axis=-1)  # (R,NC,4)

    # ---- postprocess_detections (host: dynamic shapes / sequential NMS) ----
    results, losses = [], {}
    start = 0
    for n in num_per_img:
        b = boxes_np[start:start + n]
        s = scores_np[start:start + n]
        start += n
        labels = np.tile(np.arange(1, nc), n)
        b = b[:, 1:].reshape(-1, 4)                 # drop background class
        s = s[:, 1:].reshape(-1)
        keep = s > score_thresh
        b, s, labels = b[keep], s[keep], labels[keep]
        ws, hs = b[:, 2] - b[:, 0], b[:, 3] - b[:, 1]
        keep = (ws >= 1.0) & (hs >= 1.0)            # remove_small_boxes(min_size=1)
        b, s, labels = b[keep], s[keep], labels[keep]
        keep = _batched_nms_np(b, s, labels, nms_thresh)[:detection_per_img]
        results.append({'boxes': b[keep], 'scores': s[keep],
                        'labels': labels[keep].astype(np.int64)})
    return results, losses


# ----------------------------------------------------------------------------
# main
# ----------------------------------------------------------------------------
if __name__ == "__main__":
    key = jax.random.PRNGKey(0)
    B, C, FH, FW = 2, 4, 16, 16
    IMG_H, IMG_W = 32, 32
    P = 16                      # proposals per image -> R=32 (one 128-row tile)
    NUM_CLASSES = 5             # incl. background
    REPR = 32                   # box_head representation size
    FEAT = C * 7 * 7            # flattened RoI feature dim

    ks = jax.random.split(key, 10)
    features = {'0': jax.random.normal(ks[0], (B, C, FH, FW), jnp.float32)}

    cx = jax.random.uniform(ks[1], (B, P), minval=5.0, maxval=IMG_W - 5.0)
    cy = jax.random.uniform(ks[2], (B, P), minval=5.0, maxval=IMG_H - 5.0)
    bw = jax.random.uniform(ks[3], (B, P), minval=4.0, maxval=12.0)
    bh = jax.random.uniform(ks[4], (B, P), minval=4.0, maxval=12.0)
    props = jnp.stack([cx - bw / 2, cy - bh / 2, cx + bw / 2, cy + bh / 2], axis=-1)
    props = jnp.clip(props, 0.0, float(IMG_W))
    proposals = [props[i] for i in range(B)]
    image_shapes = [(IMG_H, IMG_W)] * B

    params = {
        'w1': 0.01 * jax.random.normal(ks[5], (FEAT, REPR), jnp.float32),
        'b1': jnp.zeros((REPR,), jnp.float32),
        'w2': 0.01 * jax.random.normal(ks[6], (REPR, REPR), jnp.float32),
        'b2': jnp.zeros((REPR,), jnp.float32),
        'wc': 0.01 * jax.random.normal(ks[7], (REPR, NUM_CLASSES), jnp.float32),
        'bc': jnp.zeros((NUM_CLASSES,), jnp.float32),
        'wb': 0.01 * jax.random.normal(ks[8], (REPR, 4 * NUM_CLASSES), jnp.float32),
        'bb': jnp.zeros((4 * NUM_CLASSES,), jnp.float32),
    }

    results, losses = roi_heads_forward(features, proposals, image_shapes, params)

    assert len(results) == B
    for r in results:
        assert r['boxes'].shape[-1] == 4
        assert r['boxes'].shape[0] == r['scores'].shape[0] == r['labels'].shape[0]
        assert np.all(np.isfinite(r['boxes'])) and np.all(np.isfinite(r['scores']))
    print("KERNEL_OK")
</pallas_src>

<mosaic_0001>
module attributes {stable_mosaic.version = 11 : i64} {
  func.func @_roi_box_kernel(%arg0: i32, %arg1: memref<128x256xbf16, #tpu.memory_space<vmem>>, %arg2: memref<256x128xbf16, #tpu.memory_space<vmem>>, %arg3: memref<1x128xf32, #tpu.memory_space<vmem>>, %arg4: memref<128x128xbf16, #tpu.memory_space<vmem>>, %arg5: memref<1x128xf32, #tpu.memory_space<vmem>>, %arg6: memref<128x640xbf16, #tpu.memory_space<vmem>>, %arg7: memref<1x640xf32, #tpu.memory_space<vmem>>, %arg8: memref<128x8xf32, #tpu.memory_space<vmem>>, %arg9: memref<128x128xf32, #tpu.memory_space<vmem>>, %arg10: memref<128x512xf32, #tpu.memory_space<vmem>>) attributes {dimension_semantics = [#tpu.dimension_semantics<parallel>], iteration_bounds = array<i64: 1>, scalar_prefetch = 0 : i64, scratch_operands = 0 : i64, tpu.core_type = #tpu.core_type<tc>, window_params = [{transform_indices = @transform_0, window_bounds = array<i64: 128, 256>}, {pipeline_mode = #tpu.pipeline_mode<synchronous>, transform_indices = @transform_1, window_bounds = array<i64: 256, 128>}, {pipeline_mode = #tpu.pipeline_mode<synchronous>, transform_indices = @transform_2, window_bounds = array<i64: 1, 128>}, {pipeline_mode = #tpu.pipeline_mode<synchronous>, transform_indices = @transform_3, window_bounds = array<i64: 128, 128>}, {pipeline_mode = #tpu.pipeline_mode<synchronous>, transform_indices = @transform_4, window_bounds = array<i64: 1, 128>}, {pipeline_mode = #tpu.pipeline_mode<synchronous>, transform_indices = @transform_5, window_bounds = array<i64: 128, 640>}, {pipeline_mode = #tpu.pipeline_mode<synchronous>, transform_indices = @transform_6, window_bounds = array<i64: 1, 640>}, {transform_indices = @transform_7, window_bounds = array<i64: 128, 8>}, {transform_indices = @transform_8, window_bounds = array<i64: 128, 128>}, {transform_indices = @transform_9, window_bounds = array<i64: 128, 512>}]} {
    %c0 = arith.constant 0 : index
    %c0_0 = arith.constant 0 : index
    %0 = vector.load %arg1[%c0, %c0_0] : memref<128x256xbf16, #tpu.memory_space<vmem>>, vector<128x256xbf16>
    %c0_1 = arith.constant 0 : index
    %c0_2 = arith.constant 0 : index
    %1 = vector.load %arg2[%c0_1, %c0_2] : memref<256x128xbf16, #tpu.memory_space<vmem>>, vector<256x128xbf16>
    %cst = arith.constant dense<0.000000e+00> : vector<128x128xf32>
    %2 = tpu.matmul %0, %1, %cst {dimension_numbers = #tpu.dot_dimension_numbers<[1], [0], [0], [1], [0, 0, 1, 1], [], []>} : vector<128x256xbf16>, vector<256x128xbf16>, vector<128x128xf32> -> vector<128x128xf32>
    %c0_3 = arith.constant 0 : index
    %c0_4 = arith.constant 0 : index
    %3 = vector.load %arg3[%c0_3, %c0_4] : memref<1x128xf32, #tpu.memory_space<vmem>>, vector<1x128xf32>
    %4 = vector.broadcast %3 : vector<1x128xf32> to vector<128x128xf32>
    %5 = arith.addf %2, %4 : vector<128x128xf32>
    %cst_5 = arith.constant 0.000000e+00 : f32
    %6 = vector.broadcast %cst_5 : f32 to vector<128x128xf32>
    %7 = arith.maximumf %5, %6 : vector<128x128xf32>
    %8 = arith.truncf %7 : vector<128x128xf32> to vector<128x128xbf16>
    %c0_6 = arith.constant 0 : index
    %c0_7 = arith.constant 0 : index
    %9 = vector.load %arg4[%c0_6, %c0_7] : memref<128x128xbf16, #tpu.memory_space<vmem>>, vector<128x128xbf16>
    %cst_8 = arith.constant dense<0.000000e+00> : vector<128x128xf32>
    %10 = tpu.matmul %8, %9, %cst_8 {dimension_numbers = #tpu.dot_dimension_numbers<[1], [0], [0], [1], [0, 0, 1, 1], [], []>} : vector<128x128xbf16>, vector<128x128xbf16>, vector<128x128xf32> -> vector<128x128xf32>
    %c0_9 = arith.constant 0 : index
    %c0_10 = arith.constant 0 : index
    %11 = vector.load %arg5[%c0_9, %c0_10] : memref<1x128xf32, #tpu.memory_space<vmem>>, vector<1x128xf32>
    %12 = vector.broadcast %11 : vector<1x128xf32> to vector<128x128xf32>
    %13 = arith.addf %10, %12 : vector<128x128xf32>
    %cst_11 = arith.constant 0.000000e+00 : f32
    %14 = vector.broadcast %cst_11 : f32 to vector<128x128xf32>
    %15 = arith.maximumf %13, %14 : vector<128x128xf32>
    %16 = arith.truncf %15 : vector<128x128xf32> to vector<128x128xbf16>
    %c0_12 = arith.constant 0 : index
    %c0_13 = arith.constant 0 : index
    %17 = vector.load %arg6[%c0_12, %c0_13] : memref<128x640xbf16, #tpu.memory_space<vmem>>, vector<128x640xbf16>
    %cst_14 = arith.constant dense<0.000000e+00> : vector<128x640xf32>
    %18 = tpu.matmul %16, %17, %cst_14 {dimension_numbers = #tpu.dot_dimension_numbers<[1], [0], [0], [1], [0, 0, 1, 1], [], []>} : vector<128x128xbf16>, vector<128x640xbf16>, vector<128x640xf32> -> vector<128x640xf32>
    %c0_15 = arith.constant 0 : index
    %c0_16 = arith.constant 0 : index
    %19 = vector.load %arg7[%c0_15, %c0_16] : memref<1x640xf32, #tpu.memory_space<vmem>>, vector<1x640xf32>
    %20 = vector.broadcast %19 : vector<1x640xf32> to vector<128x640xf32>
    %21 = arith.addf %18, %20 : vector<128x640xf32>
    %22 = vector.extract_strided_slice %21 {offsets = [0, 0], sizes = [128, 128], strides = [1, 1]} : vector<128x640xf32> to vector<128x128xf32>
    %23 = vector.extract_strided_slice %21 {offsets = [0, 128], sizes = [128, 128], strides = [1, 1]} : vector<128x640xf32> to vector<128x128xf32>
    %24 = vector.extract_strided_slice %21 {offsets = [0, 256], sizes = [128, 128], strides = [1, 1]} : vector<128x640xf32> to vector<128x128xf32>
    %25 = vector.extract_strided_slice %21 {offsets = [0, 384], sizes = [128, 128], strides = [1, 1]} : vector<128x640xf32> to vector<128x128xf32>
    %cst_17 = arith.constant 4.13516665 : f32
    %26 = vector.broadcast %cst_17 : f32 to vector<128x128xf32>
    %27 = arith.minimumf %25, %26 : vector<128x128xf32>
    %28 = vector.extract_strided_slice %21 {offsets = [0, 512], sizes = [128, 128], strides = [1, 1]} : vector<128x640xf32> to vector<128x128xf32>
    %cst_18 = arith.constant 4.13516665 : f32
    %29 = vector.broadcast %cst_18 : f32 to vector<128x128xf32>
    %30 = arith.minimumf %28, %29 : vector<128x128xf32>
    %c0_19 = arith.constant 0 : index
    %c0_20 = arith.constant 0 : index
    %31 = vector.load %arg8[%c0_19, %c0_20] : memref<128x8xf32, #tpu.memory_space<vmem>>, vector<128x8xf32>
    %32 = vector.extract_strided_slice %31 {offsets = [0, 0], sizes = [128, 1], strides = [1, 1]} : vector<128x8xf32> to vector<128x1xf32>
    %33 = vector.extract_strided_slice %31 {offsets = [0, 1], sizes = [128, 1], strides = [1, 1]} : vector<128x8xf32> to vector<128x1xf32>
    %34 = vector.extract_strided_slice %31 {offsets = [0, 2], sizes = [128, 1], strides = [1, 1]} : vector<128x8xf32> to vector<128x1xf32>
    %35 = vector.extract_strided_slice %31 {offsets = [0, 3], sizes = [128, 1], strides = [1, 1]} : vector<128x8xf32> to vector<128x1xf32>
    %36 = vector.extract_strided_slice %31 {offsets = [0, 4], sizes = [128, 1], strides = [1, 1]} : vector<128x8xf32> to vector<128x1xf32>
    %37 = vector.extract_strided_slice %31 {offsets = [0, 5], sizes = [128, 1], strides = [1, 1]} : vector<128x8xf32> to vector<128x1xf32>
    %38 = arith.subf %34, %32 : vector<128x1xf32>
    %39 = arith.subf %35, %33 : vector<128x1xf32>
    %cst_21 = arith.constant 5.000000e-01 : f32
    %40 = vector.broadcast %cst_21 : f32 to vector<128x1xf32>
    %41 = arith.mulf %40, %38 : vector<128x1xf32>
    %42 = arith.addf %32, %41 : vector<128x1xf32>
    %cst_22 = arith.constant 5.000000e-01 : f32
    %43 = vector.broadcast %cst_22 : f32 to vector<128x1xf32>
    %44 = arith.mulf %43, %39 : vector<128x1xf32>
    %45 = arith.addf %33, %44 : vector<128x1xf32>
    %46 = vector.broadcast %38 : vector<128x1xf32> to vector<128x128xf32>
    %47 = arith.mulf %23, %46 : vector<128x128xf32>
    %48 = vector.broadcast %42 : vector<128x1xf32> to vector<128x128xf32>
    %49 = arith.addf %47, %48 : vector<128x128xf32>
    %50 = vector.broadcast %39 : vector<128x1xf32> to vector<128x128xf32>
    %51 = arith.mulf %24, %50 : vector<128x128xf32>
    %52 = vector.broadcast %45 : vector<128x1xf32> to vector<128x128xf32>
    %53 = arith.addf %51, %52 : vector<128x128xf32>
    %54 = math.exp %27 : vector<128x128xf32>
    %55 = vector.broadcast %38 : vector<128x1xf32> to vector<128x128xf32>
    %56 = arith.mulf %54, %55 : vector<128x128xf32>
    %57 = math.exp %30 : vector<128x128xf32>
    %58 = vector.broadcast %39 : vector<128x1xf32> to vector<128x128xf32>
    %59 = arith.mulf %57, %58 : vector<128x128xf32>
    %cst_23 = arith.constant 5.000000e-01 : f32
    %60 = vector.broadcast %cst_23 : f32 to vector<128x128xf32>
    %61 = arith.mulf %60, %56 : vector<128x128xf32>
    %62 = arith.subf %49, %61 : vector<128x128xf32>
    %cst_24 = arith.constant 0.000000e+00 : f32
    %63 = vector.broadcast %cst_24 : f32 to vector<128x128xf32>
    %64 = arith.maximumf %63, %62 : vector<128x128xf32>
    %65 = vector.broadcast %37 : vector<128x1xf32> to vector<128x128xf32>
    %66 = arith.minimumf %65, %64 : vector<128x128xf32>
    %c0_25 = arith.constant 0 : index
    %c0_26 = arith.constant 0 : index
    %67 = vector.load %arg10[%c0_25, %c0_26] : memref<128x512xf32, #tpu.memory_space<vmem>>, vector<128x128xf32>
    tpu.vector_store %arg10[%c0_25, %c0_26], %66 {strides = array<i32>} : memref<128x512xf32, #tpu.memory_space<vmem>>, vector<128x128xf32>,
    %cst_27 = arith.constant 5.000000e-01 : f32
    %68 = vector.broadcast %cst_27 : f32 to vector<128x128xf32>
    %69 = arith.mulf %68, %59 : vector<128x128xf32>
    %70 = arith.subf %53, %69 : vector<128x128xf32>
    %cst_28 = arith.constant 0.000000e+00 : f32
    %71 = vector.broadcast %cst_28 : f32 to vector<128x128xf32>
    %72 = arith.maximumf %71, %70 : vector<128x128xf32>
    %73 = vector.broadcast %36 : vector<128x1xf32> to vector<128x128xf32>
    %74 = arith.minimumf %73, %72 : vector<128x128xf32>
    %c0_29 = arith.constant 0 : index
    %c128 = arith.constant 128 : index
    %75 = vector.load %arg10[%c0_29, %c128] : memref<128x512xf32, #tpu.memory_space<vmem>>, vector<128x128xf32>
    tpu.vector_store %arg10[%c0_29, %c128], %74 {strides = array<i32>} : memref<128x512xf32, #tpu.memory_space<vmem>>, vector<128x128xf32>,
    %cst_30 = arith.constant 5.000000e-01 : f32
    %76 = vector.broadcast %cst_30 : f32 to vector<128x128xf32>
    %77 = arith.mulf %76, %56 : vector<128x128xf32>
    %78 = arith.addf %49, %77 : vector<128x128xf32>
    %cst_31 = arith.constant 0.000000e+00 : f32
    %79 = vector.broadcast %cst_31 : f32 to vector<128x128xf32>
    %80 = arith.maximumf %79, %78 : vector<128x128xf32>
    %81 = vector.broadcast %37 : vector<128x1xf32> to vector<128x128xf32>
    %82 = arith.minimumf %81, %80 : vector<128x128xf32>
    %c0_32 = arith.constant 0 : index
    %c256 = arith.constant 256 : index
    %83 = vector.load %arg10[%c0_32, %c256] : memref<128x512xf32, #tpu.memory_space<vmem>>, vector<128x128xf32>
    tpu.vector_store %arg10[%c0_32, %c256], %82 {strides = array<i32>} : memref<128x512xf32, #tpu.memory_space<vmem>>, vector<128x128xf32>,
    %cst_33 = arith.constant 5.000000e-01 : f32
    %84 = vector.broadcast %cst_33 : f32 to vector<128x128xf32>
    %85 = arith.mulf %84, %59 : vector<128x128xf32>
    %86 = arith.addf %53, %85 : vector<128x128xf32>
    %cst_34 = arith.constant 0.000000e+00 : f32
    %87 = vector.broadcast %cst_34 : f32 to vector<128x128xf32>
    %88 = arith.maximumf %87, %86 : vector<128x128xf32>
    %89 = vector.broadcast %36 : vector<128x1xf32> to vector<128x128xf32>
    %90 = arith.minimumf %89, %88 : vector<128x128xf32>
    %c0_35 = arith.constant 0 : index
    %c384 = arith.constant 384 : index
    %91 = vector.load %arg10[%c0_35, %c384] : memref<128x512xf32, #tpu.memory_space<vmem>>, vector<128x128xf32>
    tpu.vector_store %arg10[%c0_35, %c384], %90 {strides = array<i32>} : memref<128x512xf32, #tpu.memory_space<vmem>>, vector<128x128xf32>,
    %cst_36 = arith.constant dense<0xFF800000> : vector<128xf32>
    %92 = vector.multi_reduction <maximumf>, %22, %cst_36 [1] : vector<128x128xf32> to vector<128xf32>
    %93 = vector.shape_cast %92 : vector<128xf32> to vector<128x1xf32>
    %94 = vector.broadcast %93 : vector<128x1xf32> to vector<128x128xf32>
    %95 = arith.subf %22, %94 : vector<128x128xf32>
    %96 = math.exp %95 : vector<128x128xf32>
    %cst_37 = arith.constant dense<0.000000e+00> : vector<128xf32>
    %97 = vector.multi_reduction <add>, %96, %cst_37 [1] : vector<128x128xf32> to vector<128xf32>
    %98 = vector.shape_cast %97 : vector<128xf32> to vector<128x1xf32>
    %99 = vector.broadcast %98 : vector<128x1xf32> to vector<128x128xf32>
    %100 = arith.divf %96, %99 : vector<128x128xf32>
    %c0_38 = arith.constant 0 : index
    %c0_39 = arith.constant 0 : index
    %101 = vector.load %arg9[%c0_38, %c0_39] : memref<128x128xf32, #tpu.memory_space<vmem>>, vector<128x128xf32>
    tpu.vector_store %arg9[%c0_38, %c0_39], %100 {strides = array<i32>} : memref<128x128xf32, #tpu.memory_space<vmem>>, vector<128x128xf32>,
    return
  }
  func.func @transform_0(%arg0: i32) -> (i32, i32) {
    %c0_i32 = arith.constant 0 : i32
    %c0_i32_0 = arith.constant 0 : i32
    return %arg0, %c0_i32 : i32, i32
  }
  func.func @transform_1(%arg0: i32) -> (i32, i32) {
    %c0_i32 = arith.constant 0 : i32
    %c0_i32_0 = arith.constant 0 : i32
    %c0_i32_1 = arith.constant 0 : i32
    return %c0_i32, %c0_i32_0 : i32, i32
  }
  func.func @transform_2(%arg0: i32) -> (i32, i32) {
    %c0_i32 = arith.constant 0 : i32
    %c0_i32_0 = arith.constant 0 : i32
    %c0_i32_1 = arith.constant 0 : i32
    return %c0_i32, %c0_i32_0 : i32, i32
  }
  func.func @transform_3(%arg0: i32) -> (i32, i32) {
    %c0_i32 = arith.constant 0 : i32
    %c0_i32_0 = arith.constant 0 : i32
    %c0_i32_1 = arith.constant 0 : i32
    return %c0_i32, %c0_i32_0 : i32, i32
  }
  func.func @transform_4(%arg0: i32) -> (i32, i32) {
    %c0_i32 = arith.constant 0 : i32
    %c0_i32_0 = arith.constant 0 : i32
    %c0_i32_1 = arith.constant 0 : i32
    return %c0_i32, %c0_i32_0 : i32, i32
  }
  func.func @transform_5(%arg0: i32) -> (i32, i32) {
    %c0_i32 = arith.constant 0 : i32
    %c0_i32_0 = arith.constant 0 : i32
    %c0_i32_1 = arith.constant 0 : i32
    return %c0_i32, %c0_i32_0 : i32, i32
  }
  func.func @transform_6(%arg0: i32) -> (i32, i32) {
    %c0_i32 = arith.constant 0 : i32
    %c0_i32_0 = arith.constant 0 : i32
    %c0_i32_1 = arith.constant 0 : i32
    return %c0_i32, %c0_i32_0 : i32, i32
  }
  func.func @transform_7(%arg0: i32) -> (i32, i32) {
    %c0_i32 = arith.constant 0 : i32
    %c0_i32_0 = arith.constant 0 : i32
    return %arg0, %c0_i32 : i32, i32
  }
  func.func @transform_8(%arg0: i32) -> (i32, i32) {
    %c0_i32 = arith.constant 0 : i32
    %c0_i32_0 = arith.constant 0 : i32
    return %arg0, %c0_i32 : i32, i32
  }
  func.func @transform_9(%arg0: i32) -> (i32, i32) {
    %c0_i32 = arith.constant 0 : i32
    %c0_i32_0 = arith.constant 0 : i32
    return %arg0, %c0_i32 : i32, i32
  }
}

module attributes {stable_mosaic.version = 11 : i64} {
  func.func @_roi_box_kernel(%arg0: i32, %arg1: memref<128x256xbf16, #tpu.memory_space<vmem>>, %arg2: memref<256x128xbf16, #tpu.memory_space<vmem>>, %arg3: memref<1x128xf32, #tpu.memory_space<vmem>>, %arg4: memref<128x128xbf16, #tpu.memory_space<vmem>>, %arg5: memref<1x128xf32, #tpu.memory_space<vmem>>, %arg6: memref<128x640xbf16, #tpu.memory_space<vmem>>, %arg7: memref<1x640xf32, #tpu.memory_space<vmem>>, %arg8: memref<128x8xf32, #tpu.memory_space<vmem>>, %arg9: memref<128x128xf32, #tpu.memory_space<vmem>>, %arg10: memref<128x512xf32, #tpu.memory_space<vmem>>) attributes {dimension_semantics = [#tpu.dimension_semantics<parallel>], iteration_bounds = array<i64: 1>, scalar_prefetch = 0 : i64, scratch_operands = 0 : i64, tpu.core_type = #tpu.core_type<tc>, window_params = [{transform_indices = @transform_0, window_bounds = array<i64: 128, 256>}, {pipeline_mode = #tpu.pipeline_mode<synchronous>, transform_indices = @transform_1, window_bounds = array<i64: 256, 128>}, {pipeline_mode = #tpu.pipeline_mode<synchronous>, transform_indices = @transform_2, window_bounds = array<i64: 1, 128>}, {pipeline_mode = #tpu.pipeline_mode<synchronous>, transform_indices = @transform_3, window_bounds = array<i64: 128, 128>}, {pipeline_mode = #tpu.pipeline_mode<synchronous>, transform_indices = @transform_4, window_bounds = array<i64: 1, 128>}, {pipeline_mode = #tpu.pipeline_mode<synchronous>, transform_indices = @transform_5, window_bounds = array<i64: 128, 640>}, {pipeline_mode = #tpu.pipeline_mode<synchronous>, transform_indices = @transform_6, window_bounds = array<i64: 1, 640>}, {transform_indices = @transform_7, window_bounds = array<i64: 128, 8>}, {transform_indices = @transform_8, window_bounds = array<i64: 128, 128>}, {transform_indices = @transform_9, window_bounds = array<i64: 128, 512>}]} {
    %c0 = arith.constant 0 : index
    %c0_0 = arith.constant 0 : index
    %0 = vector.load %arg1[%c0, %c0_0] : memref<128x256xbf16, #tpu.memory_space<vmem>>, vector<128x256xbf16>
    %c0_1 = arith.constant 0 : index
    %c0_2 = arith.constant 0 : index
    %1 = vector.load %arg2[%c0_1, %c0_2] : memref<256x128xbf16, #tpu.memory_space<vmem>>, vector<256x128xbf16>
    %cst = arith.constant dense<0.000000e+00> : vector<128x128xf32>
    %2 = tpu.matmul %0, %1, %cst {dimension_numbers = #tpu.dot_dimension_numbers<[1], [0], [0], [1], [0, 0, 1, 1], [], []>} : vector<128x256xbf16>, vector<256x128xbf16>, vector<128x128xf32> -> vector<128x128xf32>
    %c0_3 = arith.constant 0 : index
    %c0_4 = arith.constant 0 : index
    %3 = vector.load %arg3[%c0_3, %c0_4] : memref<1x128xf32, #tpu.memory_space<vmem>>, vector<1x128xf32>
    %4 = vector.broadcast %3 : vector<1x128xf32> to vector<128x128xf32>
    %5 = arith.addf %2, %4 : vector<128x128xf32>
    %cst_5 = arith.constant 0.000000e+00 : f32
    %6 = vector.broadcast %cst_5 : f32 to vector<128x128xf32>
    %7 = arith.maximumf %5, %6 : vector<128x128xf32>
    %8 = arith.truncf %7 : vector<128x128xf32> to vector<128x128xbf16>
    %c0_6 = arith.constant 0 : index
    %c0_7 = arith.constant 0 : index
    %9 = vector.load %arg4[%c0_6, %c0_7] : memref<128x128xbf16, #tpu.memory_space<vmem>>, vector<128x128xbf16>
    %cst_8 = arith.constant dense<0.000000e+00> : vector<128x128xf32>
    %10 = tpu.matmul %8, %9, %cst_8 {dimension_numbers = #tpu.dot_dimension_numbers<[1], [0], [0], [1], [0, 0, 1, 1], [], []>} : vector<128x128xbf16>, vector<128x128xbf16>, vector<128x128xf32> -> vector<128x128xf32>
    %c0_9 = arith.constant 0 : index
    %c0_10 = arith.constant 0 : index
    %11 = vector.load %arg5[%c0_9, %c0_10] : memref<1x128xf32, #tpu.memory_space<vmem>>, vector<1x128xf32>
    %12 = vector.broadcast %11 : vector<1x128xf32> to vector<128x128xf32>
    %13 = arith.addf %10, %12 : vector<128x128xf32>
    %cst_11 = arith.constant 0.000000e+00 : f32
    %14 = vector.broadcast %cst_11 : f32 to vector<128x128xf32>
    %15 = arith.maximumf %13, %14 : vector<128x128xf32>
    %16 = arith.truncf %15 : vector<128x128xf32> to vector<128x128xbf16>
    %c0_12 = arith.constant 0 : index
    %c0_13 = arith.constant 0 : index
    %17 = vector.load %arg6[%c0_12, %c0_13] : memref<128x640xbf16, #tpu.memory_space<vmem>>, vector<128x640xbf16>
    %cst_14 = arith.constant dense<0.000000e+00> : vector<128x640xf32>
    %18 = tpu.matmul %16, %17, %cst_14 {dimension_numbers = #tpu.dot_dimension_numbers<[1], [0], [0], [1], [0, 0, 1, 1], [], []>} : vector<128x128xbf16>, vector<128x640xbf16>, vector<128x640xf32> -> vector<128x640xf32>
    %c0_15 = arith.constant 0 : index
    %c0_16 = arith.constant 0 : index
    %19 = vector.load %arg7[%c0_15, %c0_16] : memref<1x640xf32, #tpu.memory_space<vmem>>, vector<1x640xf32>
    %20 = vector.broadcast %19 : vector<1x640xf32> to vector<128x640xf32>
    %21 = arith.addf %18, %20 : vector<128x640xf32>
    %22 = vector.extract_strided_slice %21 {offsets = [0, 0], sizes = [128, 128], strides = [1, 1]} : vector<128x640xf32> to vector<128x128xf32>
    %23 = vector.extract_strided_slice %21 {offsets = [0, 128], sizes = [128, 128], strides = [1, 1]} : vector<128x640xf32> to vector<128x128xf32>
    %24 = vector.extract_strided_slice %21 {offsets = [0, 256], sizes = [128, 128], strides = [1, 1]} : vector<128x640xf32> to vector<128x128xf32>
    %25 = vector.extract_strided_slice %21 {offsets = [0, 384], sizes = [128, 128], strides = [1, 1]} : vector<128x640xf32> to vector<128x128xf32>
    %cst_17 = arith.constant 4.13516665 : f32
    %26 = vector.broadcast %cst_17 : f32 to vector<128x128xf32>
    %27 = arith.minimumf %25, %26 : vector<128x128xf32>
    %28 = vector.extract_strided_slice %21 {offsets = [0, 512], sizes = [128, 128], strides = [1, 1]} : vector<128x640xf32> to vector<128x128xf32>
    %cst_18 = arith.constant 4.13516665 : f32
    %29 = vector.broadcast %cst_18 : f32 to vector<128x128xf32>
    %30 = arith.minimumf %28, %29 : vector<128x128xf32>
    %c0_19 = arith.constant 0 : index
    %c0_20 = arith.constant 0 : index
    %31 = vector.load %arg8[%c0_19, %c0_20] : memref<128x8xf32, #tpu.memory_space<vmem>>, vector<128x8xf32>
    %32 = vector.extract_strided_slice %31 {offsets = [0, 0], sizes = [128, 1], strides = [1, 1]} : vector<128x8xf32> to vector<128x1xf32>
    %33 = vector.extract_strided_slice %31 {offsets = [0, 1], sizes = [128, 1], strides = [1, 1]} : vector<128x8xf32> to vector<128x1xf32>
    %34 = vector.extract_strided_slice %31 {offsets = [0, 2], sizes = [128, 1], strides = [1, 1]} : vector<128x8xf32> to vector<128x1xf32>
    %35 = vector.extract_strided_slice %31 {offsets = [0, 3], sizes = [128, 1], strides = [1, 1]} : vector<128x8xf32> to vector<128x1xf32>
    %36 = vector.extract_strided_slice %31 {offsets = [0, 4], sizes = [128, 1], strides = [1, 1]} : vector<128x8xf32> to vector<128x1xf32>
    %37 = vector.extract_strided_slice %31 {offsets = [0, 5], sizes = [128, 1], strides = [1, 1]} : vector<128x8xf32> to vector<128x1xf32>
    %38 = arith.subf %34, %32 : vector<128x1xf32>
    %39 = arith.subf %35, %33 : vector<128x1xf32>
    %cst_21 = arith.constant 5.000000e-01 : f32
    %40 = vector.broadcast %cst_21 : f32 to vector<128x1xf32>
    %41 = arith.mulf %40, %38 : vector<128x1xf32>
    %42 = arith.addf %32, %41 : vector<128x1xf32>
    %cst_22 = arith.constant 5.000000e-01 : f32
    %43 = vector.broadcast %cst_22 : f32 to vector<128x1xf32>
    %44 = arith.mulf %43, %39 : vector<128x1xf32>
    %45 = arith.addf %33, %44 : vector<128x1xf32>
    %46 = vector.broadcast %38 : vector<128x1xf32> to vector<128x128xf32>
    %47 = arith.mulf %23, %46 : vector<128x128xf32>
    %48 = vector.broadcast %42 : vector<128x1xf32> to vector<128x128xf32>
    %49 = arith.addf %47, %48 : vector<128x128xf32>
    %50 = vector.broadcast %39 : vector<128x1xf32> to vector<128x128xf32>
    %51 = arith.mulf %24, %50 : vector<128x128xf32>
    %52 = vector.broadcast %45 : vector<128x1xf32> to vector<128x128xf32>
    %53 = arith.addf %51, %52 : vector<128x128xf32>
    %54 = math.exp %27 : vector<128x128xf32>
    %55 = vector.broadcast %38 : vector<128x1xf32> to vector<128x128xf32>
    %56 = arith.mulf %54, %55 : vector<128x128xf32>
    %57 = math.exp %30 : vector<128x128xf32>
    %58 = vector.broadcast %39 : vector<128x1xf32> to vector<128x128xf32>
    %59 = arith.mulf %57, %58 : vector<128x128xf32>
    %cst_23 = arith.constant 5.000000e-01 : f32
    %60 = vector.broadcast %cst_23 : f32 to vector<128x128xf32>
    %61 = arith.mulf %60, %56 : vector<128x128xf32>
    %62 = arith.subf %49, %61 : vector<128x128xf32>
    %cst_24 = arith.constant 0.000000e+00 : f32
    %63 = vector.broadcast %cst_24 : f32 to vector<128x128xf32>
    %64 = arith.maximumf %63, %62 : vector<128x128xf32>
    %65 = vector.broadcast %37 : vector<128x1xf32> to vector<128x128xf32>
    %66 = arith.minimumf %65, %64 : vector<128x128xf32>
    %c0_25 = arith.constant 0 : index
    %c0_26 = arith.constant 0 : index
    %67 = vector.load %arg10[%c0_25, %c0_26] : memref<128x512xf32, #tpu.memory_space<vmem>>, vector<128x128xf32>
    tpu.vector_store %arg10[%c0_25, %c0_26], %66 {strides = array<i32>} : memref<128x512xf32, #tpu.memory_space<vmem>>, vector<128x128xf32>,
    %cst_27 = arith.constant 5.000000e-01 : f32
    %68 = vector.broadcast %cst_27 : f32 to vector<128x128xf32>
    %69 = arith.mulf %68, %59 : vector<128x128xf32>
    %70 = arith.subf %53, %69 : vector<128x128xf32>
    %cst_28 = arith.constant 0.000000e+00 : f32
    %71 = vector.broadcast %cst_28 : f32 to vector<128x128xf32>
    %72 = arith.maximumf %71, %70 : vector<128x128xf32>
    %73 = vector.broadcast %36 : vector<128x1xf32> to vector<128x128xf32>
    %74 = arith.minimumf %73, %72 : vector<128x128xf32>
    %c0_29 = arith.constant 0 : index
    %c128 = arith.constant 128 : index
    %75 = vector.load %arg10[%c0_29, %c128] : memref<128x512xf32, #tpu.memory_space<vmem>>, vector<128x128xf32>
    tpu.vector_store %arg10[%c0_29, %c128], %74 {strides = array<i32>} : memref<128x512xf32, #tpu.memory_space<vmem>>, vector<128x128xf32>,
    %cst_30 = arith.constant 5.000000e-01 : f32
    %76 = vector.broadcast %cst_30 : f32 to vector<128x128xf32>
    %77 = arith.mulf %76, %56 : vector<128x128xf32>
    %78 = arith.addf %49, %77 : vector<128x128xf32>
    %cst_31 = arith.constant 0.000000e+00 : f32
    %79 = vector.broadcast %cst_31 : f32 to vector<128x128xf32>
    %80 = arith.maximumf %79, %78 : vector<128x128xf32>
    %81 = vector.broadcast %37 : vector<128x1xf32> to vector<128x128xf32>
    %82 = arith.minimumf %81, %80 : vector<128x128xf32>
    %c0_32 = arith.constant 0 : index
    %c256 = arith.constant 256 : index
    %83 = vector.load %arg10[%c0_32, %c256] : memref<128x512xf32, #tpu.memory_space<vmem>>, vector<128x128xf32>
    tpu.vector_store %arg10[%c0_32, %c256], %82 {strides = array<i32>} : memref<128x512xf32, #tpu.memory_space<vmem>>, vector<128x128xf32>,
    %cst_33 = arith.constant 5.000000e-01 : f32
    %84 = vector.broadcast %cst_33 : f32 to vector<128x128xf32>
    %85 = arith.mulf %84, %59 : vector<128x128xf32>
    %86 = arith.addf %53, %85 : vector<128x128xf32>
    %cst_34 = arith.constant 0.000000e+00 : f32
    %87 = vector.broadcast %cst_34 : f32 to vector<128x128xf32>
    %88 = arith.maximumf %87, %86 : vector<128x128xf32>
    %89 = vector.broadcast %36 : vector<128x1xf32> to vector<128x128xf32>
    %90 = arith.minimumf %89, %88 : vector<128x128xf32>
    %c0_35 = arith.constant 0 : index
    %c384 = arith.constant 384 : index
    %91 = vector.load %arg10[%c0_35, %c384] : memref<128x512xf32, #tpu.memory_space<vmem>>, vector<128x128xf32>
    tpu.vector_store %arg10[%c0_35, %c384], %90 {strides = array<i32>} : memref<128x512xf32, #tpu.memory_space<vmem>>, vector<128x128xf32>,
    %cst_36 = arith.constant dense<0xFF800000> : vector<128xf32>
    %92 = vector.multi_reduction <maximumf>, %22, %cst_36 [1] : vector<128x128xf32> to vector<128xf32>
    %93 = vector.shape_cast %92 : vector<128xf32> to vector<128x1xf32>
    %94 = vector.broadcast %93 : vector<128x1xf32> to vector<128x128xf32>
    %95 = arith.subf %22, %94 : vector<128x128xf32>
    %96 = math.exp %95 : vector<128x128xf32>
    %cst_37 = arith.constant dense<0.000000e+00> : vector<128xf32>
    %97 = vector.multi_reduction <add>, %96, %cst_37 [1] : vector<128x128xf32> to vector<128xf32>
    %98 = vector.shape_cast %97 : vector<128xf32> to vector<128x1xf32>
    %99 = vector.broadcast %98 : vector<128x1xf32> to vector<128x128xf32>
    %100 = arith.divf %96, %99 : vector<128x128xf32>
    %c0_38 = arith.constant 0 : index
    %c0_39 = arith.constant 0 : index
    %101 = vector.load %arg9[%c0_38, %c0_39] : memref<128x128xf32, #tpu.memory_space<vmem>>, vector<128x128xf32>
    tpu.vector_store %arg9[%c0_38, %c0_39], %100 {strides = array<i32>} : memref<128x128xf32, #tpu.memory_space<vmem>>, vector<128x128xf32>,
    return
  }
  func.func @transform_0(%arg0: i32) -> (i32, i32) {
    %c0_i32 = arith.constant 0 : i32
    %c0_i32_0 = arith.constant 0 : i32
    return %arg0, %c0_i32 : i32, i32
  }
  func.func @transform_1(%arg0: i32) -> (i32, i32) {
    %c0_i32 = arith.constant 0 : i32
    %c0_i32_0 = arith.constant 0 : i32
    %c0_i32_1 = arith.constant 0 : i32
    return %c0_i32, %c0_i32_0 : i32, i32
  }
  func.func @transform_2(%arg0: i32) -> (i32, i32) {
    %c0_i32 = arith.constant 0 : i32
    %c0_i32_0 = arith.constant 0 : i32
    %c0_i32_1 = arith.constant 0 : i32
    return %c0_i32, %c0_i32_0 : i32, i32
  }
  func.func @transform_3(%arg0: i32) -> (i32, i32) {
    %c0_i32 = arith.constant 0 : i32
    %c0_i32_0 = arith.constant 0 : i32
    %c0_i32_1 = arith.constant 0 : i32
    return %c0_i32, %c0_i32_0 : i32, i32
  }
  func.func @transform_4(%arg0: i32) -> (i32, i32) {
    %c0_i32 = arith.constant 0 : i32
    %c0_i32_0 = arith.constant 0 : i32
    %c0_i32_1 = arith.constant 0 : i32
    return %c0_i32, %c0_i32_0 : i32, i32
  }
  func.func @transform_5(%arg0: i32) -> (i32, i32) {
    %c0_i32 = arith.constant 0 : i32
    %c0_i32_0 = arith.constant 0 : i32
    %c0_i32_1 = arith.constant 0 : i32
    return %c0_i32, %c0_i32_0 : i32, i32
  }
  func.func @transform_6(%arg0: i32) -> (i32, i32) {
    %c0_i32 = arith.constant 0 : i32
    %c0_i32_0 = arith.constant 0 : i32
    %c0_i32_1 = arith.constant 0 : i32
    return %c0_i32, %c0_i32_0 : i32, i32
  }
  func.func @transform_7(%arg0: i32) -> (i32, i32) {
    %c0_i32 = arith.constant 0 : i32
    %c0_i32_0 = arith.constant 0 : i32
    return %arg0, %c0_i32 : i32, i32
  }
  func.func @transform_8(%arg0: i32) -> (i32, i32) {
    %c0_i32 = arith.constant 0 : i32
    %c0_i32_0 = arith.constant 0 : i32
    return %arg0, %c0_i32 : i32, i32
  }
  func.func @transform_9(%arg0: i32) -> (i32, i32) {
    %c0_i32 = arith.constant 0 : i32
    %c0_i32_0 = arith.constant 0 : i32
    return %arg0, %c0_i32 : i32, i32
  }
}

</mosaic_0001>

<bundles_post_ra>
// kernel: tpu_custom_call.1
= control target key start
LH: loop header
LB: loop body
LE: loop exit
PB: predicated region body
PF: predicated region fallthrough
CT: control target
= control target key end

     0   :  { %15 = vsyncpa [#allocation3], 0  ;;  %s4338_s0 = inlined_call_operand.vmem [shape: bf16[128,256], index: 0, kind: input, shape index: {}]   ;;  %s4339_s1 = inlined_call_operand.hbm [shape: bf16[256,128], index: 1, kind: input, shape index: {}]   ;;  %s4340_s2 = inlined_call_operand.vmem [shape: f32[1,128], index: 2, kind: input, shape index: {}]   ;;  %s4341_s3 = inlined_call_operand.hbm [shape: bf16[128,128], index: 3, kind: input, shape index: {}]   ;;  %s4342_s4 = inlined_call_operand.vmem [shape: f32[1,128], index: 4, kind: input, shape index: {}]   ;;  %s4343_s5 = inlined_call_operand.hbm [shape: bf16[128,640], index: 5, kind: input, shape index: {}]   ;;  %s4344_s6 = inlined_call_operand.vmem [shape: f32[1,640], index: 6, kind: input, shape index: {}]   ;;  %s4345_s7 = inlined_call_operand.vmem [shape: f32[128,8], index: 7, kind: input, shape index: {}]   ;;  %s4346_s8 = inlined_call_operand.hbm [shape: f32[128,128], index: 8, kind: output, shape index: {0}]   ;;  %s4347_s9 = inlined_call_operand.hbm [shape: f32[128,512], index: 9, kind: output, shape index: {1}]  }
   0x1   :  { %16 = vsyncpa [#allocation6], 0 }
   0x2   :  { %17 = vsyncpa [#allocation4], 0 }
   0x3   :  { %18 = vsyncpa [#allocation10], 0  ;;  %s3136_s30 = smov [#allocation5]   ;;  %s3137_s11 = smov [#allocation2]  }
   0x4   :  { %s40_s10 = sshll.u32 %s3136_s30, 4  ;;  %s26_s12 = sshll.u32 %s3137_s11, 4  ;;  %s41_s10 = int_to_ptr.vmem [resolvable:$true] %s40_s10  ;;  %s27_s12 = int_to_ptr.vmem [resolvable:$true] %s26_s12 }
   0x5   :  { %s3036_s13 = scalar_lea.vmem %s41_s10, 1024  ;;  %p3041_p1 = scmp.lt.s32.totalorder %s41_s10, %s41_s10 }
   0x6   :  { %p3037_p0 = scmp.ne.s32.totalorder %s41_s10, %s3036_s13  ;;  %p3042_p2 = scmp.lt.s32.totalorder %s3036_s13, %s3036_s13 }
   0x8   :  { %p3043_p3 = por %p3042_p2, %p3041_p1 }
   0xa   :  { %p3044_p4 = pnand %p3043_p3, %p3037_p0 }
   0xc   :  { %3047 = shalt.err (!%p3044_p4)
}
   0xd   :  { %s3138_s14 = smov 64   ;;  %s3139_s15 = smov 4  }
   0xe   :  { %46 = dma.hbm_to_vmem [thread:$0]  %s4341_s3, 1024, %s41_s10, [#allocation6], %s3138_s14, %s3138_s14, %s3139_s15  }
   0xf   :  { %s3056_s18 = scalar_lea.vmem %s27_s12, 2048  ;;  %p3061_p6 = scmp.lt.s32.totalorder %s27_s12, %s27_s12 }
  0x10   :  { %p3057_p5 = scmp.ne.s32.totalorder %s27_s12, %s3056_s18  ;;  %p3062_p7 = scmp.lt.s32.totalorder %s3056_s18, %s3056_s18 }
  0x12   :  { %p3063_p8 = por %p3062_p7, %p3061_p6 }
  0x14   :  { %p3064_p9 = pnand %p3063_p8, %p3057_p5 }
  0x16   :  { %3067 = shalt.err (!%p3064_p9)
}
  0x17   :  { %32 = dma.hbm_to_vmem [thread:$0]  %s4339_s1, 2048, %s27_s12, [#allocation3], %s3138_s14, %s3138_s14, %s3139_s15  }
  0x18   :  { %s3140_s21 = smov [#allocation7]  }
  0x19   :  { %s54_s22 = sshll.u32 %s3140_s21, 4  ;;  %s55_s22 = int_to_ptr.vmem [resolvable:$true] %s54_s22 }
  0x1a   :  { %s3076_s23 = scalar_lea.vmem %s55_s22, 5120  ;;  %p3081_p11 = scmp.lt.s32.totalorder %s55_s22, %s55_s22 }
  0x1b   :  { %p3077_p10 = scmp.ne.s32.totalorder %s55_s22, %s3076_s23  ;;  %p3082_p12 = scmp.lt.s32.totalorder %s3076_s23, %s3076_s23 }
  0x1d   :  { %p3083_p13 = por %p3082_p12, %p3081_p11 }
  0x1f   :  { %p3084_p0 = pnand %p3083_p13, %p3077_p10 }
  0x21   :  { %3087 = shalt.err (!%p3084_p0)
}
  0x22   :  { %s3141_s3 = smov 320   ;;  %s3142_s24 = smov 20  }
  0x23   :  { %60 = dma.hbm_to_vmem [thread:$0]  %s4343_s5, 5120, %s55_s22, [#allocation6], %s3141_s3, %s3141_s3, %s3142_s24  }
  0x24   :  { %3128 = dma.done.wait [#allocation3], 2048  }
  0x25   :  { %3129 = vsyncadd [#allocation3], 4294965248 }
  0x26   :  { %3130 = dma.done.wait [#allocation6], 6144  }
  0x27   :  { %3131 = vsyncadd [#allocation6], 4294961152  ;;  %v2784_v0 = vld [vmem:[#allocation2 + $0x78] sm:$0xff]   ;;  %v2786_v2 = vld [vmem:[#allocation2 + $0x70] sm:$0xff]   ;;  %s3143_s29 = smov 2   ;;  %v3144_v56 = vmov 2  }
  0x28   :  { %v2785_v1 = vld [vmem:[#allocation2 + $0x38] sm:$0xff]   ;;  %2589 = vmatprep.subr.bf16.mxu0 %v2784_v0  ;;  %v2787_v3 = vld [vmem:[#allocation2 + $0x30] sm:$0xff]   ;;  %v2788_v4 = vld [vmem:[#allocation2 + $0x68] sm:$0xff]   ;;  %2771 = vset.pattern.permute.xlu1 %v3144_v56 }
  0x29   :  { %2590 = vmatpush3.bf16.msra.mxu0 %v2785_v1  ;;  %v2789_v5 = vld [vmem:[#allocation2 + $0x28] sm:$0xff]   ;;  %v2790_v6 = vld [vmem:[#allocation2 + $0x60] sm:$0xff]   ;;  %v2792_v8 = vld [vmem:[#allocation2 + $0x58] sm:$0xff]   ;;  %2770 = vset.pattern.permute.xlu0 %v3144_v56 }
  0x2a   :  { %2591 = vmatprep.subr.bf16.mxu0 %v2786_v2  ;;  %v2791_v7 = vld [vmem:[#allocation2 + $0x20] sm:$0xff]   ;;  %v2793_v9 = vld [vmem:[#allocation2 + $0x18] sm:$0xff]   ;;  %v2794_v10 = vld [vmem:[#allocation2 + $0x50] sm:$0xff]  }
  0x2b   :  { %v2802_v11 = vld [vmem:[%s4338_s0 + $0x4] ss:$8 sps:$4 sm:$0xff]   ;;  %v2795_v12 = vld [vmem:[#allocation2 + $0x10] sm:$0xff]   ;;  %v3241_v20 = vld [vmem:[%s4345_s7 + $0x18] sm:$0xff] }
  0x2c   :  { %338 = vmatprep.mubr.bf16.mxu0 %v2802_v11  ;;  %v2796_v13 = vld [vmem:[#allocation2 + $0x48] sm:$0xff]   ;;  %v2798_v15 = vld [vmem:[#allocation2 + $0x40] sm:$0xff]   ;;  %v3229_v18 = vld [vmem:[%s4345_s7 + $0x10] sm:$0xff] }
  0x2d   :  { %2592 = vmatpush3.bf16.msra.mxu0 %v2787_v3  ;;  %v2797_v14 = vld [vmem:[#allocation2 + $0x8] sm:$0xff]   ;;  %v3222_v16 = vld [vmem:[%s4345_s7] sm:$0xff]  ;;  %1293 = vrot.lane.b32.xlu1 %v3229_v18, %s3143_s29  ;;  %v2803_v22 = vld [vmem:[%s4338_s0 + $0x14] ss:$8 sps:$4 sm:$0xff]  }
  0x2e   :  { %2593 = vmatprep.subr.bf16.mxu0 %v2788_v4  ;;  %v2799_v17 = vld [vmem:[#allocation2] sm:$0xff]   ;;  %1289 = vrot.lane.b32.xlu0 %v3222_v16, %s3143_s29  ;;  %v3234_v19 = vld [vmem:[%s4345_s7 + $0x8] sm:$0xff]  ;;  %v2824_v25 = vld [vmem:[#allocation5 + $0x38] sm:$0xff]  }
  0x2f   :  { %v2800_v21 = vld [vmem:[%s4338_s0] ss:$8 sps:$4 sm:$0xff]   ;;  %v2825_v26 = vld [vmem:[#allocation5 + $0x30] sm:$0xff]   ;;  %2685 = vmatprep.subr.bf16.mxu1 %v2824_v25  ;;  %v3273_v28 = vld [vmem:[%s4345_s7 + $0x38] sm:$0xff] }
  0x30   :  { %v3254_v23 = vld [vmem:[%s4345_s7 + $0x20] sm:$0xff]  ;;  %v3259_v24 = vld [vmem:[%s4345_s7 + $0x28] sm:$0xff]  ;;  %v3266_v27 = vld [vmem:[%s4345_s7 + $0x30] sm:$0xff]  ;;  %2686 = vmatpush3.bf16.msra.mxu1 %v2824_v25 }
  0x31   :  { %2594 = vmatpush3.bf16.msra.mxu0 %v2789_v5  ;;  %1295 = vrot.lane.b32.xlu1 %v3241_v20, %s3143_s29  ;;  %v2826_v29 = vld [vmem:[#allocation5 + $0x28] sm:$0xff]   ;;  %v2805_v30 = vld [vmem:[%s4338_s0 + $0x10] ss:$8 sps:$4 sm:$0xff]   ;;  %v3286_v32 = vld [vmem:[%s4345_s7 + $0x40] sm:$0xff] }
  0x32   :  { %2595 = vmatprep.subr.bf16.mxu0 %v2790_v6  ;;  %1291 = vrot.lane.b32.xlu0 %v3234_v19, %s3143_s29  ;;  %v2806_v31 = vld [vmem:[%s4338_s0 + $0x24] ss:$8 sps:$4 sm:$0xff]   ;;  %v3300_v34 = vld [vmem:[%s4345_s7 + $0x50] sm:$0xff]  ;;  %v3307_v35 = vld [vmem:[%s4345_s7 + $0x58] sm:$0xff] }
  0x33   :  { %2687 = vmatprep.subr.bf16.mxu1 %v2825_v26  ;;  %v3293_v33 = vld [vmem:[%s4345_s7 + $0x48] sm:$0xff]  ;;  %v2809_v37 = vld [vmem:[%s4338_s0 + $0x34] ss:$8 sps:$4 sm:$0xff]   ;;  %v3320_v38 = vld [vmem:[%s4345_s7 + $0x60] sm:$0xff] }
  0x34   :  { %2688 = vmatpush3.bf16.msra.mxu1 %v2825_v26  ;;  %v2808_v36 = vld [vmem:[%s4338_s0 + $0x20] ss:$8 sps:$4 sm:$0xff]   ;;  %v3334_v40 = vld [vmem:[%s4345_s7 + $0x70] sm:$0xff]  ;;  %v3341_v41 = vld [vmem:[%s4345_s7 + $0x78] sm:$0xff] }
  0x35   :  { %2596 = vmatpush3.bf16.msra.mxu0 %v2791_v7  ;;  %1299 = vrot.lane.b32.xlu1 %v3259_v24, %s3143_s29  ;;  %v3327_v39 = vld [vmem:[%s4345_s7 + $0x68] sm:$0xff]  ;;  %v2811_v42 = vld [vmem:[%s4338_s0 + $0x30] ss:$8 sps:$4 sm:$0xff]   ;;  %v2815_v45 = vld [vmem:[%s4338_s0 + $0x54] ss:$8 sps:$4 sm:$0xff]  }
  0x36   :  { %2597 = vmatprep.subr.bf16.mxu0 %v2792_v8  ;;  %1297 = vrot.lane.b32.xlu0 %v3254_v23, %s3143_s29  ;;  %v2812_v43 = vld [vmem:[%s4338_s0 + $0x44] ss:$8 sps:$4 sm:$0xff]   ;;  %v2814_v44 = vld [vmem:[%s4338_s0 + $0x40] ss:$8 sps:$4 sm:$0xff]   ;;  %v2817_v46 = vld [vmem:[%s4338_s0 + $0x50] ss:$8 sps:$4 sm:$0xff]  }
  0x37   :  { %2689 = vmatprep.subr.bf16.mxu1 %v2826_v29  ;;  %v2818_v47 = vld [vmem:[%s4338_s0 + $0x64] ss:$8 sps:$4 sm:$0xff]   ;;  %v2820_v48 = vld [vmem:[%s4338_s0 + $0x60] ss:$8 sps:$4 sm:$0xff]   ;;  %v2821_v49 = vld [vmem:[%s4338_s0 + $0x74] ss:$8 sps:$4 sm:$0xff]  }
  0x38   :  { %2690 = vmatpush3.bf16.msra.mxu1 %v2826_v29  ;;  %v2823_v50 = vld [vmem:[%s4338_s0 + $0x70] ss:$8 sps:$4 sm:$0xff]   ;;  %v2827_v51 = vld [vmem:[#allocation5 + $0x20] sm:$0xff]   ;;  %v2830_v54 = vld [vmem:[#allocation5 + $0x8] sm:$0xff]   ;;  %s3146_s0 = smov 126  }
  0x39   :  { %2598 = vmatpush3.bf16.msra.mxu0 %v2793_v9  ;;  %1303 = vrot.lane.b32.xlu1 %v3273_v28, %s3143_s29  ;;  %v2828_v52 = vld [vmem:[#allocation5 + $0x18] sm:$0xff]   ;;  %v2829_v53 = vld [vmem:[#allocation5 + $0x10] sm:$0xff]   ;;  %v2831_v55 = vld [vmem:[#allocation5] sm:$0xff]  }
  0x3a   :  { %2599 = vmatprep.subr.bf16.mxu0 %v2794_v10  ;;  %1301 = vrot.lane.b32.xlu0 %v3266_v27, %s3143_s29  ;;  %v2855_v56 = vld [vmem:[#allocation7 + $0xac] ss:$20 sps:$4 sm:$0xff]  }
  0x3b   :  { %2691 = vmatprep.subr.bf16.mxu1 %v2827_v51 }
  0x3c   :  { %2692 = vmatpush3.bf16.msra.mxu1 %v2827_v51  ;;  %v2849_v51 = vld [vmem:[#allocation7 + $0xd4] ss:$20 sps:$4 sm:$0xff]  }
  0x3d   :  { %2600 = vmatpush3.bf16.msra.mxu0 %v2795_v12  ;;  %1307 = vrot.lane.b32.xlu1 %v3293_v33, %s3143_s29 }
  0x3e   :  { %2601 = vmatprep.subr.bf16.mxu0 %v2796_v13  ;;  %1305 = vrot.lane.b32.xlu0 %v3286_v32, %s3143_s29 }
  0x3f   :  { %2693 = vmatprep.subr.bf16.mxu1 %v2828_v52 }
  0x40   :  { %2694 = vmatpush3.bf16.msra.mxu1 %v2828_v52 }
  0x41   :  { %2602 = vmatpush3.bf16.msra.mxu0 %v2797_v14  ;;  %1311 = vrot.lane.b32.xlu1 %v3307_v35, %s3143_s29 }
  0x42   :  { %2603 = vmatprep.subr.bf16.mxu0 %v2798_v15  ;;  %1309 = vrot.lane.b32.xlu0 %v3300_v34, %s3143_s29 }
  0x43   :  { %2695 = vmatprep.subr.bf16.mxu1 %v2829_v53 }
  0x44   :  { %2696 = vmatpush3.bf16.msra.mxu1 %v2829_v53  ;;  %v3147_v53 = vmov 0  }
  0x45   :  { %2604 = vmatpush3.bf16.msra.mxu0 %v2799_v17  ;;  %1315 = vrot.lane.b32.xlu1 %v3327_v39, %s3143_s29 }
  0x46   :  { %1313 = vrot.lane.b32.xlu0 %v3320_v38, %s3143_s29  ;;  %2697 = vmatprep.subr.bf16.mxu1 %v2830_v54 }
  0x48   :  { %339 = vmatmul.mubr.bf16.vlgmr.msra.gmra.mxu0 %v2800_v21  ;;  %2698 = vmatpush3.bf16.msra.mxu1 %v2830_v54 }
  0x49   :  { %346 = vmatprep.mubr.bf16.mxu0 %v2803_v22  ;;  %1319 = vrot.lane.b32.xlu1 %v3341_v41, %s3143_s29 }
  0x4a   :  { %1317 = vrot.lane.b32.xlu0 %v3334_v40, %s3143_s29  ;;  %2699 = vmatprep.subr.bf16.mxu1 %v2831_v55 }
  0x4c   :  { %2700 = vmatpush3.bf16.msra.mxu1 %v2831_v55  ;;  %v2853_v55 = vld [vmem:[#allocation7 + $0xa8] ss:$20 sps:$4 sm:$0xff]  }
  0x50   :  { %347 = vmatmul.mubr.bf16.gmra.mxu0 %v2805_v30 }
  0x51   :  { %354 = vmatprep.mubr.bf16.mxu0 %v2806_v31 }
  0x58   :  { %355 = vmatmul.mubr.bf16.gmra.mxu0 %v2808_v36 }
  0x59   :  { %362 = vmatprep.mubr.bf16.mxu0 %v2809_v37  ;;  %v3145_v37 = vmov 3  }
  0x60   :  { %363 = vmatmul.mubr.bf16.gmra.mxu0 %v2811_v42  ;;  %v2834_v42 = vld [vmem:[#allocation7 + $0x11c] ss:$20 sps:$4 sm:$0xff]  }
  0x61   :  { %370 = vmatprep.mubr.bf16.mxu0 %v2812_v43  ;;  %902 = vmatprep.subr.bf16.mxu1 %v2834_v42  ;;  %v2835_v43 = vld [vmem:[#allocation7 + $0x120] ss:$20 sps:$4 sm:$0xff]  }
  0x68   :  { %371 = vmatmul.mubr.bf16.gmra.mxu0 %v2814_v44  ;;  %v2837_v44 = vld [vmem:[#allocation7 + $0x124] ss:$20 sps:$4 sm:$0xff]  }
  0x69   :  { %378 = vmatprep.mubr.bf16.mxu0 %v2815_v45  ;;  %1015 = vmatprep.subr.bf16.mxu0 %v2837_v44  ;;  %v3148_v44 = vmov 5  }
  0x6a   :  { %1016 = vmatpush1.bf16.msra.mxu0 %v2835_v43 }
  0x70   :  { %379 = vmatmul.mubr.bf16.gmra.mxu0 %v2817_v46  ;;  %v2841_v46 = vld [vmem:[#allocation7 + $0xf8] ss:$20 sps:$4 sm:$0xff]  }
  0x71   :  { %386 = vmatprep.mubr.bf16.mxu0 %v2818_v47  ;;  %v2843_v47 = vld [vmem:[#allocation7 + $0xfc] ss:$20 sps:$4 sm:$0xff]  }
  0x72   :  { %1017 = vmatprep.subr.bf16.mxu0 %v2843_v47 }
  0x73   :  { %1018 = vmatpush1.bf16.msra.mxu0 %v2841_v46 }
  0x74   :  { %1019 = vmatprep.subr.bf16.mxu0 %v2849_v51  ;;  %v2840_v51 = vld [vmem:[#allocation7 + $0xf4] ss:$20 sps:$4 sm:$0xff]  }
  0x78   :  { %387 = vmatmul.mubr.bf16.gmra.mxu0 %v2820_v48 }
  0x79   :  { %394 = vmatprep.mubr.bf16.mxu0 %v2821_v49 }
  0x80   :  { %395 = vmatmul.mubr.bf16.gmra.mxu0 %v2823_v50  ;;  %v2847_v50 = vld [vmem:[#allocation7 + $0xd0] ss:$20 sps:$4 sm:$0xff]  }
  0x81   :  { %1047 = vmatprep.mubr.bf16.mxu0 %v3147_v53  ;;  %1020 = vmatpush1.bf16.msra.mxu0 %v2847_v50 }
  0x82   :  { %1021 = vmatprep.subr.bf16.mxu0 %v2855_v56 }
  0x85   :  { %1022 = vmatpush1.bf16.msra.mxu0 %v2853_v55 }
  0x9f   :  { %v1294_v59 = vpop.permute.xlu1 %1293 }
  0xa0   :  { %v1290_v57 = vpop.permute.xlu0 %1289  ;;  %v3388_v0 = vsub.f32 %v3229_v18, %v1294_v59  ;;  %v2859_v59 = vld [vmem:[#allocation7 + $0x80] ss:$20 sps:$4 sm:$0xff]  }
  0xa1   :  { %v3377_v58 = vsub.f32 %v3222_v16, %v1290_v57 }
  0xa2   :  { %v1355_v48 = vmul.f32 0.5, %v3388_v0 }
  0xa3   :  { %1451 = vperm.xlu0 %2770, %v3377_v58   ;;  %v1296_v62 = vpop.permute.xlu1 %1295  ;;  %v1353_v45 = vmul.f32 0.5, %v3377_v58 }
  0xa4   :  { %v1292_v60 = vpop.permute.xlu0 %1291  ;;  %v3384_v63 = vsub.f32 %v3241_v20, %v1296_v62 }
  0xa5   :  { %v3381_v61 = vsub.f32 %v3234_v19, %v1292_v60  ;;  %v2861_v60 = vld [vmem:[#allocation7 + $0x84] ss:$20 sps:$4 sm:$0xff]  }
  0xa6   :  { %v1356_v54 = vmul.f32 0.5, %v3384_v63  ;;  %1023 = vmatprep.subr.bf16.mxu0 %v2861_v60 }
  0xa7   :  { %1456 = vperm.xlu1 %2771, %v3381_v61   ;;  %1466 = vperm.xlu0 %2770, %v3384_v63   ;;  %v1300_v2 = vpop.permute.xlu1 %1299  ;;  %v1354_v49 = vmul.f32 0.5, %v3381_v61 }
  0xa8   :  { %v1298_v1 = vpop.permute.xlu0 %1297  ;;  %v3392_v3 = vsub.f32 %v3259_v24, %v1300_v2  ;;  %1024 = vmatpush1.bf16.msra.mxu0 %v2859_v59  ;;  %v2846_v59 = vld [vmem:[#allocation7 + $0xcc] ss:$20 sps:$4 sm:$0xff]  }
  0xa9   :  { %v3396_v4 = vsub.f32 %v3254_v23, %v1298_v1 }
  0xab   :  { %1461 = vperm.xlu1 %2771, %v3388_v0   ;;  %1476 = vperm.xlu0 %2770, %v3392_v3   ;;  %v1304_v6 = vpop.permute.xlu1 %1303  ;;  %v1357_v52 = vmul.f32 0.5, %v3396_v4 }
  0xac   :  { %v1302_v5 = vpop.permute.xlu0 %1301  ;;  %v3400_v7 = vsub.f32 %v3273_v28, %v1304_v6 }
  0xad   :  { %v3404_v8 = vsub.f32 %v3266_v27, %v1302_v5 }
  0xae   :  { %v1360_v62 = vmul.f32 0.5, %v3400_v7 }
  0xaf   :  { %1471 = vperm.xlu1 %2771, %v3396_v4   ;;  %1486 = vperm.xlu0 %2770, %v3400_v7   ;;  %v1308_v10 = vpop.permute.xlu1 %1307  ;;  %v1359_v57 = vmul.f32 0.5, %v3404_v8 }
  0xb0   :  { %v1306_v9 = vpop.permute.xlu0 %1305  ;;  %v3408_v11 = vsub.f32 %v3293_v33, %v1308_v10 }
  0xb1   :  { %v3412_v12 = vsub.f32 %v3286_v32, %v1306_v9  ;;  %v3485_v9 = vld [vmem:[%s4340_s2] ss:$0 sm:$0xff] }
  0xb3   :  { %1481 = vperm.xlu1 %2771, %v3404_v8   ;;  %1496 = vperm.xlu0 %2770, %v3408_v11   ;;  %v1312_v14 = vpop.permute.xlu1 %1311 }
  0xb4   :  { %v1310_v13 = vpop.permute.xlu0 %1309  ;;  %v3416_v15 = vsub.f32 %v3307_v35, %v1312_v14 }
  0xb5   :  { %v3420_v17 = vsub.f32 %v3300_v34, %v1310_v13 }
  0xb6   :  { %v1364_v2 = vmul.f32 0.5, %v3416_v15 }
  0xb7   :  { %1491 = vperm.xlu1 %2771, %v3412_v12   ;;  %1506 = vperm.xlu0 %2770, %v3416_v15   ;;  %v1316_v22 = vpop.permute.xlu1 %1315 }
  0xb8   :  { %v1314_v21 = vpop.permute.xlu0 %1313  ;;  %v3424_v25 = vsub.f32 %v3327_v39, %v1316_v22 }
  0xb9   :  { %v3428_v26 = vsub.f32 %v3320_v38, %v1314_v21 }
  0xbb   :  { %1501 = vperm.xlu1 %2771, %v3420_v17   ;;  %1516 = vperm.xlu0 %2770, %v3424_v25   ;;  %v1320_v30 = vpop.permute.xlu1 %1319  ;;  %v1365_v1 = vmul.f32 0.5, %v3428_v26 }
  0xbc   :  { %v1318_v29 = vpop.permute.xlu0 %1317  ;;  %v3432_v31 = vsub.f32 %v3341_v41, %v1320_v30 }
  0xbd   :  { %v3436_v36 = vsub.f32 %v3334_v40, %v1318_v29 }
  0xbf   :  { %1511 = vperm.xlu1 %2771, %v3428_v26   ;;  %1526 = vperm.xlu0 %2770, %v3432_v31  }
  0xc3   :  { %1521 = vperm.xlu1 %2771, %v3436_v36   ;;  %2772 = vset.pattern.permute.xlu0 %v3145_v37 }
  0xc4   :  { %1642 = vperm.xlu0 %2772, %v3377_v58   ;;  %v1358_v58 = vmul.f32 0.5, %v3392_v3 }
  0xc7   :  { %2773 = vset.pattern.permute.xlu1 %v3145_v37 }
  0xc8   :  { %1646 = vperm.xlu1 %2773, %v3381_v61   ;;  %1654 = vperm.xlu0 %2772, %v3384_v63   ;;  %v1361_v61 = vmul.f32 0.5, %v3412_v12  ;;  %v1363_v63 = vmul.f32 0.5, %v3420_v17 }
  0xcc   :  { %1650 = vperm.xlu1 %2773, %v3388_v0   ;;  %1662 = vperm.xlu0 %2772, %v3392_v3   ;;  %v1362_v0 = vmul.f32 0.5, %v3408_v11 }
  0xd0   :  { %1658 = vperm.xlu1 %2773, %v3396_v4   ;;  %1670 = vperm.xlu0 %2772, %v3400_v7   ;;  %v1367_v4 = vmul.f32 0.5, %v3436_v36  ;;  %v1366_v7 = vmul.f32 0.5, %v3424_v25 }
  0xd4   :  { %1666 = vperm.xlu1 %2773, %v3404_v8   ;;  %1678 = vperm.xlu0 %2772, %v3408_v11  }
  0xd8   :  { %1674 = vperm.xlu1 %2773, %v3412_v12   ;;  %1686 = vperm.xlu0 %2772, %v3416_v15  }
  0xdc   :  { %1682 = vperm.xlu1 %2773, %v3420_v17   ;;  %1385 = vrot.lane.b32.xlu0 %v1353_v45, %s3146_s0 }
  0xe0   :  { %1690 = vperm.xlu1 %2773, %v3428_v26   ;;  %1389 = vrot.lane.b32.xlu0 %v1355_v48, %s3146_s0  ;;  %v1368_v26 = vmul.f32 0.5, %v3432_v31 }
  0xe4   :  { %1387 = vrot.lane.b32.xlu1 %v1354_v49, %s3146_s0  ;;  %1393 = vrot.lane.b32.xlu0 %v1357_v52, %s3146_s0  ;;  %v2832_v49 = vld [vmem:[#allocation7 + $0x118] ss:$20 sps:$4 sm:$0xff]  }
  0xe8   :  { %1391 = vrot.lane.b32.xlu1 %v1356_v54, %s3146_s0  ;;  %1397 = vrot.lane.b32.xlu0 %v1359_v57, %s3146_s0  ;;  %v2838_v57 = vld [vmem:[#allocation7 + $0xf0] ss:$20 sps:$4 sm:$0xff]  }
  0xec   :  { %1395 = vrot.lane.b32.xlu1 %v1358_v58, %s3146_s0  ;;  %1401 = vrot.lane.b32.xlu0 %v1361_v61, %s3146_s0 }
  0xf0   :  { %1399 = vrot.lane.b32.xlu1 %v1360_v62, %s3146_s0  ;;  %1405 = vrot.lane.b32.xlu0 %v1363_v63, %s3146_s0 }
  0xf4   :  { %1403 = vrot.lane.b32.xlu1 %v1362_v0, %s3146_s0  ;;  %1409 = vrot.lane.b32.xlu0 %v1365_v1, %s3146_s0  ;;  %v2844_v1 = vld [vmem:[#allocation7 + $0xc8] ss:$20 sps:$4 sm:$0xff]  }
  0xf8   :  { %1407 = vrot.lane.b32.xlu1 %v1364_v2, %s3146_s0  ;;  %1413 = vrot.lane.b32.xlu0 %v1367_v4, %s3146_s0 }
  0xfc   :  { %1411 = vrot.lane.b32.xlu1 %v1366_v7, %s3146_s0  ;;  %1694 = vperm.xlu0 %2772, %v3424_v25  }
 0x100   :  { %1698 = vperm.xlu1 %2773, %v3436_v36   ;;  %1702 = vperm.xlu0 %2772, %v3432_v31  }
 0x104   :  { %1415 = vrot.lane.b32.xlu1 %v1368_v26, %s3146_s0  ;;  %2774 = vset.pattern.permute.xlu0 %v3148_v44 }
 0x105   :  { %2775 = vset.pattern.permute.xlu1 %v3148_v44  ;;  %1946 = vperm.xlu0 %2774, %v3222_v16  }
 0x108   :  { %v2605_v3 = vpop.f32.mrf.mxu0  ;;  %1950 = vperm.xlu1 %2775, %v3234_v19  }
 0x109   :  { %1958 = vperm.xlu0 %2774, %v3241_v20  }
 0x10a   :  { %v2606_v5 = vpop.f32.mrf.mxu0 }
 0x10b   :  { %v2607_v6 = vadd.f32 %v2606_v5, %v2605_v3  ;;  %v2852_v3 = vld [vmem:[#allocation7 + $0xa4] ss:$20 sps:$4 sm:$0xff]  }
 0x10c   :  { %v2608_v8 = vpop.f32.mrf.mxu0  ;;  %1954 = vperm.xlu1 %2775, %v3229_v18  }
 0x10d   :  { %v341_v12 = vadd.f32 %v2607_v6, %v3485_v9  ;;  %1966 = vperm.xlu0 %2774, %v3259_v24  }
 0x10e   :  { %v2609_v10 = vpop.f32.mrf.mxu0 }
 0x10f   :  { %v2610_v11 = vadd.f32 %v2609_v10, %v2608_v8  ;;  %v403_v21 = vmax.f32 %v341_v12, 0.0  ;;  %v2850_v8 = vld [vmem:[#allocation7 + $0xa0] ss:$20 sps:$4 sm:$0xff]  }
 0x110   :  { %v2611_v13 = vpop.f32.mrf.mxu0  ;;  %1962 = vperm.xlu1 %2775, %v3254_v23  }
 0x111   :  { %v344_v14 = vadd.f32 %v2610_v11, %v3485_v9  ;;  %1974 = vperm.xlu0 %2774, %v3273_v28   ;;  %v2858_v11 = vld [vmem:[#allocation7 + $0x7c] ss:$20 sps:$4 sm:$0xff]  }
 0x112   :  { %v2612_v15 = vpop.f32.mrf.mxu0 }
 0x113   :  { %v2613_v17 = vadd.f32 %v2612_v15, %v2611_v13  ;;  %v404_v22 = vmax.f32 %v344_v14, 0.0 }
 0x114   :  { %v2614_v29 = vpop.f32.mrf.mxu0  ;;  %1970 = vperm.xlu1 %2775, %v3266_v27  }
 0x115   :  { %v419_v30 = vpack.c.bf16 %v404_v22, %v403_v21  ;;  %v349_v42 = vadd.f32 %v2613_v17, %v3485_v9  ;;  %1978 = vperm.xlu0 %2774, %v3286_v32   ;;  %v2856_v21 = vld [vmem:[#allocation7 + $0x78] ss:$20 sps:$4 sm:$0xff]  }
 0x116   :  { %v2615_v37 = vpop.f32.mrf.mxu0 }
 0x117   :  { %v2616_v43 = vadd.f32 %v2615_v37, %v2614_v29  ;;  %2701 = vmatprep.mubr.bf16.mxu1 %v419_v30  ;;  %v405_v31 = vmax.f32 %v349_v42, 0.0 }
 0x118   :  { %v2617_v25 = vpop.f32.mrf.mxu0  ;;  %1982 = vperm.xlu1 %2775, %v3293_v33  }
 0x119   :  { %v352_v36 = vadd.f32 %v2616_v43, %v3485_v9  ;;  %1990 = vperm.xlu0 %2774, %v3307_v35  }
 0x11a   :  { %v2618_v45 = vpop.f32.mrf.mxu0 }
 0x11b   :  { %v406_v46 = vmax.f32 %v352_v36, 0.0  ;;  %v2619_v47 = vadd.f32 %v2618_v45, %v2617_v25 }
 0x11c   :  { %v2620_v48 = vpop.f32.mrf.mxu0  ;;  %1986 = vperm.xlu1 %2775, %v3300_v34  }
 0x11d   :  { %v420_v50 = vpack.c.bf16 %v406_v46, %v405_v31  ;;  %v357_v54 = vadd.f32 %v2619_v47, %v3485_v9  ;;  %2777 = vset.pattern.permute.xlu0 %v3147_v53 }
 0x11e   :  { %v2621_v52 = vpop.f32.mrf.mxu0  ;;  %v3518_v43 = vpop.permute.xlu0 %1451 }
 0x11f   :  { %v2622_v55 = vadd.f32 %v2621_v52, %v2620_v48  ;;  %2702 = vmatmul.mubr.bf16.vlgmr.msra.gmra.mxu1 %v420_v50  ;;  %v407_v61 = vmax.f32 %v357_v54, 0.0 }
 0x120   :  { %v2623_v56 = vpop.f32.mrf.mxu0  ;;  %903 = vmatpush1.bf16.msra.mxu1 %v2832_v49  ;;  %1994 = vperm.xlu1 %2775, %v3320_v38  }
 0x121   :  { %v360_v58 = vadd.f32 %v2622_v55, %v3485_v9  ;;  %904 = vmatprep.subr.bf16.mxu1 %v2840_v51 }
 0x122   :  { %v2624_v60 = vpop.f32.mrf.mxu0  ;;  %v3522_v48 = vpop.permute.xlu1 %1456 }
 0x123   :  { %v408_v62 = vmax.f32 %v360_v58, 0.0  ;;  %v2625_v63 = vadd.f32 %v2624_v60, %v2623_v56  ;;  %v3524_v50 = vpop.permute.xlu0 %1466 }
 0x124   :  { %v2626_v0 = vpop.f32.mrf.mxu0  ;;  %905 = vmatpush1.bf16.msra.mxu1 %v2838_v57  ;;  %2776 = vset.pattern.permute.xlu1 %v3147_v53 }
 0x125   :  { %v421_v2 = vpack.c.bf16 %v408_v62, %v407_v61  ;;  %906 = vmatprep.subr.bf16.mxu1 %v2846_v59  ;;  %v365_v5 = vadd.f32 %v2625_v63, %v3485_v9 }
 0x126   :  { %v2627_v4 = vpop.f32.mrf.mxu0  ;;  %v3529_v56 = vpop.permute.xlu1 %1461 }
 0x127   :  { %v2628_v6 = vadd.f32 %v2627_v4, %v2626_v0  ;;  %2705 = vmatprep.mubr.bf16.mxu1 %v421_v2  ;;  %v409_v13 = vmax.f32 %v365_v5, 0.0  ;;  %v3531_v58 = vpop.permute.xlu0 %1476 }
 0x128   :  { %v2629_v7 = vpop.f32.mrf.mxu0  ;;  %907 = vmatpush1.bf16.msra.mxu1 %v2844_v1 }
 0x129   :  { %v368_v10 = vadd.f32 %v2628_v6, %v3485_v9  ;;  %908 = vmatprep.subr.bf16.mxu1 %v2852_v3 }
 0x12a   :  { %v2630_v12 = vpop.f32.mrf.mxu0  ;;  %v3533_v0 = vpop.permute.xlu1 %1471 }
 0x12b   :  { %v410_v14 = vmax.f32 %v368_v10, 0.0  ;;  %v2631_v15 = vadd.f32 %v2630_v12, %v2629_v7  ;;  %v3535_v2 = vpop.permute.xlu0 %1486 }
 0x12c   :  { %v2632_v17 = vpop.f32.mrf.mxu0  ;;  %909 = vmatpush1.bf16.msra.mxu1 %v2850_v8 }
 0x12d   :  { %v422_v22 = vpack.c.bf16 %v410_v14, %v409_v13  ;;  %910 = vmatprep.subr.bf16.mxu1 %v2858_v11  ;;  %v373_v29 = vadd.f32 %v2631_v15, %v3485_v9 }
 0x12e   :  { %v2633_v26 = vpop.f32.mrf.mxu0  ;;  %v3539_v7 = vpop.permute.xlu1 %1481 }
 0x12f   :  { %v2634_v30 = vadd.f32 %v2633_v26, %v2632_v17  ;;  %2706 = vmatmul.mubr.bf16.gmra.mxu1 %v422_v22  ;;  %v411_v36 = vmax.f32 %v373_v29, 0.0  ;;  %v3541_v10 = vpop.permute.xlu0 %1496 }
 0x130   :  { %v2635_v37 = vpop.f32.mrf.mxu0  ;;  %911 = vmatpush1.bf16.msra.mxu1 %v2856_v21  ;;  %4388 = vst [vmem:[#allocation15_spill] sm:$0xff] %v3541_v10 }
 0x131   :  { %v376_v42 = vadd.f32 %v2634_v30, %v3485_v9 }
 0x132   :  { %v2636_v25 = vpop.f32.mrf.mxu0  ;;  %v3543_v17 = vpop.permute.xlu1 %1491 }
 0x133   :  { %v412_v45 = vmax.f32 %v376_v42, 0.0  ;;  %v2637_v31 = vadd.f32 %v2636_v25, %v2635_v37  ;;  %v3545_v22 = vpop.permute.xlu0 %1506 }
 0x134   :  { %v2638_v46 = vpop.f32.mrf.mxu0  ;;  %4389 = vst [vmem:[#allocation16_spill] sm:$0xff] %v3545_v22 }
 0x135   :  { %v423_v47 = vpack.c.bf16 %v412_v45, %v411_v36  ;;  %v381_v51 = vadd.f32 %v2637_v31, %v3485_v9 }
 0x136   :  { %v2639_v49 = vpop.f32.mrf.mxu0  ;;  %v3549_v37 = vpop.permute.xlu1 %1501 }
 0x137   :  { %v2640_v52 = vadd.f32 %v2639_v49, %v2638_v46  ;;  %2709 = vmatprep.mubr.bf16.mxu1 %v423_v47  ;;  %v413_v59 = vmax.f32 %v381_v51, 0.0  ;;  %4390 = vst [vmem:[#allocation17_spill] sm:$0xff] %v3549_v37  ;;  %v3551_v42 = vpop.permute.xlu0 %1516 }
 0x138   :  { %v2641_v54 = vpop.f32.mrf.mxu0  ;;  %4391 = vst [vmem:[#allocation18_spill] sm:$0xff] %v3551_v42 }
 0x139   :  { %v384_v55 = vadd.f32 %v2640_v52, %v3485_v9 }
 0x13a   :  { %v2642_v57 = vpop.f32.mrf.mxu0  ;;  %v3553_v31 = vpop.permute.xlu1 %1511 }
 0x13b   :  { %v414_v60 = vmax.f32 %v384_v55, 0.0  ;;  %v2643_v61 = vadd.f32 %v2642_v57, %v2641_v54  ;;  %4392 = vst [vmem:[#allocation19_spill] sm:$0xff] %v3553_v31  ;;  %v3555_v46 = vpop.permute.xlu0 %1526  ;;  %v2864_v57 = vld [vmem:[#allocation7 + $0x54] ss:$20 sps:$4 sm:$0xff]  }
 0x13c   :  { %v2644_v62 = vpop.f32.mrf.mxu0  ;;  %4393 = vst [vmem:[#allocation20_spill] sm:$0xff] %v3555_v46  ;;  %912 = vmatprep.subr.bf16.mxu1 %v2864_v57 }
 0x13d   :  { %v424_v63 = vpack.c.bf16 %v414_v60, %v413_v59  ;;  %v389_v3 = vadd.f32 %v2643_v61, %v3485_v9  ;;  %v2867_v59 = vld [vmem:[#allocation7 + $0x5c] ss:$20 sps:$4 sm:$0xff]  }
 0x13e   :  { %v2645_v1 = vpop.f32.mrf.mxu0  ;;  %v3558_v47 = vpop.permute.xlu1 %1521  ;;  %v2862_v61 = vld [vmem:[#allocation7 + $0x50] ss:$20 sps:$4 sm:$0xff]   ;;  %1025 = vmatprep.subr.bf16.mxu0 %v2867_v59 }
 0x13f   :  { %v2646_v4 = vadd.f32 %v2645_v1, %v2644_v62  ;;  %2710 = vmatmul.mubr.bf16.gmra.mxu1 %v424_v63  ;;  %v415_v11 = vmax.f32 %v389_v3, 0.0  ;;  %4394 = vst [vmem:[#allocation21_spill] sm:$0xff] %v3558_v47  ;;  %v3560_v49 = vpop.permute.xlu0 %1642  ;;  %v2865_v62 = vld [vmem:[#allocation7 + $0x58] ss:$20 sps:$4 sm:$0xff]   ;;  %v2873_v3 = vld [vmem:[#allocation7 + $0x34] ss:$20 sps:$4 sm:$0xff]  }
 0x140   :  { %v2647_v5 = vpop.f32.mrf.mxu0  ;;  %4395 = vst [vmem:[#allocation22_spill] sm:$0xff] %v3560_v49  ;;  %913 = vmatpush1.bf16.msra.mxu1 %v2862_v61  ;;  %1026 = vmatpush1.bf16.msra.mxu0 %v2865_v62  ;;  %v2870_v1 = vld [vmem:[#allocation7 + $0x2c] ss:$20 sps:$4 sm:$0xff]  }
 0x141   :  { %v392_v6 = vadd.f32 %v2646_v4, %v3485_v9  ;;  %914 = vmatprep.subr.bf16.mxu1 %v2870_v1  ;;  %1027 = vmatprep.subr.bf16.mxu0 %v2873_v3 }
 0x142   :  { %v2648_v8 = vpop.f32.mrf.mxu0 }
 0x143   :  { %v416_v12 = vmax.f32 %v392_v6, 0.0  ;;  %v2649_v13 = vadd.f32 %v2648_v8, %v2647_v5  ;;  %v3562_v51 = vpop.permute.xlu1 %1646  ;;  %v2868_v5 = vld [vmem:[#allocation7 + $0x28] ss:$20 sps:$4 sm:$0xff]   ;;  %v2871_v6 = vld [vmem:[#allocation7 + $0x30] ss:$20 sps:$4 sm:$0xff]  }
 0x144   :  { %v2650_v14 = vpop.f32.mrf.mxu0  ;;  %4396 = vst [vmem:[#allocation23_spill] sm:$0xff] %v3562_v51  ;;  %915 = vmatpush1.bf16.msra.mxu1 %v2868_v5  ;;  %1028 = vmatpush1.bf16.msra.mxu0 %v2871_v6 }
 0x145   :  { %v425_v15 = vpack.c.bf16 %v416_v12, %v415_v11  ;;  %v397_v26 = vadd.f32 %v2649_v13, %v3485_v9  ;;  %v2876_v11 = vld [vmem:[#allocation7 + $0x4] ss:$20 sps:$4 sm:$0xff]   ;;  %v2879_v12 = vld [vmem:[#allocation7 + $0xc] ss:$20 sps:$4 sm:$0xff]  }
 0x146   :  { %v2651_v21 = vpop.f32.mrf.mxu0  ;;  %916 = vmatprep.subr.bf16.mxu1 %v2876_v11  ;;  %1029 = vmatprep.subr.bf16.mxu0 %v2879_v12 }
 0x147   :  { %v2652_v29 = vadd.f32 %v2651_v21, %v2650_v14  ;;  %2713 = vmatprep.mubr.bf16.mxu1 %v425_v15  ;;  %v417_v25 = vmax.f32 %v397_v26, 0.0  ;;  %v3566_v52 = vpop.permute.xlu1 %1650  ;;  %v2874_v14 = vld [vmem:[#allocation7] ss:$20 sps:$4 sm:$0xff]   ;;  %v2877_v15 = vld [vmem:[#allocation7 + $0x8] ss:$20 sps:$4 sm:$0xff]  }
 0x148   :  { %4397 = vst [vmem:[#allocation24_spill] sm:$0xff] %v3566_v52  ;;  %917 = vmatpush1.bf16.msra.mxu1 %v2874_v14  ;;  %1030 = vmatpush1.bf16.msra.mxu0 %v2877_v15 }
 0x149   :  { %v400_v30 = vadd.f32 %v2652_v29, %v3485_v9  ;;  %v3564_v9 = vpop.permute.xlu0 %1654 }
 0x14b   :  { %v418_v36 = vmax.f32 %v400_v30, 0.0  ;;  %v3570_v55 = vpop.permute.xlu1 %1658 }
 0x14d   :  { %v426_v45 = vpack.c.bf16 %v418_v36, %v417_v25  ;;  %v3568_v54 = vpop.permute.xlu0 %1662 }
 0x14f   :  { %2714 = vmatmul.mubr.bf16.gmra.mxu1 %v426_v45  ;;  %v3574_v63 = vpop.permute.xlu1 %1666 }
 0x150   :  { %934 = vmatprep.mubr.bf16.mxu1 %v3147_v53 }
 0x151   :  { %v3572_v60 = vpop.permute.xlu0 %1670 }
 0x153   :  { %v3578_v8 = vpop.permute.xlu1 %1674 }
 0x155   :  { %v3576_v4 = vpop.permute.xlu0 %1678 }
 0x157   :  { %v3582_v21 = vpop.permute.xlu1 %1682 }
 0x158   :  { %4399 = vst [vmem:[#allocation26_spill] sm:$0xff] %v3582_v21 }
 0x159   :  { %v3580_v13 = vpop.permute.xlu0 %1686 }
 0x15a   :  { %4398 = vst [vmem:[#allocation25_spill] sm:$0xff] %v3580_v13 }
 0x15b   :  { %v3585_v30 = vpop.permute.xlu1 %1690 }
 0x15c   :  { %4400 = vst [vmem:[#allocation27_spill] sm:$0xff] %v3585_v30 }
 0x15d   :  { %v1386_v26 = vpop.permute.xlu0 %1385 }
 0x15e   :  { %v1433_v29 = vadd.f32 %v1386_v26, %v3222_v16 }
 0x15f   :  { %v1388_v45 = vpop.permute.xlu1 %1387 }
 0x160   :  { %1547 = vperm.xlu1 %2776, %v1433_v29   ;;  %v1434_v57 = vadd.f32 %v1388_v45, %v3234_v19 }
 0x161   :  { %v1390_v25 = vpop.permute.xlu0 %1389 }
 0x162   :  { %v1435_v36 = vadd.f32 %v1390_v25, %v3229_v18  ;;  %1552 = vperm.xlu0 %2777, %v1434_v57  }
 0x163   :  { %v1392_v62 = vpop.permute.xlu1 %1391 }
 0x164   :  { %1557 = vperm.xlu1 %2776, %v1435_v36   ;;  %v1436_v1 = vadd.f32 %v1392_v62, %v3241_v20  ;;  %v3600_v62 = vld [vmem:[#allocation7 + $0x128] ss:$20 sps:$4 sm:$0xff]  }
 0x165   :  { %v1394_v59 = vpop.permute.xlu0 %1393  ;;  %2717 = vmatprep.subr.bf16.mxu1 %v3600_v62 }
 0x166   :  { %v1437_v61 = vadd.f32 %v1394_v59, %v3254_v23 }
 0x167   :  { %v1396_v5 = vpop.permute.xlu1 %1395 }
 0x168   :  { %1562 = vperm.xlu1 %2776, %v1436_v1   ;;  %1567 = vperm.xlu0 %2777, %v1437_v61   ;;  %v1438_v6 = vadd.f32 %v1396_v5, %v3259_v24 }
 0x169   :  { %v1398_v3 = vpop.permute.xlu0 %1397 }
 0x16a   :  { %v1439_v16 = vadd.f32 %v1398_v3, %v3266_v27 }
 0x16b   :  { %v1400_v11 = vpop.permute.xlu1 %1399 }
 0x16c   :  { %1572 = vperm.xlu1 %2776, %v1438_v6   ;;  %1577 = vperm.xlu0 %2777, %v1439_v16   ;;  %v1440_v12 = vadd.f32 %v1400_v11, %v3273_v28 }
 0x16d   :  { %v1402_v18 = vpop.permute.xlu0 %1401 }
 0x16e   :  { %v1441_v19 = vadd.f32 %v1402_v18, %v3286_v32 }
 0x16f   :  { %v1404_v14 = vpop.permute.xlu1 %1403 }
 0x170   :  { %1582 = vperm.xlu1 %2776, %v1440_v12   ;;  %1587 = vperm.xlu0 %2777, %v1441_v19   ;;  %v1442_v15 = vadd.f32 %v1404_v14, %v3293_v33 }
 0x171   :  { %v1406_v23 = vpop.permute.xlu0 %1405 }
 0x172   :  { %v1443_v20 = vadd.f32 %v1406_v23, %v3300_v34 }
 0x173   :  { %v1408_v26 = vpop.permute.xlu1 %1407 }
 0x174   :  { %1592 = vperm.xlu1 %2776, %v1442_v15   ;;  %1597 = vperm.xlu0 %2777, %v1443_v20   ;;  %v1444_v25 = vadd.f32 %v1408_v26, %v3307_v35 }
 0x175   :  { %v1410_v27 = vpop.permute.xlu0 %1409 }
 0x176   :  { %v1445_v24 = vadd.f32 %v1410_v27, %v3320_v38  ;;  %v3149_v38 = vmov 1  }
 0x177   :  { %v1412_v59 = vpop.permute.xlu1 %1411 }
 0x178   :  { %1602 = vperm.xlu1 %2776, %v1444_v25   ;;  %1607 = vperm.xlu0 %2777, %v1445_v24   ;;  %v1446_v3 = vadd.f32 %v1412_v59, %v3327_v39 }
 0x179   :  { %v1414_v45 = vpop.permute.xlu0 %1413 }
 0x17a   :  { %v1447_v28 = vadd.f32 %v1414_v45, %v3334_v40 }
 0x17b   :  { %v3604_v5 = vpop.permute.xlu1 %1698 }
 0x17c   :  { %1612 = vperm.xlu1 %2776, %v1446_v3   ;;  %1617 = vperm.xlu0 %2777, %v1447_v28   ;;  %4401 = vst [vmem:[#allocation28_spill] sm:$0xff] %v3604_v5 }
 0x17f   :  { %v1416_v18 = vpop.permute.xlu1 %1415 }
 0x180   :  { %2779 = vset.pattern.permute.xlu0 %v3149_v38  ;;  %v1448_v11 = vadd.f32 %v1416_v18, %v3341_v41 }
 0x181   :  { %1726 = vperm.xlu0 %2779, %v1434_v57   ;;  %v3021_v57 = vld [vmem:[%s4345_s7 + $0x30] sm:$0xff] }
 0x182   :  { %1622 = vperm.xlu1 %2776, %v1448_v11  }
 0x185   :  { %1738 = vperm.xlu0 %2779, %v1437_v61   ;;  %v3022_v61 = vld [vmem:[%s4345_s7 + $0x28] sm:$0xff] }
 0x186   :  { %2778 = vset.pattern.permute.xlu1 %v3149_v38  ;;  %v2883_v38 = vld [vmem:[#allocation7 + $0xb0] ss:$20 sps:$4 sm:$0xff]  }
 0x187   :  { %1722 = vperm.xlu1 %2778, %v1433_v29   ;;  %v3150_v29 = vmov 4  }
 0x189   :  { %1746 = vperm.xlu0 %2779, %v1439_v16  }
 0x18b   :  { %1730 = vperm.xlu1 %2778, %v1435_v36   ;;  %v3016_v36 = vld [vmem:[%s4345_s7] sm:$0xff] }
 0x18d   :  { %1754 = vperm.xlu0 %2779, %v1441_v19   ;;  %v3643_v19 = vld [vmem:[%s4342_s4] ss:$0 sm:$0xff] }
 0x18f   :  { %1734 = vperm.xlu1 %2778, %v1436_v1   ;;  %v3023_v1 = vld [vmem:[%s4345_s7 + $0x38] sm:$0xff] }
 0x191   :  { %1762 = vperm.xlu0 %2779, %v1443_v20  }
 0x193   :  { %1742 = vperm.xlu1 %2778, %v1438_v6  }
 0x195   :  { %1770 = vperm.xlu0 %2779, %v1445_v24  }
 0x197   :  { %1750 = vperm.xlu1 %2778, %v1440_v12  }
 0x199   :  { %1778 = vperm.xlu0 %2779, %v1447_v28  }
 0x19b   :  { %1758 = vperm.xlu1 %2778, %v1442_v15  }
 0x19d   :  { %2780 = vset.pattern.permute.xlu0 %v3148_v44 }
 0x19e   :  { %1998 = vperm.xlu0 %2780, %v3327_v39   ;;  %v3017_v39 = vld [vmem:[%s4345_s7 + $0x8] sm:$0xff] }
 0x19f   :  { %1766 = vperm.xlu1 %2778, %v1444_v25   ;;  %v2882_v25 = vld [vmem:[#allocation7 + $0xd8] ss:$20 sps:$4 sm:$0xff]  }
 0x1a2   :  { %2002 = vperm.xlu0 %2780, %v3334_v40   ;;  %v3018_v40 = vld [vmem:[%s4345_s7 + $0x10] sm:$0xff] }
 0x1a3   :  { %1774 = vperm.xlu1 %2778, %v1446_v3  }
 0x1a6   :  { %2783 = vset.pattern.permute.xlu0 %v3150_v29 }
 0x1a7   :  { %1782 = vperm.xlu1 %2778, %v1448_v11   ;;  %2094 = vperm.xlu0 %2783, %v3017_v39  }
 0x1ab   :  { %2781 = vset.pattern.permute.xlu1 %v3148_v44  ;;  %v3020_v44 = vld [vmem:[%s4345_s7 + $0x18] sm:$0xff] }
 0x1ac   :  { %2006 = vperm.xlu1 %2781, %v3341_v41   ;;  %v3019_v41 = vld [vmem:[%s4345_s7 + $0x20] sm:$0xff] }
 0x1ad   :  { %2106 = vperm.xlu0 %2783, %v3019_v41  }
 0x1b0   :  { %2782 = vset.pattern.permute.xlu1 %v3150_v29  ;;  %v2884_v29 = vld [vmem:[#allocation7 + $0x88] ss:$20 sps:$4 sm:$0xff]  }
 0x1b1   :  { %2090 = vperm.xlu1 %2782, %v3016_v36   ;;  %2114 = vperm.xlu0 %2783, %v3021_v57  }
 0x1b5   :  { %2098 = vperm.xlu1 %2782, %v3018_v40   ;;  %2122 = vperm.xlu0 %2783, %v3286_v32  }
 0x1b9   :  { %2102 = vperm.xlu1 %2782, %v3020_v44   ;;  %2130 = vperm.xlu0 %2783, %v3300_v34   ;;  %v2885_v44 = vld [vmem:[#allocation7 + $0x60] ss:$20 sps:$4 sm:$0xff]  }
 0x1bd   :  { %2110 = vperm.xlu1 %2782, %v3022_v61  }
 0x1c1   :  { %2118 = vperm.xlu1 %2782, %v3023_v1  }
 0x1c5   :  { %2126 = vperm.xlu1 %2782, %v3293_v33  }
 0x1c9   :  { %2134 = vperm.xlu1 %2782, %v3307_v35   ;;  %v2881_v35 = vld [vmem:[#allocation7 + $0x100] ss:$20 sps:$4 sm:$0xff]  }
 0x1df   :  { %v2703_v16 = vpop.f32.mrf.mxu1 }
 0x1e0   :  { %v541_v27 = vadd.f32 %v2703_v16, %v3643_v19  ;;  %v2886_v16 = vld [vmem:[#allocation7 + $0x38] ss:$20 sps:$4 sm:$0xff]  }
 0x1e1   :  { %v532_v6 = vpop.f32.mrf.mxu1 }
 0x1e2   :  { %v533_v32 = vadd.f32 %v3643_v19, %v532_v6  ;;  %v597_v45 = vmax.f32 %v541_v27, 0.0 }
 0x1e3   :  { %v2704_v12 = vpop.f32.mrf.mxu1 }
 0x1e4   :  { %v595_v14 = vmax.f32 %v533_v32, 0.0  ;;  %v544_v34 = vadd.f32 %v2704_v12, %v3643_v19 }
 0x1e5   :  { %v535_v23 = vpop.f32.mrf.mxu1 }
 0x1e6   :  { %v536_v20 = vadd.f32 %v3643_v19, %v535_v23  ;;  %v598_v24 = vmax.f32 %v544_v34, 0.0 }
 0x1e8   :  { %v596_v15 = vmax.f32 %v536_v20, 0.0  ;;  %v3656_v59 = vpack.c.bf16 %v598_v24, %v597_v45  ;;  %v2887_v20 = vld [vmem:[#allocation7 + $0x10] ss:$20 sps:$4 sm:$0xff]  }
 0x1ea   :  { %v3648_v33 = vpack.c.bf16 %v596_v15, %v595_v14 }
 0x1ec   :  { %935 = vmatmul.mubr.bf16.vlgmr.msra.gmra.mxu1 %v3648_v33  ;;  %1048 = vmatmul.mubr.bf16.vlgmr.msra.gmra.mxu0 %v3648_v33 }
 0x1ed   :  { %944 = vmatprep.mubr.bf16.mxu1 %v3147_v53  ;;  %1057 = vmatprep.mubr.bf16.mxu0 %v3147_v53 }
 0x1ee   :  { %2718 = vmatpush3.bf16.msra.mxu1 %v3600_v62 }
 0x1ef   :  { %v2707_v26 = vpop.f32.mrf.mxu1  ;;  %2719 = vmatprep.subr.bf16.mxu1 %v2881_v35 }
 0x1f0   :  { %v557_v57 = vadd.f32 %v2707_v26, %v3643_v19 }
 0x1f1   :  { %v548_v28 = vpop.f32.mrf.mxu1 }
 0x1f2   :  { %2720 = vmatpush3.bf16.msra.mxu1 %v2881_v35  ;;  %v549_v18 = vadd.f32 %v3643_v19, %v548_v28  ;;  %v601_v6 = vmax.f32 %v557_v57, 0.0 }
 0x1f3   :  { %v2708_v3 = vpop.f32.mrf.mxu1  ;;  %2721 = vmatprep.subr.bf16.mxu1 %v2882_v25 }
 0x1f4   :  { %945 = vmatmul.mubr.bf16.gmra.mxu1 %v3656_v59  ;;  %1058 = vmatmul.mubr.bf16.gmra.mxu0 %v3656_v59  ;;  %v599_v36 = vmax.f32 %v549_v18, 0.0  ;;  %v560_v40 = vadd.f32 %v2708_v3, %v3643_v19 }
 0x1f5   :  { %v551_v11 = vpop.f32.mrf.mxu1  ;;  %954 = vmatprep.mubr.bf16.mxu1 %v3147_v53  ;;  %1067 = vmatprep.mubr.bf16.mxu0 %v3147_v53 }
 0x1f6   :  { %v552_v62 = vadd.f32 %v3643_v19, %v551_v11  ;;  %2722 = vmatpush3.bf16.msra.mxu1 %v2882_v25  ;;  %v602_v61 = vmax.f32 %v560_v40, 0.0 }
 0x1f7   :  { %2723 = vmatprep.subr.bf16.mxu1 %v2883_v38 }
 0x1f8   :  { %v600_v39 = vmax.f32 %v552_v62, 0.0  ;;  %v614_v32 = vpack.c.bf16 %v602_v61, %v601_v6 }
 0x1fa   :  { %v3665_v41 = vpack.c.bf16 %v600_v39, %v599_v36  ;;  %2724 = vmatpush3.bf16.msra.mxu1 %v2883_v38 }
 0x1fb   :  { %2725 = vmatprep.subr.bf16.mxu1 %v2884_v29 }
 0x1fc   :  { %955 = vmatmul.mubr.bf16.gmra.mxu1 %v3665_v41  ;;  %1068 = vmatmul.mubr.bf16.gmra.mxu0 %v3665_v41 }
 0x1fd   :  { %964 = vmatprep.mubr.bf16.mxu1 %v3147_v53  ;;  %1077 = vmatprep.mubr.bf16.mxu0 %v3147_v53 }
 0x1fe   :  { %2726 = vmatpush3.bf16.msra.mxu1 %v2884_v29 }
 0x1ff   :  { %v2711_v1 = vpop.f32.mrf.mxu1  ;;  %2727 = vmatprep.subr.bf16.mxu1 %v2885_v44 }
 0x200   :  { %v573_v25 = vadd.f32 %v2711_v1, %v3643_v19 }
 0x201   :  { %v564_v12 = vpop.f32.mrf.mxu1 }
 0x202   :  { %2728 = vmatpush3.bf16.msra.mxu1 %v2885_v44  ;;  %v565_v14 = vadd.f32 %v3643_v19, %v564_v12  ;;  %v605_v3 = vmax.f32 %v573_v25, 0.0 }
 0x203   :  { %v2712_v23 = vpop.f32.mrf.mxu1  ;;  %2729 = vmatprep.subr.bf16.mxu1 %v2886_v16 }
 0x204   :  { %965 = vmatmul.mubr.bf16.gmra.mxu1 %v614_v32  ;;  %1078 = vmatmul.mubr.bf16.gmra.mxu0 %v614_v32  ;;  %v603_v35 = vmax.f32 %v565_v14, 0.0  ;;  %v576_v24 = vadd.f32 %v2712_v23, %v3643_v19  ;;  %v3697_v23 = vpop.permute.xlu0 %1694 }
 0x205   :  { %v567_v15 = vpop.f32.mrf.mxu1  ;;  %974 = vmatprep.mubr.bf16.mxu1 %v3147_v53  ;;  %1087 = vmatprep.mubr.bf16.mxu0 %v3147_v53  ;;  %4402 = vst [vmem:[#allocation29_spill] sm:$0xff] %v3697_v23 }
 0x206   :  { %v568_v34 = vadd.f32 %v3643_v19, %v567_v15  ;;  %2730 = vmatpush3.bf16.msra.mxu1 %v2886_v16  ;;  %v606_v45 = vmax.f32 %v576_v24, 0.0 }
 0x207   :  { %2731 = vmatprep.subr.bf16.mxu1 %v2887_v20 }
 0x208   :  { %v604_v27 = vmax.f32 %v568_v34, 0.0  ;;  %v616_v18 = vpack.c.bf16 %v606_v45, %v605_v3 }
 0x20a   :  { %v615_v26 = vpack.c.bf16 %v604_v27, %v603_v35  ;;  %2732 = vmatpush3.bf16.msra.mxu1 %v2887_v20 }
 0x20c   :  { %975 = vmatmul.mubr.bf16.gmra.mxu1 %v615_v26  ;;  %1088 = vmatmul.mubr.bf16.gmra.mxu0 %v615_v26 }
 0x20d   :  { %984 = vmatprep.mubr.bf16.mxu1 %v3147_v53  ;;  %1097 = vmatprep.mubr.bf16.mxu0 %v3147_v53 }
 0x20f   :  { %v2715_v28 = vpop.f32.mrf.mxu1 }
 0x210   :  { %v589_v61 = vadd.f32 %v2715_v28, %v3643_v19 }
 0x211   :  { %v580_v38 = vpop.f32.mrf.mxu1 }
 0x212   :  { %v581_v62 = vadd.f32 %v3643_v19, %v580_v38  ;;  %v609_v16 = vmax.f32 %v589_v61, 0.0 }
 0x213   :  { %v2716_v11 = vpop.f32.mrf.mxu1 }
 0x214   :  { %985 = vmatmul.mubr.bf16.gmra.mxu1 %v616_v18  ;;  %1098 = vmatmul.mubr.bf16.gmra.mxu0 %v616_v18  ;;  %v607_v39 = vmax.f32 %v581_v62, 0.0  ;;  %v592_v44 = vadd.f32 %v2716_v11, %v3643_v19  ;;  %v669_v11 = vlaneseq }
 0x215   :  { %v583_v29 = vpop.f32.mrf.mxu1  ;;  %994 = vmatprep.mubr.bf16.mxu1 %v3147_v53  ;;  %1107 = vmatprep.mubr.bf16.mxu0 %v3147_v53 }
 0x216   :  { %v584_v36 = vadd.f32 %v3643_v19, %v583_v29  ;;  %v610_v1 = vmax.f32 %v592_v44, 0.0  ;;  %v3691_v19 = vpop.permute.xlu1 %1950  ;;  %v3737_v29 = vshrl.u32 %v669_v11, 7 }
 0x218   :  { %v608_v40 = vmax.f32 %v584_v36, 0.0  ;;  %v618_v6 = vpack.c.bf16 %v610_v1, %v609_v16  ;;  %v679_v47 = vsub.s32 2, %v3737_v29 }
 0x21a   :  { %v617_v57 = vpack.c.bf16 %v608_v40, %v607_v39  ;;  %v3693_v12 = vpop.permute.xlu1 %1954  ;;  %v671_v39 = vsub.s32 0, %v3737_v29  ;;  %v3745_v40 = vld [vmem:[%s4344_s6] sm:$0x1f] }
 0x21c   :  { %995 = vmatmul.mubr.bf16.gmra.mxu1 %v617_v57  ;;  %1108 = vmatmul.mubr.bf16.gmra.mxu0 %v617_v57  ;;  %v3753_v1 = vrot.slane %v3745_v40, %v671_v39 }
 0x21d   :  { %1004 = vmatprep.mubr.bf16.mxu1 %v3147_v53  ;;  %1117 = vmatprep.mubr.bf16.mxu0 %v3147_v53 }
 0x21e   :  { %v3695_v53 = vpop.permute.xlu1 %1962 }
 0x222   :  { %v3699_v20 = vpop.permute.xlu1 %1970 }
 0x223   :  { %4403 = vst [vmem:[#allocation30_spill] sm:$0xff] %v3699_v20 }
 0x224   :  { %1005 = vmatmul.mubr.bf16.gmra.mxu1 %v618_v6  ;;  %1118 = vmatmul.mubr.bf16.gmra.mxu0 %v618_v6 }
 0x225   :  { %2733 = vmatprep.mubr.bf16.mxu1 %v3648_v33  ;;  %v3701_v33 = vpop.permute.xlu0 %1702 }
 0x226   :  { %4404 = vst [vmem:[#allocation31_spill] sm:$0xff] %v3701_v33 }
 0x22c   :  { %2734 = vmatmul.mubr.bf16.vlgmr.msra.gmra.mxu1 %v3656_v59  ;;  %v3703_v59 = vpop.permute.xlu1 %1982 }
 0x22d   :  { %2737 = vmatprep.mubr.bf16.mxu1 %v3665_v41  ;;  %4405 = vst [vmem:[#allocation32_spill] sm:$0xff] %v3703_v59  ;;  %v3705_v41 = vpop.permute.xlu0 %1946 }
 0x231   :  { %v3709_v14 = vpop.permute.xlu0 %1958 }
 0x234   :  { %2738 = vmatmul.mubr.bf16.gmra.mxu1 %v614_v32  ;;  %v3707_v32 = vpop.permute.xlu1 %1986 }
 0x235   :  { %2741 = vmatprep.mubr.bf16.mxu1 %v615_v26  ;;  %4406 = vst [vmem:[#allocation33_spill] sm:$0xff] %v3707_v32  ;;  %v3713_v34 = vpop.permute.xlu0 %1966 }
 0x236   :  { %4408 = vst [vmem:[#allocation35_spill] sm:$0xff] %v3713_v34 }
 0x238   :  { %v3711_v15 = vpop.permute.xlu1 %1994 }
 0x239   :  { %4407 = vst [vmem:[#allocation34_spill] sm:$0xff] %v3711_v15  ;;  %v3717_v27 = vpop.permute.xlu0 %1974 }
 0x23a   :  { %4409 = vst [vmem:[#allocation36_spill] sm:$0xff] %v3717_v27  ;;  %v3782_v27 = vrot.slane %v3745_v40, %v679_v47 }
 0x23c   :  { %2742 = vmatmul.mubr.bf16.gmra.mxu1 %v616_v18  ;;  %v3715_v35 = vpop.permute.xlu1 %1547 }
 0x23d   :  { %2745 = vmatprep.mubr.bf16.mxu1 %v617_v57  ;;  %v3721_v26 = vpop.permute.xlu0 %1978  ;;  %v683_v57 = vsub.s32 3, %v3737_v29 }
 0x23e   :  { %4410 = vst [vmem:[#allocation37_spill] sm:$0xff] %v3721_v26 }
 0x23f   :  { %v3756_v16 = vrot.slane %v3745_v40, %v683_v57 }
 0x240   :  { %v3719_v24 = vpop.permute.xlu1 %1557 }
 0x241   :  { %v3725_v45 = vpop.permute.xlu0 %1990 }
 0x242   :  { %4411 = vst [vmem:[#allocation38_spill] sm:$0xff] %v3725_v45 }
 0x244   :  { %2746 = vmatmul.mubr.bf16.gmra.mxu1 %v618_v6  ;;  %v3723_v25 = vpop.permute.xlu1 %1562 }
 0x245   :  { %v3729_v3 = vpop.permute.xlu0 %1552 }
 0x248   :  { %v3727_v28 = vpop.permute.xlu1 %1572 }
 0x249   :  { %v3733_v18 = vpop.permute.xlu0 %1567 }
 0x24c   :  { %v3731_v38 = vpop.permute.xlu1 %1582 }
 0x24d   :  { %v3739_v36 = vpop.permute.xlu0 %1577 }
 0x250   :  { %v3735_v62 = vpop.permute.xlu1 %1592 }
 0x251   :  { %4412 = vst [vmem:[#allocation39_spill] sm:$0xff] %v3735_v62  ;;  %v3750_v61 = vpop.permute.xlu0 %1587 }
 0x254   :  { %v3747_v44 = vpop.permute.xlu1 %1602 }
 0x255   :  { %4413 = vst [vmem:[#allocation40_spill] sm:$0xff] %v3747_v44  ;;  %v3763_v32 = vpop.permute.xlu0 %1597 }
 0x256   :  { %4416 = vst [vmem:[#allocation43_spill] sm:$0xff] %v3763_v32 }
 0x258   :  { %v3758_v23 = vpop.permute.xlu1 %1612 }
 0x259   :  { %4414 = vst [vmem:[#allocation41_spill] sm:$0xff] %v3758_v23  ;;  %v675_v23 = vsub.s32 1, %v3737_v29  ;;  %v3776_v31 = vpop.permute.xlu0 %1607 }
 0x25a   :  { %4419 = vst [vmem:[#allocation46_spill] sm:$0xff] %v3776_v31 }
 0x25b   :  { %v3785_v32 = vrot.slane %v3745_v40, %v675_v23 }
 0x25c   :  { %v3772_v42 = vpop.permute.xlu1 %1622 }
 0x25d   :  { %4418 = vst [vmem:[#allocation45_spill] sm:$0xff] %v3772_v42  ;;  %v3795_v21 = vpop.permute.xlu0 %1617 }
 0x25e   :  { %4422 = vst [vmem:[#allocation49_spill] sm:$0xff] %v3795_v21 }
 0x2ac   :  { %v936_v6 = vpop.f32.mrf.mxu1  ;;  %v1049_v11 = vpop.f32.mrf.mxu0 }
 0x2ad   :  { %v3761_v33 = vadd.f32 %v936_v6, %v3753_v1  ;;  %v1050_v47 = vadd.f32 %v1049_v11, %v3782_v27 }
 0x2ae   :  { %v938_v15 = vpop.f32.mrf.mxu1  ;;  %v1051_v45 = vpop.f32.mrf.mxu0 }
 0x2af   :  { %4415 = vst [vmem:[#allocation42_spill] sm:$0xff] %v3761_v33  ;;  %v1052_v59 = vadd.f32 %v1051_v45, %v3756_v16  ;;  %2313 = vmax.xlane.f32.xlu1 %v3761_v33  ;;  %v939_v23 = vadd.f32 %v938_v15, %v3785_v32  ;;  %v687_v15 = vsub.s32 4, %v3737_v29 }
 0x2b0   :  { %v940_v39 = vpop.f32.mrf.mxu1  ;;  %v1053_v46 = vpop.f32.mrf.mxu0 }
 0x2b1   :  { %v1225_v5 = vmin.f32 %v1052_v59, 4.1351666  ;;  %v3768_v57 = vadd.f32 %v940_v39, %v3753_v1  ;;  %v1054_v13 = vadd.f32 %v1053_v46, %v3782_v27 }
 0x2b2   :  { %v942_v6 = vpop.f32.mrf.mxu1  ;;  %v1055_v26 = vpop.f32.mrf.mxu0 }
 0x2b3   :  { %4417 = vst [vmem:[#allocation44_spill] sm:$0xff] %v3768_v57  ;;  %v1801_v30 = vmul.f32 1.442695, %v1225_v5  ;;  %v1056_v44 = vadd.f32 %v1055_v26, %v3756_v16  ;;  %2315 = vmax.xlane.f32.xlu0 %v3768_v57 }
 0x2b4   :  { %v946_v45 = vpop.f32.mrf.mxu1  ;;  %v1059_v33 = vpop.f32.mrf.mxu0 }
 0x2b5   :  { %2888 = vpow2.f32 %v1801_v30  ;;  %v1226_v59 = vmin.f32 %v1056_v44, 4.1351666  ;;  %v3779_v39 = vadd.f32 %v946_v45, %v3753_v1  ;;  %v1723_v30 = vpop.permute.xlu1 %1722 }
 0x2b6   :  { %v948_v5 = vpop.f32.mrf.mxu1  ;;  %v1061_v42 = vpop.f32.mrf.mxu0 }
 0x2b7   :  { %4420 = vst [vmem:[#allocation47_spill] sm:$0xff] %v3779_v39  ;;  %v1803_v26 = vmul.f32 1.442695, %v1226_v59  ;;  %v1062_v57 = vadd.f32 %v1061_v42, %v3756_v16  ;;  %2317 = vmax.xlane.f32.xlu0 %v3779_v39  ;;  %v943_v42 = vadd.f32 %v942_v6, %v3785_v32 }
 0x2b8   :  { %v950_v22 = vpop.f32.mrf.mxu1  ;;  %v1063_v31 = vpop.f32.mrf.mxu0 }
 0x2b9   :  { %2890 = vpow2.f32 %v1803_v26  ;;  %v1227_v44 = vmin.f32 %v1062_v57, 4.1351666  ;;  %v3790_v45 = vadd.f32 %v950_v22, %v3753_v1  ;;  %v1060_v22 = vadd.f32 %v1059_v33, %v3782_v27  ;;  %v1731_v46 = vpop.permute.xlu1 %1730 }
 0x2ba   :  { %v952_v37 = vpop.f32.mrf.mxu1  ;;  %v1065_v59 = vpop.f32.mrf.mxu0  ;;  %v949_v57 = vadd.f32 %v948_v5, %v3785_v32  ;;  %v1064_v20 = vadd.f32 %v1063_v31, %v3782_v27  ;;  %v1706_v33 = vmul.f32 %v3562_v51, %v1054_v13  ;;  %v1530_v29 = vmul.f32 %v3522_v48, %v943_v42 }
 0x2bb   :  { %4421 = vst [vmem:[#allocation48_spill] sm:$0xff] %v3790_v45  ;;  %v1805_v39 = vmul.f32 1.442695, %v1227_v44  ;;  %v1066_v62 = vadd.f32 %v1065_v59, %v3756_v16  ;;  %2319 = vmax.xlane.f32.xlu1 %v3790_v45  ;;  %v1705_v44 = vmul.f32 %v3560_v49, %v1050_v47  ;;  %v1529_v59 = vmul.f32 %v3518_v43, %v939_v23 }
 0x2bc   :  { %v956_v11 = vpop.f32.mrf.mxu1  ;;  %v1069_v26 = vpop.f32.mrf.mxu0  ;;  %v953_v5 = vadd.f32 %v952_v37, %v3785_v32  ;;  %v1707_v31 = vmul.f32 %v3566_v52, %v1060_v22  ;;  %v3818_v13 = vrot.slane %v3745_v40, %v687_v15  ;;  %v1708_v51 = vmul.f32 %v3564_v9, %v1064_v20 }
 0x2bd   :  { %2892 = vpow2.f32 %v1805_v39  ;;  %v1228_v21 = vmin.f32 %v1066_v62, 4.1351666  ;;  %v3805_v6 = vadd.f32 %v956_v11, %v3753_v1  ;;  %v1531_v62 = vmul.f32 %v3529_v56, %v949_v57  ;;  %v1727_v37 = vpop.permute.xlu0 %1726  ;;  %v1735_v15 = vpop.permute.xlu1 %1734 }
 0x2be   :  { %v958_v45 = vpop.f32.mrf.mxu1  ;;  %v1071_v34 = vpop.f32.mrf.mxu0  ;;  %v1070_v47 = vadd.f32 %v1069_v26, %v3782_v27  ;;  %v1625_v22 = vadd.f32 %v3715_v35, %v1529_v59  ;;  %v3827_v57 = vadd.f32 %v1727_v37, %v1706_v33  ;;  %v1532_v26 = vmul.f32 %v3524_v50, %v953_v5 }
 0x2bf   :  { %4423 = vst [vmem:[#allocation50_spill] sm:$0xff] %v3805_v6  ;;  %v1807_v10 = vmul.f32 1.442695, %v1228_v21  ;;  %v1072_v39 = vadd.f32 %v1071_v34, %v3756_v16  ;;  %2321 = vmax.xlane.f32.xlu0 %v3805_v6  ;;  %v3824_v6 = vadd.f32 %v1723_v30, %v1705_v44  ;;  %v959_v20 = vadd.f32 %v958_v45, %v3785_v32 }
 0x2c0   :  { %v960_v23 = vpop.f32.mrf.mxu1  ;;  %v1073_v11 = vpop.f32.mrf.mxu0  ;;  %v3834_v30 = vadd.f32 %v1731_v46, %v1707_v31  ;;  %v3837_v35 = vadd.f32 %v3719_v24, %v1531_v62  ;;  %v1709_v44 = vmul.f32 %v3570_v55, %v1070_v47  ;;  %v3847_v46 = vadd.f32 %v3723_v25, %v1532_v26 }
 0x2c1   :  { %2894 = vpow2.f32 %v1807_v10  ;;  %v1229_v21 = vmin.f32 %v1072_v39, 4.1351666  ;;  %v3822_v34 = vadd.f32 %v960_v23, %v3753_v1  ;;  %v1626_v10 = vadd.f32 %v3729_v3, %v1530_v29  ;;  %v1739_v37 = vpop.permute.xlu0 %1738 }
 0x2c2   :  { %v2889_v42 = vpop.eup %2888  ;;  %v962_v49 = vpop.f32.mrf.mxu1  ;;  %v1074_v24 = vadd.f32 %v1073_v11, %v3782_v27 }
 0x2c3   :  { %4424 = vst [vmem:[#allocation51_spill] sm:$0xff] %v3822_v34  ;;  %v1075_v40 = vpop.f32.mrf.mxu0  ;;  %v1833_v52 = vmul.f32 %v2889_v42, %v3518_v43  ;;  %v1809_v39 = vmul.f32 1.442695, %v1229_v21  ;;  %2323 = vmax.xlane.f32.xlu1 %v3822_v34  ;;  %v3841_v43 = vadd.f32 %v1735_v15, %v1708_v51  ;;  %v963_v29 = vadd.f32 %v962_v49, %v3785_v32 }
 0x2c4   :  { %v1076_v59 = vadd.f32 %v1075_v40, %v3756_v16  ;;  %v966_v33 = vpop.f32.mrf.mxu1  ;;  %v1533_v42 = vmul.f32 %v3533_v0, %v959_v20  ;;  %v3854_v40 = vadd.f32 %v1739_v37, %v1709_v44  ;;  %v1710_v20 = vmul.f32 %v3568_v54, %v1074_v24 }
 0x2c5   :  { %v1079_v5 = vpop.f32.mrf.mxu0  ;;  %v1897_v23 = vmul.f32 0.5, %v1833_v52  ;;  %2896 = vpow2.f32 %v1809_v39  ;;  %v3844_v3 = vadd.f32 %v966_v33, %v3753_v1 }
 0x2c6   :  { %v2891_v45 = vpop.eup %2890  ;;  %v1230_v31 = vmin.f32 %v1076_v59, 4.1351666  ;;  %v968_v62 = vpop.f32.mrf.mxu1  ;;  %v1080_v26 = vadd.f32 %v1079_v5, %v3782_v27 }
 0x2c7   :  { %4425 = vst [vmem:[#allocation52_spill] sm:$0xff] %v3844_v3  ;;  %v1081_v47 = vpop.f32.mrf.mxu0  ;;  %v1913_v21 = vsub.f32 %v1625_v22, %v1897_v23  ;;  %v2185_v52 = vadd.f32 %v1897_v23, %v1625_v22  ;;  %v1834_v51 = vmul.f32 %v2891_v45, %v3522_v48  ;;  %2325 = vmax.xlane.f32.xlu0 %v3844_v3 }
 0x2c8   :  { %v1811_v25 = vmul.f32 1.442695, %v1230_v31  ;;  %v1082_v11 = vadd.f32 %v1081_v47, %v3756_v16  ;;  %v970_v49 = vpop.f32.mrf.mxu1  ;;  %v1534_v23 = vmul.f32 %v3531_v58, %v963_v29  ;;  %v1711_v24 = vmul.f32 %v3574_v63, %v1080_v26 }
 0x2c9   :  { %v1083_v15 = vpop.f32.mrf.mxu0  ;;  %v1929_v39 = vmax.f32 %v1913_v21, 0.0  ;;  %v2201_v59 = vmax.f32 %v2185_v52, 0.0  ;;  %v1898_v33 = vmul.f32 0.5, %v1834_v51  ;;  %v3859_v22 = vadd.f32 %v970_v49, %v3753_v1  ;;  %v1743_v49 = vpop.permute.xlu1 %1742 }
 0x2ca   :  { %v2893_v48 = vpop.eup %2892  ;;  %2898 = vpow2.f32 %v1811_v25  ;;  %v1231_v44 = vmin.f32 %v1082_v11, 4.1351666  ;;  %v972_v45 = vpop.f32.mrf.mxu1  ;;  %v3868_v51 = vadd.f32 %v3733_v18, %v1533_v42 }
 0x2cb   :  { %4426 = vst [vmem:[#allocation53_spill] sm:$0xff] %v3859_v22  ;;  %v1085_v31 = vpop.f32.mrf.mxu0  ;;  %v2009_v5 = vmin.f32 %v3705_v41, %v1929_v39  ;;  %v2217_v47 = vmin.f32 %v3705_v41, %v2201_v59  ;;  %v1914_v37 = vsub.f32 %v1626_v10, %v1898_v33  ;;  %v2186_v21 = vadd.f32 %v1898_v33, %v1626_v10 }
 0x2cc   :  { %2327 = vmax.xlane.f32.xlu1 %v3859_v22  ;;  %v1835_v52 = vmul.f32 %v2893_v48, %v3529_v56  ;;  %v1813_v29 = vmul.f32 1.442695, %v1231_v44  ;;  %v976_v25 = vpop.f32.mrf.mxu1  ;;  %v969_v41 = vadd.f32 %v968_v62, %v3785_v32  ;;  %v1086_v10 = vadd.f32 %v1085_v31, %v3756_v16  ;;  %v1747_v48 = vpop.permute.xlu0 %1746 }
 0x2cd   :  { %v1089_v11 = vpop.f32.mrf.mxu0  ;;  %2025 = vst [vmem:[#allocation9] sm:$0xff] %v2009_v5  ;;  %2233 = vst [vmem:[#allocation9 + $0x10] sm:$0xff] %v2217_v47  ;;  %v1930_v39 = vmax.f32 %v1914_v37, 0.0  ;;  %v2202_v3 = vmax.f32 %v2186_v21, 0.0  ;;  %v3873_v56 = vadd.f32 %v1743_v49, %v1710_v20  ;;  %v3876_v18 = vadd.f32 %v976_v25, %v3753_v1 }
 0x2ce   :  { %v2895_v59 = vpop.eup %2894  ;;  %v1899_v33 = vmul.f32 0.5, %v1835_v52  ;;  %2900 = vpow2.f32 %v1813_v29  ;;  %v978_v42 = vpop.f32.mrf.mxu1  ;;  %v3882_v62 = vadd.f32 %v3727_v28, %v1534_v23  ;;  %v3886_v37 = vadd.f32 %v1747_v48, %v1711_v24 }
 0x2cf   :  { %4427 = vst [vmem:[#allocation54_spill] sm:$0xff] %v3876_v18  ;;  %v1091_v26 = vpop.f32.mrf.mxu0  ;;  %v2010_v44 = vmin.f32 %v3691_v19, %v1930_v39  ;;  %v2218_v5 = vmin.f32 %v3691_v19, %v2202_v3  ;;  %v1836_v47 = vmul.f32 %v2895_v59, %v3524_v50  ;;  %v1232_v21 = vmin.f32 %v1086_v10, 4.1351666  ;;  %2329 = vmax.xlane.f32.xlu0 %v3876_v18 }
 0x2d0   :  { %v1915_v31 = vsub.f32 %v3837_v35, %v1899_v33  ;;  %v2187_v20 = vadd.f32 %v1899_v33, %v3837_v35  ;;  %v980_v52 = vpop.f32.mrf.mxu1  ;;  %v1535_v19 = vmul.f32 %v3539_v7, %v969_v41  ;;  %v1084_v50 = vadd.f32 %v1083_v15, %v3782_v27 }
 0x2d1   :  { %v1093_v29 = vpop.f32.mrf.mxu0  ;;  %2026 = vst [vmem:[#allocation9 + $0x20] sm:$0xff] %v2010_v44  ;;  %2234 = vst [vmem:[#allocation9 + $0x30] sm:$0xff] %v2218_v5  ;;  %v1900_v25 = vmul.f32 0.5, %v1836_v47  ;;  %v973_v28 = vadd.f32 %v972_v45, %v3785_v32  ;;  %v1815_v35 = vmul.f32 1.442695, %v1232_v21  ;;  %v1092_v24 = vadd.f32 %v1091_v26, %v3756_v16 }
 0x2d2   :  { %v2897_v3 = vpop.eup %2896  ;;  %v1931_v23 = vmax.f32 %v1915_v31, 0.0  ;;  %v2203_v49 = vmax.f32 %v2187_v20, 0.0  ;;  %v982_v39 = vpop.f32.mrf.mxu1  ;;  %v1090_v41 = vadd.f32 %v1089_v11, %v3782_v27  ;;  %v979_v44 = vadd.f32 %v978_v42, %v3785_v32 }
 0x2d3   :  { %v1095_v10 = vpop.f32.mrf.mxu0  ;;  %v1916_v59 = vsub.f32 %v3847_v46, %v1900_v25  ;;  %v2188_v33 = vadd.f32 %v1900_v25, %v3847_v46  ;;  %v1837_v48 = vmul.f32 %v2897_v3, %v3533_v0  ;;  %2902 = vpow2.f32 %v1815_v35 }
 0x2d4   :  { %v2011_v15 = vmin.f32 %v3693_v12, %v1931_v23  ;;  %v2219_v45 = vmin.f32 %v3693_v12, %v2203_v49  ;;  %v986_v5 = vpop.f32.mrf.mxu1  ;;  %v3903_v21 = vadd.f32 %v3739_v36, %v1535_v19  ;;  %v1712_v0 = vmul.f32 %v3572_v60, %v1084_v50 }
 0x2d5   :  { %v3900_v47 = vpop.f32.mrf.mxu0  ;;  %v1932_v26 = vmax.f32 %v1916_v59, 0.0  ;;  %v2204_v31 = vmax.f32 %v2188_v33, 0.0  ;;  %v1901_v20 = vmul.f32 0.5, %v1837_v48  ;;  %v1536_v46 = vmul.f32 %v3535_v2, %v973_v28  ;;  %v1751_v33 = vpop.permute.xlu1 %1750 }
 0x2d6   :  { %2027 = vst [vmem:[#allocation9 + $0x40] sm:$0xff] %v2011_v15  ;;  %2235 = vst [vmem:[#allocation9 + $0x50] sm:$0xff] %v2219_v45  ;;  %v1233_v11 = vmin.f32 %v1092_v24, 4.1351666  ;;  %v3908_v12 = vadd.f32 %v980_v52, %v3753_v1  ;;  %v3910_v42 = vpop.f32.mrf.mxu1  ;;  %v1713_v28 = vmul.f32 %v3578_v8, %v1090_v41  ;;  %v1537_v35 = vmul.f32 %v3543_v17, %v979_v44 }
 0x2d7   :  { %v1101_v25 = vpop.f32.mrf.mxu0  ;;  %v2899_v3 = vpop.eup %2898  ;;  %v2012_v23 = vmin.f32 %v3709_v14, %v1932_v26  ;;  %v2220_v49 = vmin.f32 %v3709_v14, %v2204_v31  ;;  %v1917_v36 = vsub.f32 %v3868_v51, %v1901_v20  ;;  %v2189_v19 = vadd.f32 %v1901_v20, %v3868_v51 }
 0x2d8   :  { %4428 = vst [vmem:[#allocation55_spill] sm:$0xff] %v3908_v12  ;;  %v1838_v50 = vmul.f32 %v2899_v3, %v3531_v58  ;;  %v1817_v52 = vmul.f32 1.442695, %v1233_v11  ;;  %2331 = vmax.xlane.f32.xlu1 %v3908_v12  ;;  %v990_v24 = vpop.f32.mrf.mxu1  ;;  %v1096_v15 = vadd.f32 %v1095_v10, %v3756_v16  ;;  %v3922_v51 = vadd.f32 %v986_v5, %v3753_v1  ;;  %v1755_v20 = vpop.permute.xlu0 %1754  ;;  %v4441_v12 = vld [vmem:[#allocation43_spill] sm:$0xff] }
 0x2d9   :  { %v1103_v59 = vpop.f32.mrf.mxu0  ;;  %2028 = vst [vmem:[#allocation9 + $0x60] sm:$0xff] %v2012_v23  ;;  %2236 = vst [vmem:[#allocation9 + $0x70] sm:$0xff] %v2220_v49  ;;  %v1933_v48 = vmax.f32 %v1917_v36, 0.0  ;;  %v2205_v14 = vmax.f32 %v2189_v19, 0.0  ;;  %v3924_v45 = vadd.f32 %v1751_v33, %v1712_v0  ;;  %v1094_v41 = vadd.f32 %v1093_v29, %v3782_v27 }
 0x2da   :  { %4429 = vst [vmem:[#allocation56_spill] sm:$0xff] %v3922_v51  ;;  %v1902_v58 = vmul.f32 0.5, %v1838_v50  ;;  %2904 = vpow2.f32 %v1817_v52  ;;  %v992_v44 = vpop.f32.mrf.mxu1  ;;  %v983_v23 = vadd.f32 %v982_v39, %v3785_v32  ;;  %v1234_v10 = vmin.f32 %v1096_v15, 4.1351666  ;;  %2333 = vmax.xlane.f32.xlu0 %v3922_v51  ;;  %v4431_v15 = vld [vmem:[#allocation15_spill] sm:$0xff] }
 0x2db   :  { %v1105_v26 = vpop.f32.mrf.mxu0  ;;  %v2901_v31 = vpop.eup %2900  ;;  %v2013_v11 = vmin.f32 %v3695_v53, %v1933_v48  ;;  %v2221_v3 = vmin.f32 %v3695_v53, %v2205_v14  ;;  %v3935_v29 = vadd.f32 %v3731_v38, %v1536_v46  ;;  %v3939_v53 = vadd.f32 %v1755_v20, %v1713_v28 }
 0x2dc   :  { %v1918_v5 = vsub.f32 %v3882_v62, %v1902_v58  ;;  %v2190_v0 = vadd.f32 %v1902_v58, %v3882_v62  ;;  %v1839_v49 = vmul.f32 %v2901_v31, %v3539_v7  ;;  %v996_v36 = vpop.f32.mrf.mxu1  ;;  %v3942_v39 = vadd.f32 %v3750_v61, %v1537_v35  ;;  %v4432_v31 = vld [vmem:[#allocation35_spill] sm:$0xff] }
 0x2dd   :  { %v3937_v19 = vpop.f32.mrf.mxu0  ;;  %2029 = vst [vmem:[#allocation9 + $0x80] sm:$0xff] %v2013_v11  ;;  %2237 = vst [vmem:[#allocation9 + $0x90] sm:$0xff] %v2221_v3  ;;  %v1819_v50 = vmul.f32 1.442695, %v1234_v10  ;;  %v1102_v52 = vadd.f32 %v1101_v25, %v3756_v16  ;;  %v3946_v7 = vadd.f32 %v990_v24, %v3753_v1  ;;  %v1714_v14 = vmul.f32 %v3576_v4, %v1094_v41  ;;  %v1759_v10 = vpop.permute.xlu1 %1758 }
 0x2de   :  { %v1934_v33 = vmax.f32 %v1918_v5, 0.0  ;;  %v2206_v62 = vmax.f32 %v2190_v0, 0.0  ;;  %v1903_v48 = vmul.f32 0.5, %v1839_v49  ;;  %v998_v38 = vpop.f32.mrf.mxu1  ;;  %v1538_v58 = vmul.f32 %v4431_v15, %v983_v23 }
 0x2df   :  { %4430 = vst [vmem:[#allocation57_spill] sm:$0xff] %v3946_v7  ;;  %v1111_v46 = vpop.f32.mrf.mxu0  ;;  %2906 = vpow2.f32 %v1819_v50  ;;  %v1235_v28 = vmin.f32 %v1102_v52, 4.1351666  ;;  %2335 = vmax.xlane.f32.xlu1 %v3946_v7  ;;  %v1100_v41 = vadd.f32 %v3900_v47, %v3782_v27  ;;  %v989_v23 = vadd.f32 %v3910_v42, %v3785_v32 }
 0x2e0   :  { %v2014_v61 = vmin.f32 %v4432_v31, %v1934_v33  ;;  %v2222_v35 = vmin.f32 %v4432_v31, %v2206_v62  ;;  %v1919_v25 = vsub.f32 %v3903_v21, %v1903_v48  ;;  %v2191_v20 = vadd.f32 %v1903_v48, %v3903_v21  ;;  %v1000_v24 = vpop.f32.mrf.mxu1  ;;  %v2903_v3 = vpop.eup %2902 }
 0x2e1   :  { %v3955_v11 = vpop.f32.mrf.mxu0  ;;  %v1821_v5 = vmul.f32 1.442695, %v1235_v28  ;;  %v1104_v0 = vadd.f32 %v1103_v59, %v3782_v27  ;;  %v1840_v50 = vmul.f32 %v2903_v3, %v3535_v2  ;;  %v1106_v52 = vadd.f32 %v1105_v26, %v3756_v16  ;;  %v4434_v28 = vld [vmem:[#allocation30_spill] sm:$0xff]  ;;  %v4435_v26 = vld [vmem:[#allocation39_spill] sm:$0xff] }
 0x2e2   :  { %2030 = vst [vmem:[#allocation9 + $0xa0] sm:$0xff] %v2014_v61  ;;  %2238 = vst [vmem:[#allocation9 + $0xb0] sm:$0xff] %v2222_v35  ;;  %v1935_v49 = vmax.f32 %v1919_v25, 0.0  ;;  %v2207_v21 = vmax.f32 %v2191_v20, 0.0  ;;  %v1002_v33 = vpop.f32.mrf.mxu1  ;;  %v3964_v48 = vadd.f32 %v1759_v10, %v1714_v14  ;;  %v993_v47 = vadd.f32 %v992_v44, %v3785_v32  ;;  %v4436_v14 = vld [vmem:[#allocation26_spill] sm:$0xff]  ;;  %v4437_v10 = vld [vmem:[#allocation17_spill] sm:$0xff] }
 0x2e3   :  { %v1115_v62 = vpop.f32.mrf.mxu0  ;;  %2908 = vpow2.f32 %v1821_v5  ;;  %v3968_v42 = vadd.f32 %v996_v36, %v3753_v1  ;;  %v1904_v61 = vmul.f32 0.5, %v1840_v50  ;;  %v1236_v35 = vmin.f32 %v1106_v52, 4.1351666  ;;  %v4438_v44 = vld [vmem:[#allocation25_spill] sm:$0xff] }
 0x2e4   :  { %v2015_v59 = vmin.f32 %v4434_v28, %v1935_v49  ;;  %v2223_v31 = vmin.f32 %v4434_v28, %v2207_v21  ;;  %v1006_v25 = vpop.f32.mrf.mxu1  ;;  %v3975_v20 = vadd.f32 %v4435_v26, %v1538_v58  ;;  %v1715_v3 = vmul.f32 %v4436_v14, %v1100_v41  ;;  %v1763_v28 = vpop.permute.xlu0 %1762  ;;  %v4439_v41 = vld [vmem:[#allocation16_spill] sm:$0xff] }
 0x2e5   :  { %4433 = vst [vmem:[#allocation15_spill] sm:$0xff] %v3968_v42  ;;  %v3972_v2 = vpop.f32.mrf.mxu0  ;;  %v1539_v5 = vmul.f32 %v4437_v10, %v989_v23  ;;  %v1716_v7 = vmul.f32 %v4438_v44, %v1104_v0  ;;  %2337 = vmax.xlane.f32.xlu0 %v3968_v42  ;;  %v1920_v36 = vsub.f32 %v3935_v29, %v1904_v61  ;;  %v1823_v21 = vmul.f32 1.442695, %v1236_v35  ;;  %v1767_v26 = vpop.permute.xlu1 %1766 }
 0x2e6   :  { %2031 = vst [vmem:[#allocation9 + $0xc0] sm:$0xff] %v2015_v59  ;;  %2239 = vst [vmem:[#allocation9 + $0xd0] sm:$0xff] %v2223_v31  ;;  %v2192_v49 = vadd.f32 %v1904_v61, %v3935_v29  ;;  %v1112_v50 = vadd.f32 %v1111_v46, %v3756_v16  ;;  %v1008_v52 = vpop.f32.mrf.mxu1  ;;  %v1540_v51 = vmul.f32 %v4439_v41, %v993_v47 }
 0x2e7   :  { %v2905_v58 = vpop.eup %2904  ;;  %v1110_v23 = vadd.f32 %v3937_v19, %v3782_v27  ;;  %v999_v0 = vadd.f32 %v998_v38, %v3785_v32  ;;  %v3989_v59 = vadd.f32 %v1000_v24, %v3753_v1  ;;  %v1936_v31 = vmax.f32 %v1920_v36, 0.0  ;;  %v1121_v46 = vpop.f32.mrf.mxu0  ;;  %v4442_v38 = vld [vmem:[#allocation36_spill] sm:$0xff] }
 0x2e8   :  { %v2208_v42 = vmax.f32 %v2192_v49, 0.0  ;;  %v1841_v29 = vmul.f32 %v2905_v58, %v3543_v17  ;;  %2910 = vpow2.f32 %v1823_v21  ;;  %v1010_v61 = vpop.f32.mrf.mxu1  ;;  %v3992_v35 = vadd.f32 %v1763_v28, %v1715_v3  ;;  %v4443_v58 = vld [vmem:[#allocation19_spill] sm:$0xff] }
 0x2e9   :  { %4440 = vst [vmem:[#allocation35_spill] sm:$0xff] %v3989_v59  ;;  %v3995_v18 = vadd.f32 %v4441_v12, %v1539_v5  ;;  %v3997_v47 = vadd.f32 %v1767_v26, %v1716_v7  ;;  %v1237_v19 = vmin.f32 %v1112_v50, 4.1351666  ;;  %2339 = vmax.xlane.f32.xlu1 %v3989_v59  ;;  %v2016_v24 = vmin.f32 %v4442_v38, %v1936_v31 }
 0x2ea   :  { %v2224_v36 = vmin.f32 %v4442_v38, %v2208_v42  ;;  %v1905_v49 = vmul.f32 0.5, %v1841_v29  ;;  %v1003_v17 = vadd.f32 %v1002_v33, %v3785_v32  ;;  %v1012_v21 = vpop.f32.mrf.mxu1  ;;  %v1541_v22 = vmul.f32 %v4443_v58, %v999_v0  ;;  %v4445_v42 = vld [vmem:[#allocation40_spill] sm:$0xff]  ;;  %v4446_v33 = vld [vmem:[#allocation27_spill] sm:$0xff]  ;;  %v4016_v0 = vpop.f32.mrf.mxu0 }
 0x2eb   :  { %v1825_v3 = vmul.f32 1.442695, %v1237_v19  ;;  %v1116_v28 = vadd.f32 %v1115_v62, %v3756_v16  ;;  %v4006_v12 = vadd.f32 %v1006_v25, %v3753_v1  ;;  %2032 = vst [vmem:[#allocation9 + $0xe0] sm:$0xff] %v2016_v24  ;;  %v4011_v26 = vadd.f32 %v4445_v42, %v1540_v51  ;;  %v4447_v25 = vld [vmem:[#allocation18_spill] sm:$0xff] }
 0x2ec   :  { %v2907_v7 = vpop.eup %2906  ;;  %2240 = vst [vmem:[#allocation9 + $0xf0] sm:$0xff] %v2224_v36  ;;  %v1921_v5 = vsub.f32 %v3942_v39, %v1905_v49  ;;  %v2193_v50 = vadd.f32 %v1905_v49, %v3942_v39  ;;  %v4014_v31 = vmul.f32 %v4446_v33, %v1110_v23  ;;  %v2735_v29 = vpop.f32.mrf.mxu1  ;;  %v1542_v19 = vmul.f32 %v4447_v25, %v1003_v17  ;;  %v4449_v42 = vld [vmem:[#allocation46_spill] sm:$0xff] }
 0x2ed   :  { %4444 = vst [vmem:[#allocation30_spill] sm:$0xff] %v4006_v12  ;;  %v1842_v62 = vmul.f32 %v2907_v7, %v4431_v15  ;;  %2912 = vpow2.f32 %v1825_v3  ;;  %v1238_v38 = vmin.f32 %v1116_v28, 4.1351666  ;;  %2341 = vmax.xlane.f32.xlu0 %v4006_v12  ;;  %v4023_v51 = vadd.f32 %v3955_v11, %v3782_v27  ;;  %v4450_v28 = vld [vmem:[#allocation37_spill] sm:$0xff] }
 0x2ee   :  { %v1937_v24 = vmax.f32 %v1921_v5, 0.0  ;;  %v2209_v36 = vmax.f32 %v2193_v50, 0.0  ;;  %v1009_v39 = vadd.f32 %v1008_v52, %v3785_v32  ;;  %v1162_v23 = vpop.f32.mrf.mxu1  ;;  %v4027_v59 = vadd.f32 %v4449_v42, %v1541_v22  ;;  %v1125_v52 = vpop.f32.mrf.mxu0 }
 0x2ef   :  { %4448 = vst [vmem:[#allocation39_spill] sm:$0xff] %v4023_v51  ;;  %v1906_v49 = vmul.f32 0.5, %v1842_v62  ;;  %v1827_v15 = vmul.f32 1.442695, %v1238_v38  ;;  %v1122_v3 = vadd.f32 %v1121_v46, %v3756_v16  ;;  %v1120_v50 = vadd.f32 %v3972_v2, %v3782_v27  ;;  %v4452_v46 = vld [vmem:[#allocation41_spill] sm:$0xff] }
 0x2f0   :  { %v2909_v17 = vpop.eup %2908  ;;  %v2017_v7 = vmin.f32 %v4450_v28, %v1937_v24  ;;  %v2225_v5 = vmin.f32 %v4450_v28, %v2209_v36  ;;  %v4035_v11 = vadd.f32 %v1010_v61, %v3753_v1  ;;  %v2736_v12 = vpop.f32.mrf.mxu1  ;;  %v4041_v42 = vadd.f32 %v4452_v46, %v1542_v19  ;;  %v4454_v2 = vld [vmem:[#allocation21_spill] sm:$0xff]  ;;  %v4455_v19 = vld [vmem:[#allocation28_spill] sm:$0xff] }
 0x2f1   :  { %v1922_v62 = vsub.f32 %v3975_v20, %v1906_v49  ;;  %v2194_v22 = vadd.f32 %v1906_v49, %v3975_v20  ;;  %v1843_v38 = vmul.f32 %v2909_v17, %v4437_v10  ;;  %v4043_v24 = vpop.permute.xlu1 %1774  ;;  %2914 = vpow2.f32 %v1827_v15 }
 0x2f2   :  { %4451 = vst [vmem:[#allocation26_spill] sm:$0xff] %v4035_v11  ;;  %4453 = vst [vmem:[#allocation17_spill] sm:$0xff] %v4043_v24  ;;  %v1543_v36 = vmul.f32 %v4454_v2, %v1009_v39  ;;  %v1239_v1 = vmin.f32 %v1122_v3, 4.1351666  ;;  %v1013_v61 = vadd.f32 %v1012_v21, %v3785_v32  ;;  %2343 = vmax.xlane.f32.xlu1 %v4035_v11  ;;  %v1165_v28 = vpop.f32.mrf.mxu1  ;;  %v4457_v24 = vld [vmem:[#allocation32_spill] sm:$0xff] }
 0x2f3   :  { %2033 = vst [vmem:[#allocation9 + $0x100] sm:$0xff] %v2017_v7  ;;  %2241 = vst [vmem:[#allocation9 + $0x110] sm:$0xff] %v2225_v5  ;;  %v1938_v34 = vmax.f32 %v1922_v62, 0.0  ;;  %v2210_v20 = vmax.f32 %v2194_v22, 0.0  ;;  %v1907_v49 = vmul.f32 0.5, %v1843_v38  ;;  %v1126_v10 = vadd.f32 %v1125_v52, %v3756_v16  ;;  %v4456_v7 = vld [vmem:[#allocation20_spill] sm:$0xff] }
 0x2f4   :  { %v4050_v17 = vmul.f32 %v4455_v19, %v1120_v50  ;;  %v1829_v46 = vmul.f32 1.442695, %v1239_v1  ;;  %v1544_v5 = vmul.f32 %v4456_v7, %v1013_v61  ;;  %v1171_v15 = vadd.f32 %v2735_v29, %v3818_v13  ;;  %v2739_v39 = vpop.f32.mrf.mxu1  ;;  %v4458_v52 = vld [vmem:[#allocation49_spill] sm:$0xff] }
 0x2f5   :  { %v2911_v3 = vpop.eup %2910  ;;  %v2018_v32 = vmin.f32 %v4457_v24, %v1938_v34  ;;  %v2226_v21 = vmin.f32 %v4457_v24, %v2210_v20  ;;  %v1923_v62 = vsub.f32 %v3995_v18, %v1907_v49  ;;  %v2195_v22 = vadd.f32 %v1907_v49, %v3995_v18  ;;  %v4459_v38 = vld [vmem:[#allocation45_spill] sm:$0xff]  ;;  %v4065_v20 = vpop.permute.xlu1 %1782 }
 0x2f6   :  { %v1844_v16 = vmul.f32 %v2911_v3, %v4439_v41  ;;  %v4060_v50 = vadd.f32 %v4458_v52, %v1543_v36  ;;  %2916 = vpow2.f32 %v1829_v46  ;;  %v4063_v1 = vadd.f32 %v4459_v38, %v1544_v5  ;;  %v1178_v29 = vpop.f32.mrf.mxu1  ;;  %4460 = vst [vmem:[#allocation25_spill] sm:$0xff] %v4065_v20  ;;  %v4461_v46 = vld [vmem:[#allocation33_spill] sm:$0xff] }
 0x2f7   :  { %2034 = vst [vmem:[#allocation9 + $0x120] sm:$0xff] %v2018_v32  ;;  %2242 = vst [vmem:[#allocation9 + $0x130] sm:$0xff] %v2226_v21  ;;  %v1939_v61 = vmax.f32 %v1923_v62, 0.0  ;;  %v2211_v34 = vmax.f32 %v2195_v22, 0.0  ;;  %v1240_v11 = vmin.f32 %v1126_v10, 4.1351666  ;;  %v1163_v18 = vadd.f32 %v1162_v23, %v3818_v13  ;;  %v4072_v22 = vpop.permute.xlu0 %1770 }
 0x2f8   :  { %v1243_v24 = vmin.f32 %v1171_v15, 4.1351666  ;;  %v1908_v51 = vmul.f32 0.5, %v1844_v16  ;;  %v1174_v41 = vadd.f32 %v2736_v12, %v3818_v13  ;;  %v1166_v36 = vadd.f32 %v1165_v28, %v3818_v13  ;;  %v2740_v49 = vpop.f32.mrf.mxu1 }
 0x2f9   :  { %v2019_v5 = vmin.f32 %v4461_v46, %v1939_v61  ;;  %v2227_v3 = vmin.f32 %v4461_v46, %v2211_v34  ;;  %v1831_v32 = vmul.f32 1.442695, %v1240_v11  ;;  %v1241_v16 = vmin.f32 %v1163_v18, 4.1351666 }
 0x2fa   :  { %v1853_v21 = vmul.f32 1.442695, %v1243_v24  ;;  %v2913_v62 = vpop.eup %2912  ;;  %v1924_v10 = vsub.f32 %v4011_v26, %v1908_v51  ;;  %v2196_v15 = vadd.f32 %v1908_v51, %v4011_v26  ;;  %v1244_v23 = vmin.f32 %v1174_v41, 4.1351666  ;;  %v1181_v52 = vpop.f32.mrf.mxu1  ;;  %v4462_v41 = vld [vmem:[#allocation38_spill] sm:$0xff] }
 0x2fb   :  { %2035 = vst [vmem:[#allocation9 + $0x140] sm:$0xff] %v2019_v5  ;;  %2243 = vst [vmem:[#allocation9 + $0x150] sm:$0xff] %v2227_v3  ;;  %v1845_v12 = vmul.f32 %v2913_v62, %v4443_v58  ;;  %2918 = vpow2.f32 %v1831_v32  ;;  %v1242_v28 = vmin.f32 %v1166_v36, 4.1351666  ;;  %v1187_v38 = vadd.f32 %v2739_v39, %v3818_v13  ;;  %v4078_v24 = vpop.permute.xlu1 %2006 }
 0x2fc   :  { %v1940_v11 = vmax.f32 %v1924_v10, 0.0  ;;  %v2212_v61 = vmax.f32 %v2196_v15, 0.0  ;;  %2920 = vpow2.f32 %v1853_v21  ;;  %v1849_v34 = vmul.f32 1.442695, %v1241_v16  ;;  %v2743_v46 = vpop.f32.mrf.mxu1  ;;  %v4085_v10 = vpop.permute.xlu0 %1778 }
 0x2fd   :  { %v1909_v20 = vmul.f32 0.5, %v1845_v12  ;;  %v1855_v26 = vmul.f32 1.442695, %v1244_v23  ;;  %v1851_v51 = vmul.f32 1.442695, %v1242_v28  ;;  %v1179_v18 = vadd.f32 %v1178_v29, %v3818_v13 }
 0x2fe   :  { %v2020_v5 = vmin.f32 %v4462_v41, %v1940_v11  ;;  %v2228_v58 = vmin.f32 %v4462_v41, %v2212_v61  ;;  %2922 = vpow2.f32 %v1849_v34  ;;  %v1247_v36 = vmin.f32 %v1187_v38, 4.1351666  ;;  %v1194_v3 = vpop.f32.mrf.mxu1  ;;  %v2915_v39 = vpop.eup %2914 }
 0x2ff   :  { %v1925_v32 = vsub.f32 %v4027_v59, %v1909_v20  ;;  %v2197_v21 = vadd.f32 %v1909_v20, %v4027_v59  ;;  %2924 = vpow2.f32 %v1855_v26  ;;  %v1245_v62 = vmin.f32 %v1179_v18, 4.1351666  ;;  %v4090_v59 = vpop.permute.xlu1 %2090  ;;  %v4463_v18 = vld [vmem:[#allocation34_spill] sm:$0xff] }
 0x300   :  { %2036 = vst [vmem:[#allocation9 + $0x160] sm:$0xff] %v2020_v5  ;;  %2244 = vst [vmem:[#allocation9 + $0x170] sm:$0xff] %v2228_v58  ;;  %2926 = vpow2.f32 %v1851_v51  ;;  %v1861_v29 = vmul.f32 1.442695, %v1247_v36  ;;  %v1190_v15 = vadd.f32 %v2740_v49, %v3818_v13  ;;  %v1182_v16 = vadd.f32 %v1181_v52, %v3818_v13  ;;  %v2744_v23 = vpop.f32.mrf.mxu1  ;;  %v3024_v5 = vld [vmem:[%s4345_s7 + $0x68] sm:$0xff]  ;;  %v1999_v36 = vpop.permute.xlu0 %1998 }
 0x301   :  { %v1941_v12 = vmax.f32 %v1925_v32, 0.0  ;;  %v2213_v28 = vmax.f32 %v2197_v21, 0.0  ;;  %v1857_v38 = vmul.f32 1.442695, %v1245_v62  ;;  %v1203_v11 = vadd.f32 %v2743_v46, %v3818_v13  ;;  %v3025_v46 = vld [vmem:[%s4345_s7 + $0x60] sm:$0xff] }
 0x302   :  { %2928 = vpow2.f32 %v1861_v29  ;;  %v1248_v20 = vmin.f32 %v1190_v15, 4.1351666  ;;  %v1246_v61 = vmin.f32 %v1182_v16, 4.1351666  ;;  %v1846_v34 = vmul.f32 %v2915_v39, %v4447_v25  ;;  %v1197_v26 = vpop.f32.mrf.mxu1 }
 0x303   :  { %v2917_v51 = vpop.eup %2916  ;;  %v2021_v41 = vmin.f32 %v4463_v18, %v1941_v12  ;;  %v2229_v49 = vmin.f32 %v4463_v18, %v2213_v28  ;;  %2930 = vpow2.f32 %v1857_v38  ;;  %v1251_v52 = vmin.f32 %v1203_v11, 4.1351666  ;;  %2142 = vperm.xlu1 %2782, %v3024_v5   ;;  %2138 = vperm.xlu0 %2783, %v3025_v46  }
 0x304   :  { %v1863_v58 = vmul.f32 1.442695, %v1248_v20  ;;  %v1859_v25 = vmul.f32 1.442695, %v1246_v61  ;;  %v1910_v39 = vmul.f32 0.5, %v1846_v34  ;;  %v1195_v32 = vadd.f32 %v1194_v3, %v3818_v13  ;;  %v4107_v61 = vpop.permute.xlu1 %2098 }
 0x305   :  { %2037 = vst [vmem:[#allocation9 + $0x180] sm:$0xff] %v2021_v41  ;;  %2245 = vst [vmem:[#allocation9 + $0x190] sm:$0xff] %v2229_v49  ;;  %v1869_v21 = vmul.f32 1.442695, %v1251_v52  ;;  %v1206_v62 = vadd.f32 %v2744_v23, %v3818_v13  ;;  %v1847_v29 = vmul.f32 %v2917_v51, %v4454_v2  ;;  %v1198_v15 = vadd.f32 %v1197_v26, %v3818_v13  ;;  %v2747_v2 = vpop.f32.mrf.mxu1  ;;  %v4464_v52 = vld [vmem:[#allocation24_spill] sm:$0xff] }
 0x306   :  { %2932 = vpow2.f32 %v1863_v58  ;;  %v1926_v16 = vsub.f32 %v4041_v42, %v1910_v39  ;;  %v2198_v12 = vadd.f32 %v1910_v39, %v4041_v42  ;;  %v1249_v28 = vmin.f32 %v1195_v32, 4.1351666 }
 0x307   :  { %2934 = vpow2.f32 %v1859_v25  ;;  %v1252_v38 = vmin.f32 %v1206_v62, 4.1351666  ;;  %v1911_v11 = vmul.f32 0.5, %v1847_v29  ;;  %v1250_v20 = vmin.f32 %v1198_v15, 4.1351666  ;;  %v2003_v25 = vpop.permute.xlu0 %2002  ;;  %v4465_v15 = vld [vmem:[#allocation22_spill] sm:$0xff] }
 0x308   :  { %v2919_v3 = vpop.eup %2918  ;;  %2936 = vpow2.f32 %v1869_v21  ;;  %v1942_v34 = vmax.f32 %v1926_v16, 0.0  ;;  %v2214_v23 = vmax.f32 %v2198_v12, 0.0  ;;  %v1865_v18 = vmul.f32 1.442695, %v1249_v28  ;;  %v1210_v28 = vpop.f32.mrf.mxu1 }
 0x309   :  { %v2921_v51 = vpop.eup %2920  ;;  %v1848_v26 = vmul.f32 %v2919_v3, %v4456_v7  ;;  %v1871_v41 = vmul.f32 1.442695, %v1252_v38  ;;  %v1927_v49 = vsub.f32 %v4060_v50, %v1911_v11  ;;  %v2199_v42 = vadd.f32 %v1911_v11, %v4060_v50 }
 0x30a   :  { %v1883_v5 = vmul.f32 %v2921_v51, %v4464_v52  ;;  %v2022_v46 = vmin.f32 %v1999_v36, %v1942_v34  ;;  %v2230_v58 = vmin.f32 %v1999_v36, %v2214_v23  ;;  %2938 = vpow2.f32 %v1865_v18 }
 0x30b   :  { %v2923_v39 = vpop.eup %2922  ;;  %v1912_v32 = vmul.f32 0.5, %v1848_v26  ;;  %2940 = vpow2.f32 %v1871_v41  ;;  %v1943_v21 = vmax.f32 %v1927_v49, 0.0  ;;  %v2215_v62 = vmax.f32 %v2199_v42, 0.0  ;;  %v2103_v26 = vpop.permute.xlu1 %2102 }
 0x30c   :  { %v2925_v29 = vpop.eup %2924  ;;  %v1881_v16 = vmul.f32 %v2923_v39, %v4465_v15  ;;  %v2043_v7 = vmul.f32 0.5, %v1883_v5  ;;  %2038 = vst [vmem:[#allocation9 + $0x1a0] sm:$0xff] %v2022_v46  ;;  %2246 = vst [vmem:[#allocation9 + $0x1b0] sm:$0xff] %v2230_v58  ;;  %v1867_v12 = vmul.f32 1.442695, %v1250_v20  ;;  %v1219_v50 = vadd.f32 %v2747_v2, %v3818_v13  ;;  %v2748_v58 = vpop.f32.mrf.mxu1 }
 0x30d   :  { %v2927_v38 = vpop.eup %2926  ;;  %v1928_v36 = vsub.f32 %v4063_v1, %v1912_v32  ;;  %v2200_v11 = vadd.f32 %v1912_v32, %v4063_v1  ;;  %v1884_v3 = vmul.f32 %v2925_v29, %v3564_v9  ;;  %v2023_v34 = vmin.f32 %v2003_v25, %v1943_v21  ;;  %v4128_v21 = vpop.permute.xlu0 %2094 }
 0x30e   :  { %v2041_v23 = vmul.f32 0.5, %v1881_v16  ;;  %v2059_v18 = vsub.f32 %v3834_v30, %v2043_v7  ;;  %v2251_v51 = vadd.f32 %v2043_v7, %v3834_v30  ;;  %v2231_v41 = vmin.f32 %v2003_v25, %v2215_v62 }
 0x30f   :  { %v4120_v49 = vpop.eup %2928  ;;  %v1944_v20 = vmax.f32 %v1928_v36, 0.0  ;;  %v2216_v2 = vmax.f32 %v2200_v11, 0.0  ;;  %v2044_v42 = vmul.f32 0.5, %v1884_v3  ;;  %2039 = vst [vmem:[#allocation9 + $0x1c0] sm:$0xff] %v2023_v34  ;;  %2942 = vpow2.f32 %v1867_v12  ;;  %v2111_v34 = vpop.permute.xlu1 %2110 }
 0x310   :  { %v2931_v52 = vpop.eup %2930  ;;  %v2057_v1 = vsub.f32 %v3824_v6, %v2041_v23  ;;  %v2249_v9 = vadd.f32 %v2041_v23, %v3824_v6  ;;  %v2075_v5 = vmax.f32 %v2059_v18, 0.0  ;;  %v2267_v46 = vmax.f32 %v2251_v51, 0.0  ;;  %2247 = vst [vmem:[#allocation9 + $0x1d0] sm:$0xff] %v2231_v41  ;;  %v4466_v18 = vld [vmem:[#allocation23_spill] sm:$0xff]  ;;  %v1213_v51 = vpop.f32.mrf.mxu1 }
 0x311   :  { %v2024_v30 = vmin.f32 %v4078_v24, %v1944_v20  ;;  %v2232_v25 = vmin.f32 %v4078_v24, %v2216_v2  ;;  %v2060_v39 = vsub.f32 %v3841_v43, %v2044_v42  ;;  %v2252_v32 = vadd.f32 %v2044_v42, %v3841_v43 }
 0x312   :  { %v2073_v62 = vmax.f32 %v2057_v1, 0.0  ;;  %v2265_v29 = vmax.f32 %v2249_v9, 0.0  ;;  %v2155_v15 = vmin.f32 %v4107_v61, %v2075_v5  ;;  %v2283_v6 = vmin.f32 %v4107_v61, %v2267_v46  ;;  %v4140_v46 = vpop.permute.xlu0 %2106 }
 0x313   :  { %v2933_v16 = vpop.eup %2932  ;;  %2040 = vst [vmem:[#allocation9 + $0x1e0] sm:$0xff] %v2024_v30  ;;  %2248 = vst [vmem:[#allocation9 + $0x1f0] sm:$0xff] %v2232_v25  ;;  %v2076_v7 = vmax.f32 %v2060_v39, 0.0  ;;  %v2268_v12 = vmax.f32 %v2252_v32, 0.0  ;;  %v1255_v36 = vmin.f32 %v1219_v50, 4.1351666  ;;  %v1211_v24 = vadd.f32 %v1210_v28, %v3818_v13 }
 0x314   :  { %v2935_v11 = vpop.eup %2934  ;;  %v2153_v3 = vmin.f32 %v4090_v59, %v2073_v62  ;;  %v2281_v43 = vmin.f32 %v4090_v59, %v2265_v29  ;;  %2171 = vst [vmem:[#allocation9 + $0x48] sm:$0xff] %v2155_v15  ;;  %2299 = vst [vmem:[#allocation9 + $0x58] sm:$0xff] %v2283_v6  ;;  %v1888_v23 = vmul.f32 %v2933_v16, %v3572_v60 }
 0x315   :  { %v1882_v61 = vmul.f32 %v2927_v38, %v4466_v18  ;;  %v2937_v41 = vpop.eup %2936  ;;  %v2156_v20 = vmin.f32 %v2103_v26, %v2076_v7  ;;  %v2284_v2 = vmin.f32 %v2103_v26, %v2268_v12  ;;  %v1886_v50 = vmul.f32 %v2935_v11, %v3568_v54 }
 0x316   :  { %v1877_v42 = vmul.f32 1.442695, %v1255_v36  ;;  %2169 = vst [vmem:[#allocation9 + $0x8] sm:$0xff] %v2153_v3  ;;  %2297 = vst [vmem:[#allocation9 + $0x18] sm:$0xff] %v2281_v43  ;;  %v2048_v28 = vmul.f32 0.5, %v1888_v23  ;;  %v1222_v59 = vadd.f32 %v2748_v58, %v3818_v13  ;;  %v1214_v38 = vadd.f32 %v1213_v51, %v3818_v13  ;;  %v2119_v13 = vpop.permute.xlu1 %2118  ;;  %v4151_v18 = vpop.permute.xlu0 %2114 }
 0x317   :  { %v1253_v1 = vmin.f32 %v1211_v24, 4.1351666  ;;  %v2042_v9 = vmul.f32 0.5, %v1882_v61  ;;  %v2939_v5 = vpop.eup %2938  ;;  %2172 = vst [vmem:[#allocation9 + $0x68] sm:$0xff] %v2156_v20  ;;  %2300 = vst [vmem:[#allocation9 + $0x78] sm:$0xff] %v2284_v2  ;;  %v2046_v60 = vmul.f32 0.5, %v1886_v50  ;;  %v1885_v26 = vmul.f32 %v2931_v52, %v3570_v55 }
 0x318   :  { %2944 = vpow2.f32 %v1877_v42  ;;  %v2941_v54 = vpop.eup %2940  ;;  %v2064_v30 = vsub.f32 %v3924_v45, %v2048_v28  ;;  %v2256_v25 = vadd.f32 %v2048_v28, %v3924_v45  ;;  %v1256_v15 = vmin.f32 %v1222_v59, 4.1351666 }
 0x319   :  { %v1873_v39 = vmul.f32 1.442695, %v1253_v1  ;;  %v2058_v32 = vsub.f32 %v3827_v57, %v2042_v9  ;;  %v2062_v58 = vsub.f32 %v3873_v56, %v2046_v60  ;;  %v2254_v62 = vadd.f32 %v2046_v60, %v3873_v56 }
 0x31a   :  { %v2250_v29 = vadd.f32 %v2042_v9, %v3827_v57  ;;  %v2080_v6 = vmax.f32 %v2064_v30, 0.0  ;;  %v2272_v16 = vmax.f32 %v2256_v25, 0.0  ;;  %v1879_v36 = vmul.f32 1.442695, %v1256_v15  ;;  %v2127_v28 = vpop.permute.xlu1 %2126 }
 0x31b   :  { %2946 = vpow2.f32 %v1873_v39  ;;  %v2074_v55 = vmax.f32 %v2058_v32, 0.0  ;;  %v2078_v52 = vmax.f32 %v2062_v58, 0.0  ;;  %v2270_v7 = vmax.f32 %v2254_v62, 0.0 }
 0x31c   :  { %v2266_v12 = vmax.f32 %v2250_v29, 0.0  ;;  %v2943_v45 = vpop.eup %2942  ;;  %v2160_v24 = vmin.f32 %v2119_v13, %v2080_v6  ;;  %v2288_v11 = vmin.f32 %v2119_v13, %v2272_v16  ;;  %v1254_v43 = vmin.f32 %v1214_v38, 4.1351666 }
 0x31d   :  { %v2154_v3 = vmin.f32 %v4128_v21, %v2074_v55  ;;  %v2158_v23 = vmin.f32 %v2111_v34, %v2078_v52  ;;  %v2286_v56 = vmin.f32 %v2111_v34, %v2270_v7  ;;  %2948 = vpow2.f32 %v1879_v36 }
 0x31e   :  { %v2282_v57 = vmin.f32 %v4128_v21, %v2266_v12  ;;  %2176 = vst [vmem:[#allocation9 + $0xe8] sm:$0xff] %v2160_v24  ;;  %2304 = vst [vmem:[#allocation9 + $0xf8] sm:$0xff] %v2288_v11  ;;  %v1890_v61 = vmul.f32 %v2943_v45, %v3576_v4  ;;  %v1875_v51 = vmul.f32 1.442695, %v1254_v43  ;;  %v2045_v20 = vmul.f32 0.5, %v1885_v26  ;;  %v2123_v26 = vpop.permute.xlu0 %2122 }
 0x31f   :  { %2170 = vst [vmem:[#allocation9 + $0x28] sm:$0xff] %v2154_v3  ;;  %v1892_v2 = vmul.f32 %v2941_v54, %v4438_v44  ;;  %v1124_v50 = vadd.f32 %v4016_v0, %v3782_v27  ;;  %2174 = vst [vmem:[#allocation9 + $0xa8] sm:$0xff] %v2158_v23  ;;  %v1887_v21 = vmul.f32 %v4120_v49, %v3574_v63 }
 0x320   :  { %2302 = vst [vmem:[#allocation9 + $0xb8] sm:$0xff] %v2286_v56  ;;  %2298 = vst [vmem:[#allocation9 + $0x38] sm:$0xff] %v2282_v57  ;;  %v1889_v34 = vmul.f32 %v2939_v5, %v3578_v8  ;;  %v1891_v42 = vmul.f32 %v2937_v41, %v4436_v14  ;;  %v2050_v1 = vmul.f32 0.5, %v1890_v61  ;;  %2950 = vpow2.f32 %v1875_v51 }
 0x321   :  { %v2061_v4 = vsub.f32 %v3854_v40, %v2045_v20  ;;  %v2253_v44 = vadd.f32 %v2045_v20, %v3854_v40  ;;  %v2052_v9 = vmul.f32 0.5, %v1892_v2  ;;  %v2047_v59 = vmul.f32 0.5, %v1887_v21  ;;  %v4468_v2 = vld [vmem:[#allocation39_spill] sm:$0xff] }
 0x322   :  { %v2049_v27 = vmul.f32 0.5, %v1889_v34  ;;  %v2051_v0 = vmul.f32 0.5, %v1891_v42  ;;  %v2066_v60 = vsub.f32 %v3964_v48, %v2050_v1  ;;  %v2258_v38 = vadd.f32 %v2050_v1, %v3964_v48  ;;  %v2131_v3 = vpop.permute.xlu0 %2130  ;;  %v4470_v1 = vld [vmem:[#allocation25_spill] sm:$0xff] }
 0x323   :  { %v2077_v63 = vmax.f32 %v2061_v4, 0.0  ;;  %v2269_v49 = vmax.f32 %v2253_v44, 0.0  ;;  %v2068_v8 = vsub.f32 %v3997_v47, %v2052_v9  ;;  %v2260_v14 = vadd.f32 %v2052_v9, %v3997_v47  ;;  %v2135_v47 = vpop.permute.xlu1 %2134 }
 0x324   :  { %v2063_v41 = vsub.f32 %v3886_v37, %v2047_v59  ;;  %v2255_v5 = vadd.f32 %v2047_v59, %v3886_v37  ;;  %v2082_v54 = vmax.f32 %v2066_v60, 0.0  ;;  %v2274_v30 = vmax.f32 %v2258_v38, 0.0  ;;  %v4471_v59 = vld [vmem:[#allocation17_spill] sm:$0xff] }
 0x325   :  { %v2945_v40 = vpop.eup %2944  ;;  %v2157_v25 = vmin.f32 %v4140_v46, %v2077_v63  ;;  %v2285_v39 = vmin.f32 %v4140_v46, %v2269_v49  ;;  %v2084_v32 = vmax.f32 %v2068_v8, 0.0  ;;  %v2276_v48 = vmax.f32 %v2260_v14, 0.0  ;;  %v4472_v14 = vld [vmem:[#allocation42_spill] sm:$0xff] }
 0x326   :  { %v2079_v58 = vmax.f32 %v2063_v41, 0.0  ;;  %v2271_v62 = vmax.f32 %v2255_v5, 0.0  ;;  %v2162_v29 = vmin.f32 %v2127_v28, %v2082_v54  ;;  %v2290_v15 = vmin.f32 %v2127_v28, %v2274_v30 }
 0x327   :  { %2173 = vst [vmem:[#allocation9 + $0x88] sm:$0xff] %v2157_v25  ;;  %2301 = vst [vmem:[#allocation9 + $0x98] sm:$0xff] %v2285_v39  ;;  %v2065_v13 = vsub.f32 %v3939_v53, %v2049_v27  ;;  %v2257_v37 = vadd.f32 %v2049_v27, %v3939_v53  ;;  %v2164_v16 = vmin.f32 %v2135_v47, %v2084_v32  ;;  %v4467_v53 = vld [vmem:[#allocation31_spill] sm:$0xff] }
 0x328   :  { %v2947_v6 = vpop.eup %2946  ;;  %v2292_v55 = vmin.f32 %v2135_v47, %v2276_v48  ;;  %v2159_v52 = vmin.f32 %v4151_v18, %v2079_v58  ;;  %v2287_v46 = vmin.f32 %v4151_v18, %v2271_v62  ;;  %2178 = vst [vmem:[#allocation9 + $0x128] sm:$0xff] %v2162_v29  ;;  %2306 = vst [vmem:[#allocation9 + $0x138] sm:$0xff] %v2290_v15  ;;  %v4474_v39 = vld [vmem:[#allocation47_spill] sm:$0xff]  ;;  %v4475_v62 = vld [vmem:[#allocation48_spill] sm:$0xff] }
 0x329   :  { %v2081_v7 = vmax.f32 %v2065_v13, 0.0  ;;  %v2273_v12 = vmax.f32 %v2257_v37, 0.0  ;;  %v2067_v36 = vsub.f32 %v3992_v35, %v2051_v0  ;;  %v2259_v45 = vadd.f32 %v2051_v0, %v3992_v35  ;;  %2180 = vst [vmem:[#allocation9 + $0x168] sm:$0xff] %v2164_v16  ;;  %v4476_v13 = vld [vmem:[#allocation50_spill] sm:$0xff] }
 0x32a   :  { %v4179_v24 = vadd.f32 %v4072_v22, %v4014_v31  ;;  %v1720_v11 = vmul.f32 %v4467_v53, %v1124_v50  ;;  %2308 = vst [vmem:[#allocation9 + $0x178] sm:$0xff] %v2292_v55  ;;  %2175 = vst [vmem:[#allocation9 + $0xc8] sm:$0xff] %v2159_v52  ;;  %v1893_v43 = vmul.f32 %v2947_v6, %v4446_v33  ;;  %v2949_v56 = vpop.eup %2948  ;;  %v4469_v50 = vld [vmem:[#allocation29_spill] sm:$0xff]  ;;  %v4477_v52 = vld [vmem:[#allocation51_spill] sm:$0xff] }
 0x32b   :  { %2303 = vst [vmem:[#allocation9 + $0xd8] sm:$0xff] %v2287_v46  ;;  %v1895_v23 = vmul.f32 %v2945_v40, %v4455_v19  ;;  %v2161_v57 = vmin.f32 %v2123_v26, %v2081_v7  ;;  %v2289_v18 = vmin.f32 %v2123_v26, %v2273_v12  ;;  %v2083_v61 = vmax.f32 %v2067_v36, 0.0  ;;  %v4473_v40 = vld [vmem:[#allocation44_spill] sm:$0xff] }
 0x32c   :  { %v2275_v35 = vmax.f32 %v2259_v45, 0.0  ;;  %v4186_v31 = vadd.f32 %v4085_v10, %v4050_v17  ;;  %v4188_v22 = vmul.f32 0.5, %v1893_v43  ;;  %v1896_v20 = vmul.f32 %v2949_v56, %v4467_v53  ;;  %v4478_v45 = vld [vmem:[#allocation52_spill] sm:$0xff] }
 0x32d   :  { %v4190_v51 = vmul.f32 0.5, %v1895_v23  ;;  %v1718_v33 = vmul.f32 %v4469_v50, %v4468_v2  ;;  %2177 = vst [vmem:[#allocation9 + $0x108] sm:$0xff] %v2161_v57  ;;  %2305 = vst [vmem:[#allocation9 + $0x118] sm:$0xff] %v2289_v18  ;;  %v2163_v19 = vmin.f32 %v2131_v3, %v2083_v61  ;;  %v2951_v34 = vpop.eup %2950  ;;  %v4208_v4 = vadd.f32 %v4470_v1, %v1720_v11  ;;  %v4479_v23 = vld [vmem:[#allocation53_spill] sm:$0xff] }
 0x32e   :  { %v2291_v21 = vmin.f32 %v2131_v3, %v2275_v35  ;;  %v2069_v42 = vsub.f32 %v4179_v24, %v4188_v22  ;;  %v4199_v17 = vadd.f32 %v4188_v22, %v4179_v24  ;;  %v1894_v44 = vmul.f32 %v2951_v34, %v4469_v50  ;;  %v4481_v34 = vld [vmem:[#allocation55_spill] sm:$0xff] }
 0x32f   :  { %v2071_v10 = vsub.f32 %v4186_v31, %v4190_v51  ;;  %v4205_v28 = vadd.f32 %v4190_v51, %v4186_v31  ;;  %2179 = vst [vmem:[#allocation9 + $0x148] sm:$0xff] %v2163_v19  ;;  %v4211_v9 = vmul.f32 0.5, %v1896_v20  ;;  %v4214_v27 = vadd.f32 %v4471_v59, %v1718_v33  ;;  %v4480_v20 = vld [vmem:[#allocation54_spill] sm:$0xff] }
 0x330   :  { %2307 = vst [vmem:[#allocation9 + $0x158] sm:$0xff] %v2291_v21  ;;  %v4216_v0 = vmul.f32 0.5, %v1894_v44 }
 0x331   :  { %v2072_v60 = vsub.f32 %v4208_v4, %v4211_v9  ;;  %v4222_v38 = vadd.f32 %v4211_v9, %v4208_v4 }
 0x332   :  { %v2070_v63 = vsub.f32 %v4214_v27, %v4216_v0  ;;  %v4228_v49 = vadd.f32 %v4216_v0, %v4214_v27  ;;  %v3027_v27 = vld [vmem:[%s4345_s7 + $0x70] sm:$0xff] }
 0x338   :  { %v2314_v8 = vpop.xlane.xlu1 %2313 }
 0x339   :  { %v2345_v41 = vsub.f32 %v4472_v14, %v2314_v8  ;;  %v4482_v8 = vld [vmem:[#allocation56_spill] sm:$0xff] }
 0x33b   :  { %v2361_v5 = vmul.f32 1.442695, %v2345_v41 }
 0x33c   :  { %v2316_v26 = vpop.xlane.xlu0 %2315 }
 0x33d   :  { %2952 = vpow2.f32 %v2361_v5  ;;  %v2346_v54 = vsub.f32 %v4473_v40, %v2316_v26  ;;  %v4483_v40 = vld [vmem:[#allocation57_spill] sm:$0xff] }
 0x33f   :  { %v2363_v30 = vmul.f32 1.442695, %v2346_v54 }
 0x340   :  { %v2318_v25 = vpop.xlane.xlu0 %2317 }
 0x341   :  { %2954 = vpow2.f32 %v2363_v30  ;;  %v2347_v32 = vsub.f32 %v4474_v39, %v2318_v25 }
 0x343   :  { %v2365_v48 = vmul.f32 1.442695, %v2347_v32  ;;  %v4484_v32 = vld [vmem:[#allocation15_spill] sm:$0xff] }
 0x344   :  { %v2320_v58 = vpop.xlane.xlu1 %2319 }
 0x345   :  { %2956 = vpow2.f32 %v2365_v48  ;;  %v2348_v29 = vsub.f32 %v4475_v62, %v2320_v58 }
 0x347   :  { %v2367_v15 = vmul.f32 1.442695, %v2348_v29 }
 0x348   :  { %v2322_v47 = vpop.xlane.xlu0 %2321 }
 0x349   :  { %2958 = vpow2.f32 %v2367_v15  ;;  %v2349_v37 = vsub.f32 %v4476_v13, %v2322_v47  ;;  %v4485_v15 = vld [vmem:[#allocation35_spill] sm:$0xff] }
 0x34a   :  { %v4235_v6 = vpop.eup %2952 }
 0x34b   :  { %v2369_v16 = vmul.f32 1.442695, %v2349_v37  ;;  %2393 = vadd.xlane.f32.xlu1 %v4235_v6 }
 0x34c   :  { %v2324_v55 = vpop.xlane.xlu1 %2323 }
 0x34d   :  { %2960 = vpow2.f32 %v2369_v16  ;;  %v2350_v46 = vsub.f32 %v4477_v52, %v2324_v55  ;;  %v4486_v55 = vld [vmem:[#allocation30_spill] sm:$0xff] }
 0x34e   :  { %v4239_v7 = vpop.eup %2954 }
 0x34f   :  { %v2371_v12 = vmul.f32 1.442695, %v2350_v46  ;;  %2395 = vadd.xlane.f32.xlu0 %v4239_v7 }
 0x350   :  { %v2326_v36 = vpop.xlane.xlu0 %2325 }
 0x351   :  { %2962 = vpow2.f32 %v2371_v12  ;;  %v2351_v53 = vsub.f32 %v4478_v45, %v2326_v36  ;;  %v4487_v45 = vld [vmem:[#allocation26_spill] sm:$0xff] }
 0x352   :  { %v4243_v11 = vpop.eup %2956 }
 0x353   :  { %v2373_v3 = vmul.f32 1.442695, %v2351_v53  ;;  %2397 = vadd.xlane.f32.xlu0 %v4243_v11 }
 0x355   :  { %v2328_v43 = vpop.xlane.xlu1 %2327  ;;  %2964 = vpow2.f32 %v2373_v3  ;;  %v2085_v3 = vmax.f32 %v2069_v42, 0.0 }
 0x356   :  { %v2352_v56 = vsub.f32 %v4479_v23, %v2328_v43  ;;  %v4247_v57 = vpop.eup %2958  ;;  %v2277_v43 = vmax.f32 %v4199_v17, 0.0  ;;  %v3026_v17 = vld [vmem:[%s4345_s7 + $0x78] sm:$0xff]  ;;  %s3151_s7 = smov [#allocation9]  }
 0x357   :  { %2399 = vadd.xlane.f32.xlu1 %v4247_v57  ;;  %s2490_s2 = sshll.u32 %s3151_s7, 4  ;;  %s2491_s2 = int_to_ptr.vmem [resolvable:$true] %s2490_s2 }
 0x358   :  { %v2375_v18 = vmul.f32 1.442695, %v2352_v56  ;;  %v2330_v61 = vpop.xlane.xlu0 %2329  ;;  %s3088_s3 = scalar_lea.vmem %s2491_s2, 8192  ;;  %p3093_p2 = scmp.lt.s32.totalorder %s2491_s2, %s2491_s2 }
 0x359   :  { %v2353_v2 = vsub.f32 %v4480_v20, %v2330_v61  ;;  %v2278_v61 = vmax.f32 %v4228_v49, 0.0  ;;  %p3089_p1 = scmp.ne.s32.totalorder %s2491_s2, %s3088_s3  ;;  %p3094_p3 = scmp.lt.s32.totalorder %s3088_s3, %s3088_s3 }
 0x35a   :  { %2966 = vpow2.f32 %v2375_v18  ;;  %v4250_v35 = vpop.eup %2960  ;;  %v2086_v18 = vmax.f32 %v2070_v63, 0.0 }
 0x35b   :  { %2401 = vadd.xlane.f32.xlu0 %v4250_v35  ;;  %v2377_v50 = vmul.f32 1.442695, %v2353_v2  ;;  %p3095_p4 = por %p3094_p3, %p3093_p2 }
 0x35d   :  { %2968 = vpow2.f32 %v2377_v50  ;;  %p3096_p5 = pnand %p3095_p4, %p3089_p1 }
 0x35e   :  { %v4254_v33 = vpop.eup %2962 }
 0x35f   :  { %2403 = vadd.xlane.f32.xlu1 %v4254_v33 }
 0x361   :  { %v2332_v19 = vpop.xlane.xlu1 %2331 }
 0x362   :  { %v4257_v21 = vpop.eup %2964  ;;  %v2354_v1 = vsub.f32 %v4481_v34, %v2332_v19 }
 0x363   :  { %2405 = vadd.xlane.f32.xlu0 %v4257_v21  ;;  %v2334_v59 = vpop.xlane.xlu0 %2333 }
 0x364   :  { %v2379_v44 = vmul.f32 1.442695, %v2354_v1  ;;  %v2355_v14 = vsub.f32 %v4482_v8, %v2334_v59 }
 0x366   :  { %2970 = vpow2.f32 %v2379_v44  ;;  %v2381_v5 = vmul.f32 1.442695, %v2355_v14 }
 0x367   :  { %v4262_v41 = vpop.eup %2966 }
 0x368   :  { %2407 = vadd.xlane.f32.xlu1 %v4262_v41  ;;  %2972 = vpow2.f32 %v2381_v5  ;;  %v2336_v26 = vpop.xlane.xlu1 %2335 }
 0x369   :  { %v2356_v54 = vsub.f32 %v4483_v40, %v2336_v26 }
 0x36a   :  { %v4266_v30 = vpop.eup %2968 }
 0x36b   :  { %v2383_v25 = vmul.f32 1.442695, %v2356_v54  ;;  %2409 = vadd.xlane.f32.xlu0 %v4266_v30 }
 0x36d   :  { %2974 = vpow2.f32 %v2383_v25 }
 0x36e   :  { %v2338_v39 = vpop.xlane.xlu0 %2337 }
 0x36f   :  { %v2357_v48 = vsub.f32 %v4484_v32, %v2338_v39 }
 0x371   :  { %v2385_v58 = vmul.f32 1.442695, %v2357_v48 }
 0x372   :  { %v2340_v62 = vpop.xlane.xlu1 %2339 }
 0x373   :  { %v4270_v29 = vpop.eup %2970  ;;  %2976 = vpow2.f32 %v2385_v58  ;;  %v2358_v47 = vsub.f32 %v4485_v15, %v2340_v62 }
 0x374   :  { %2411 = vadd.xlane.f32.xlu1 %v4270_v29 }
 0x375   :  { %v2387_v13 = vmul.f32 1.442695, %v2358_v47  ;;  %v4274_v37 = vpop.eup %2972 }
 0x376   :  { %v2342_v16 = vpop.xlane.xlu0 %2341  ;;  %2413 = vadd.xlane.f32.xlu0 %v4274_v37 }
 0x377   :  { %2978 = vpow2.f32 %v2387_v13  ;;  %v2359_v52 = vsub.f32 %v4486_v55, %v2342_v16 }
 0x379   :  { %v2389_v46 = vmul.f32 1.442695, %v2359_v52 }
 0x37a   :  { %v4278_v12 = vpop.eup %2974 }
 0x37b   :  { %2980 = vpow2.f32 %v2389_v46  ;;  %v2344_v36 = vpop.xlane.xlu1 %2343  ;;  %2415 = vadd.xlane.f32.xlu1 %v4278_v12 }
 0x37c   :  { %v2360_v53 = vsub.f32 %v4487_v45, %v2344_v36 }
 0x37e   :  { %v2391_v23 = vmul.f32 1.442695, %v2360_v53  ;;  %v2139_v56 = vpop.permute.xlu0 %2138 }
 0x37f   :  { %v2165_v20 = vmin.f32 %v2139_v56, %v2085_v3  ;;  %v2293_v2 = vmin.f32 %v2139_v56, %v2277_v43  ;;  %v2143_v50 = vpop.permute.xlu1 %2142 }
 0x380   :  { %v4290_v19 = vpop.eup %2976  ;;  %2982 = vpow2.f32 %v2391_v23  ;;  %v2166_v34 = vmin.f32 %v2143_v50, %v2086_v18  ;;  %v2294_v1 = vmin.f32 %v2143_v50, %v2278_v61 }
 0x381   :  { %2181 = vst [vmem:[#allocation9 + $0x188] sm:$0xff] %v2165_v20  ;;  %2309 = vst [vmem:[#allocation9 + $0x198] sm:$0xff] %v2293_v2  ;;  %2417 = vadd.xlane.f32.xlu0 %v4290_v19  ;;  %v2279_v20 = vmax.f32 %v4205_v28, 0.0  ;;  %v2088_v2 = vmax.f32 %v2072_v60, 0.0 }
 0x382   :  { %2182 = vst [vmem:[#allocation9 + $0x1a8] sm:$0xff] %v2166_v34  ;;  %2310 = vst [vmem:[#allocation9 + $0x1b8] sm:$0xff] %v2294_v1 }
 0x384   :  { %v4293_v24 = vpop.eup %2978 }
 0x385   :  { %2419 = vadd.xlane.f32.xlu1 %v4293_v24 }
 0x388   :  { %v4296_v22 = vpop.eup %2980 }
 0x389   :  { %2421 = vadd.xlane.f32.xlu0 %v4296_v22 }
 0x38d   :  { %v4299_v42 = vpop.eup %2982 }
 0x38e   :  { %2423 = vadd.xlane.f32.xlu1 %v4299_v42 }
 0x39f   :  { %2150 = vperm.xlu1 %2782, %v3026_v17   ;;  %2146 = vperm.xlu0 %2783, %v3027_v27  }
 0x3d4   :  { %v2394_v0 = vpop.xlane.xlu1 %2393 }
 0x3d5   :  { %2984 = vrcp.f32 %v2394_v0 }
 0x3d8   :  { %v2396_v63 = vpop.xlane.xlu0 %2395 }
 0x3d9   :  { %2986 = vrcp.f32 %v2396_v63 }
 0x3dc   :  { %v2398_v49 = vpop.xlane.xlu0 %2397 }
 0x3dd   :  { %2988 = vrcp.f32 %v2398_v49 }
 0x3e0   :  { %v2400_v44 = vpop.xlane.xlu1 %2399 }
 0x3e1   :  { %2990 = vrcp.f32 %v2400_v44 }
 0x3e2   :  { %v2985_v59 = vpop.eup %2984 }
 0x3e3   :  { %v2426_v8 = vmul.f32 %v2985_v59, %v4235_v6 }
 0x3e4   :  { %v2402_v14 = vpop.xlane.xlu0 %2401 }
 0x3e5   :  { %2457 = vst [vmem:[#allocation8] sm:$0xff] %v2426_v8  ;;  %2992 = vrcp.f32 %v2402_v14 }
 0x3e6   :  { %v2987_v5 = vpop.eup %2986 }
 0x3e7   :  { %v2428_v26 = vmul.f32 %v2987_v5, %v4239_v7 }
 0x3e8   :  { %v2404_v40 = vpop.xlane.xlu1 %2403 }
 0x3e9   :  { %2458 = vst [vmem:[#allocation8 + $0x8] sm:$0xff] %v2428_v26  ;;  %2994 = vrcp.f32 %v2404_v40 }
 0x3ea   :  { %v2989_v54 = vpop.eup %2988 }
 0x3eb   :  { %v2430_v25 = vmul.f32 %v2989_v54, %v4243_v11 }
 0x3ec   :  { %v2406_v39 = vpop.xlane.xlu0 %2405 }
 0x3ed   :  { %2459 = vst [vmem:[#allocation8 + $0x10] sm:$0xff] %v2430_v25  ;;  %2996 = vrcp.f32 %v2406_v39 }
 0x3ee   :  { %v2991_v32 = vpop.eup %2990 }
 0x3ef   :  { %v2432_v48 = vmul.f32 %v2991_v32, %v4247_v57 }
 0x3f1   :  { %v2408_v58 = vpop.xlane.xlu1 %2407  ;;  %2460 = vst [vmem:[#allocation8 + $0x18] sm:$0xff] %v2432_v48 }
 0x3f2   :  { %2998 = vrcp.f32 %v2408_v58  ;;  %v2993_v6 = vpop.eup %2992 }
 0x3f3   :  { %v2434_v62 = vmul.f32 %v2993_v6, %v4250_v35 }
 0x3f4   :  { %v2410_v7 = vpop.xlane.xlu0 %2409 }
 0x3f5   :  { %2461 = vst [vmem:[#allocation8 + $0x20] sm:$0xff] %v2434_v62  ;;  %3000 = vrcp.f32 %v2410_v7 }
 0x3f6   :  { %v2995_v15 = vpop.eup %2994 }
 0x3f7   :  { %v2436_v47 = vmul.f32 %v2995_v15, %v4254_v33 }
 0x3f9   :  { %2462 = vst [vmem:[#allocation8 + $0x28] sm:$0xff] %v2436_v47 }
 0x3fa   :  { %v2997_v11 = vpop.eup %2996 }
 0x3fb   :  { %v2438_v13 = vmul.f32 %v2997_v11, %v4257_v21 }
 0x3fd   :  { %2463 = vst [vmem:[#allocation8 + $0x30] sm:$0xff] %v2438_v13  ;;  %v2412_v16 = vpop.xlane.xlu1 %2411 }
 0x3fe   :  { %3002 = vrcp.f32 %v2412_v16 }
 0x3ff   :  { %v2999_v55 = vpop.eup %2998  ;;  %v2414_v52 = vpop.xlane.xlu0 %2413 }
 0x400   :  { %v2440_v57 = vmul.f32 %v2999_v55, %v4262_v41  ;;  %3004 = vrcp.f32 %v2414_v52 }
 0x402   :  { %2464 = vst [vmem:[#allocation8 + $0x38] sm:$0xff] %v2440_v57  ;;  %v3001_v35 = vpop.eup %3000 }
 0x403   :  { %v2442_v46 = vmul.f32 %v3001_v35, %v4266_v30 }
 0x404   :  { %v2416_v36 = vpop.xlane.xlu1 %2415 }
 0x405   :  { %2465 = vst [vmem:[#allocation8 + $0x40] sm:$0xff] %v2442_v46  ;;  %3006 = vrcp.f32 %v2416_v36 }
 0x40a   :  { %v2418_v33 = vpop.xlane.xlu0 %2417 }
 0x40b   :  { %v3003_v45 = vpop.eup %3002  ;;  %3008 = vrcp.f32 %v2418_v33 }
 0x40c   :  { %v2444_v21 = vmul.f32 %v3003_v45, %v4270_v29  ;;  %v2087_v29 = vmax.f32 %v2071_v10, 0.0 }
 0x40d   :  { %v3005_v53 = vpop.eup %3004 }
 0x40e   :  { %2466 = vst [vmem:[#allocation8 + $0x48] sm:$0xff] %v2444_v21  ;;  %v2420_v3 = vpop.xlane.xlu1 %2419  ;;  %v2446_v43 = vmul.f32 %v3005_v53, %v4274_v37 }
 0x40f   :  { %3010 = vrcp.f32 %v2420_v3 }
 0x410   :  { %2467 = vst [vmem:[#allocation8 + $0x50] sm:$0xff] %v2446_v43 }
 0x412   :  { %v2422_v41 = vpop.xlane.xlu0 %2421  ;;  %v3007_v23 = vpop.eup %3006 }
 0x413   :  { %3012 = vrcp.f32 %v2422_v41  ;;  %v2448_v30 = vmul.f32 %v3007_v23, %v4278_v12  ;;  %v2280_v12 = vmax.f32 %v4222_v38, 0.0 }
 0x415   :  { %2468 = vst [vmem:[#allocation8 + $0x58] sm:$0xff] %v2448_v30 }
 0x417   :  { %v2424_v56 = vpop.xlane.xlu1 %2423 }
 0x418   :  { %v3009_v18 = vpop.eup %3008  ;;  %3014 = vrcp.f32 %v2424_v56 }
 0x419   :  { %v2450_v61 = vmul.f32 %v3009_v18, %v4290_v19 }
 0x41a   :  { %v2147_v37 = vpop.permute.xlu0 %2146 }
 0x41b   :  { %2469 = vst [vmem:[#allocation8 + $0x60] sm:$0xff] %v2450_v61  ;;  %v2167_v50 = vmin.f32 %v2147_v37, %v2087_v29  ;;  %v2295_v34 = vmin.f32 %v2147_v37, %v2279_v20  ;;  %v2151_v1 = vpop.permute.xlu1 %2150 }
 0x41c   :  { %v3011_v19 = vpop.eup %3010  ;;  %v2168_v17 = vmin.f32 %v2151_v1, %v2088_v2  ;;  %v2296_v27 = vmin.f32 %v2151_v1, %v2280_v12 }
 0x41d   :  { %v2452_v31 = vmul.f32 %v3011_v19, %v4293_v24  ;;  %2183 = vst [vmem:[#allocation9 + $0x1c8] sm:$0xff] %v2167_v50  ;;  %2311 = vst [vmem:[#allocation9 + $0x1d8] sm:$0xff] %v2295_v34 }
 0x41e   :  { %2184 = vst [vmem:[#allocation9 + $0x1e8] sm:$0xff] %v2168_v17  ;;  %2312 = vst [vmem:[#allocation9 + $0x1f8] sm:$0xff] %v2296_v27 }
 0x41f   :  { %2470 = vst [vmem:[#allocation8 + $0x68] sm:$0xff] %v2452_v31 }
 0x420   :  { %3099 = shalt.err (!%p3096_p5)
}
 0x421   :  { %s3152_s24 = smov 512   ;;  %s3153_s25 = smov 32   ;;  %v3013_v51 = vpop.eup %3012 }
 0x422   :  { %2496 = dma.vmem_to_hbm [thread:$0]  %s2491_s2, 8192, %s4347_s9, [#allocation10], %s3152_s24, %s3152_s24, %s3153_s25   ;;  %v2454_v10 = vmul.f32 %v3013_v51, %v4296_v22 }
 0x423   :  { %s3154_s5 = smov [#allocation8]  }
 0x424   :  { %2471 = vst [vmem:[#allocation8 + $0x70] sm:$0xff] %v2454_v10  ;;  %s2478_s27 = sshll.u32 %s3154_s5, 4  ;;  %s2479_s27 = int_to_ptr.vmem [resolvable:$true] %s2478_s27 }
 0x425   :  { %v3015_v28 = vpop.eup %3014  ;;  %s3108_s28 = scalar_lea.vmem %s2479_s27, 2048  ;;  %p3113_p7 = scmp.lt.s32.totalorder %s2479_s27, %s2479_s27 }
 0x426   :  { %v2456_v4 = vmul.f32 %v3015_v28, %v4299_v42  ;;  %p3109_p6 = scmp.ne.s32.totalorder %s2479_s27, %s3108_s28  ;;  %p3114_p8 = scmp.lt.s32.totalorder %s3108_s28, %s3108_s28 }
 0x428   :  { %2472 = vst [vmem:[#allocation8 + $0x78] sm:$0xff] %v2456_v4  ;;  %p3115_p9 = por %p3114_p8, %p3113_p7 }
 0x42a   :  { %p3116_p10 = pnand %p3115_p9, %p3109_p6 }
 0x42c   :  { %3119 = shalt.err (!%p3116_p10)
}
 0x42d   :  { %s3155_s30 = smov 128   ;;  %s3156_s9 = smov 8  }
 0x42e   :  { %2484 = dma.vmem_to_hbm [thread:$0]  %s2479_s27, 2048, %s4346_s8, [#allocation4], %s3155_s30, %s3155_s30, %s3156_s9  }
 0x42f   :  { %3132 = dma.done.wait [#allocation4], 2048  }
 0x430   :  { %3133 = vsyncadd [#allocation4], 4294965248 }
 0x431   :  { %3134 = dma.done.wait [#allocation10], 8192  }
 0x432   :  { %3135 = vsyncadd [#allocation10], 4294959104 }
 0x433   :  { %2503 = vsyncpa [#allocation3], 1 }
 0x434   :  { %2504 = vsyncpa [#allocation6], 1 }
 0x435   :  { %2505 = vsyncpa [#allocation4], 1 }
 0x436   :  { %2506 = vsyncpa [#allocation10], 1 }

// kernel: tpu_custom_call.1
= control target key start
LH: loop header
LB: loop body
LE: loop exit
PB: predicated region body
PF: predicated region fallthrough
CT: control target
= control target key end

     0   :  { %15 = vsyncpa [#allocation3], 0  ;;  %s4338_s0 = inlined_call_operand.vmem [shape: bf16[128,256], index: 0, kind: input, shape index: {}]   ;;  %s4339_s1 = inlined_call_operand.hbm [shape: bf16[256,128], index: 1, kind: input, shape index: {}]   ;;  %s4340_s2 = inlined_call_operand.vmem [shape: f32[1,128], index: 2, kind: input, shape index: {}]   ;;  %s4341_s3 = inlined_call_operand.hbm [shape: bf16[128,128], index: 3, kind: input, shape index: {}]   ;;  %s4342_s4 = inlined_call_operand.vmem [shape: f32[1,128], index: 4, kind: input, shape index: {}]   ;;  %s4343_s5 = inlined_call_operand.hbm [shape: bf16[128,640], index: 5, kind: input, shape index: {}]   ;;  %s4344_s6 = inlined_call_operand.vmem [shape: f32[1,640], index: 6, kind: input, shape index: {}]   ;;  %s4345_s7 = inlined_call_operand.vmem [shape: f32[128,8], index: 7, kind: input, shape index: {}]   ;;  %s4346_s8 = inlined_call_operand.hbm [shape: f32[128,128], index: 8, kind: output, shape index: {0}]   ;;  %s4347_s9 = inlined_call_operand.hbm [shape: f32[128,512], index: 9, kind: output, shape index: {1}]  }
   0x1   :  { %16 = vsyncpa [#allocation6], 0 }
   0x2   :  { %17 = vsyncpa [#allocation4], 0 }
   0x3   :  { %18 = vsyncpa [#allocation10], 0  ;;  %s3136_s30 = smov [#allocation5]   ;;  %s3137_s11 = smov [#allocation2]  }
   0x4   :  { %s40_s10 = sshll.u32 %s3136_s30, 4  ;;  %s26_s12 = sshll.u32 %s3137_s11, 4  ;;  %s41_s10 = int_to_ptr.vmem [resolvable:$true] %s40_s10  ;;  %s27_s12 = int_to_ptr.vmem [resolvable:$true] %s26_s12 }
   0x5   :  { %s3036_s13 = scalar_lea.vmem %s41_s10, 1024  ;;  %p3041_p1 = scmp.lt.s32.totalorder %s41_s10, %s41_s10 }
   0x6   :  { %p3037_p0 = scmp.ne.s32.totalorder %s41_s10, %s3036_s13  ;;  %p3042_p2 = scmp.lt.s32.totalorder %s3036_s13, %s3036_s13 }
   0x8   :  { %p3043_p3 = por %p3042_p2, %p3041_p1 }
   0xa   :  { %p3044_p4 = pnand %p3043_p3, %p3037_p0 }
   0xc   :  { %3047 = shalt.err (!%p3044_p4)
}
   0xd   :  { %s3138_s14 = smov 64   ;;  %s3139_s15 = smov 4  }
   0xe   :  { %46 = dma.hbm_to_vmem [thread:$0]  %s4341_s3, 1024, %s41_s10, [#allocation6], %s3138_s14, %s3138_s14, %s3139_s15  }
   0xf   :  { %s3056_s18 = scalar_lea.vmem %s27_s12, 2048  ;;  %p3061_p6 = scmp.lt.s32.totalorder %s27_s12, %s27_s12 }
  0x10   :  { %p3057_p5 = scmp.ne.s32.totalorder %s27_s12, %s3056_s18  ;;  %p3062_p7 = scmp.lt.s32.totalorder %s3056_s18, %s3056_s18 }
  0x12   :  { %p3063_p8 = por %p3062_p7, %p3061_p6 }
  0x14   :  { %p3064_p9 = pnand %p3063_p8, %p3057_p5 }
  0x16   :  { %3067 = shalt.err (!%p3064_p9)
}
  0x17   :  { %32 = dma.hbm_to_vmem [thread:$0]  %s4339_s1, 2048, %s27_s12, [#allocation3], %s3138_s14, %s3138_s14, %s3139_s15  }
  0x18   :  { %s3140_s21 = smov [#allocation7]  }
  0x19   :  { %s54_s22 = sshll.u32 %s3140_s21, 4  ;;  %s55_s22 = int_to_ptr.vmem [resolvable:$true] %s54_s22 }
  0x1a   :  { %s3076_s23 = scalar_lea.vmem %s55_s22, 5120  ;;  %p3081_p11 = scmp.lt.s32.totalorder %s55_s22, %s55_s22 }
  0x1b   :  { %p3077_p10 = scmp.ne.s32.totalorder %s55_s22, %s3076_s23  ;;  %p3082_p12 = scmp.lt.s32.totalorder %s3076_s23, %s3076_s23 }
  0x1d   :  { %p3083_p13 = por %p3082_p12, %p3081_p11 }
  0x1f   :  { %p3084_p0 = pnand %p3083_p13, %p3077_p10 }
  0x21   :  { %3087 = shalt.err (!%p3084_p0)
}
  0x22   :  { %s3141_s3 = smov 320   ;;  %s3142_s24 = smov 20  }
  0x23   :  { %60 = dma.hbm_to_vmem [thread:$0]  %s4343_s5, 5120, %s55_s22, [#allocation6], %s3141_s3, %s3141_s3, %s3142_s24  }
  0x24   :  { %3128 = dma.done.wait [#allocation3], 2048  }
  0x25   :  { %3129 = vsyncadd [#allocation3], 4294965248 }
  0x26   :  { %3130 = dma.done.wait [#allocation6], 6144  }
  0x27   :  { %3131 = vsyncadd [#allocation6], 4294961152  ;;  %v2784_v0 = vld [vmem:[#allocation2 + $0x78] sm:$0xff]   ;;  %v2786_v2 = vld [vmem:[#allocation2 + $0x70] sm:$0xff]   ;;  %s3143_s29 = smov 2   ;;  %v3144_v56 = vmov 2  }
  0x28   :  { %v2785_v1 = vld [vmem:[#allocation2 + $0x38] sm:$0xff]   ;;  %2589 = vmatprep.subr.bf16.mxu0 %v2784_v0  ;;  %v2787_v3 = vld [vmem:[#allocation2 + $0x30] sm:$0xff]   ;;  %v2788_v4 = vld [vmem:[#allocation2 + $0x68] sm:$0xff]   ;;  %2771 = vset.pattern.permute.xlu1 %v3144_v56 }
  0x29   :  { %2590 = vmatpush3.bf16.msra.mxu0 %v2785_v1  ;;  %v2789_v5 = vld [vmem:[#allocation2 + $0x28] sm:$0xff]   ;;  %v2790_v6 = vld [vmem:[#allocation2 + $0x60] sm:$0xff]   ;;  %v2792_v8 = vld [vmem:[#allocation2 + $0x58] sm:$0xff]   ;;  %2770 = vset.pattern.permute.xlu0 %v3144_v56 }
  0x2a   :  { %2591 = vmatprep.subr.bf16.mxu0 %v2786_v2  ;;  %v2791_v7 = vld [vmem:[#allocation2 + $0x20] sm:$0xff]   ;;  %v2793_v9 = vld [vmem:[#allocation2 + $0x18] sm:$0xff]   ;;  %v2794_v10 = vld [vmem:[#allocation2 + $0x50] sm:$0xff]  }
  0x2b   :  { %v2802_v11 = vld [vmem:[%s4338_s0 + $0x4] ss:$8 sps:$4 sm:$0xff]   ;;  %v2795_v12 = vld [vmem:[#allocation2 + $0x10] sm:$0xff]   ;;  %v3241_v20 = vld [vmem:[%s4345_s7 + $0x18] sm:$0xff] }
  0x2c   :  { %338 = vmatprep.mubr.bf16.mxu0 %v2802_v11  ;;  %v2796_v13 = vld [vmem:[#allocation2 + $0x48] sm:$0xff]   ;;  %v2798_v15 = vld [vmem:[#allocation2 + $0x40] sm:$0xff]   ;;  %v3229_v18 = vld [vmem:[%s4345_s7 + $0x10] sm:$0xff] }
  0x2d   :  { %2592 = vmatpush3.bf16.msra.mxu0 %v2787_v3  ;;  %v2797_v14 = vld [vmem:[#allocation2 + $0x8] sm:$0xff]   ;;  %v3222_v16 = vld [vmem:[%s4345_s7] sm:$0xff]  ;;  %1293 = vrot.lane.b32.xlu1 %v3229_v18, %s3143_s29  ;;  %v2803_v22 = vld [vmem:[%s4338_s0 + $0x14] ss:$8 sps:$4 sm:$0xff]  }
  0x2e   :  { %2593 = vmatprep.subr.bf16.mxu0 %v2788_v4  ;;  %v2799_v17 = vld [vmem:[#allocation2] sm:$0xff]   ;;  %1289 = vrot.lane.b32.xlu0 %v3222_v16, %s3143_s29  ;;  %v3234_v19 = vld [vmem:[%s4345_s7 + $0x8] sm:$0xff]  ;;  %v2824_v25 = vld [vmem:[#allocation5 + $0x38] sm:$0xff]  }
  0x2f   :  { %v2800_v21 = vld [vmem:[%s4338_s0] ss:$8 sps:$4 sm:$0xff]   ;;  %v2825_v26 = vld [vmem:[#allocation5 + $0x30] sm:$0xff]   ;;  %2685 = vmatprep.subr.bf16.mxu1 %v2824_v25  ;;  %v3273_v28 = vld [vmem:[%s4345_s7 + $0x38] sm:$0xff] }
  0x30   :  { %v3254_v23 = vld [vmem:[%s4345_s7 + $0x20] sm:$0xff]  ;;  %v3259_v24 = vld [vmem:[%s4345_s7 + $0x28] sm:$0xff]  ;;  %v3266_v27 = vld [vmem:[%s4345_s7 + $0x30] sm:$0xff]  ;;  %2686 = vmatpush3.bf16.msra.mxu1 %v2824_v25 }
  0x31   :  { %2594 = vmatpush3.bf16.msra.mxu0 %v2789_v5  ;;  %1295 = vrot.lane.b32.xlu1 %v3241_v20, %s3143_s29  ;;  %v2826_v29 = vld [vmem:[#allocation5 + $0x28] sm:$0xff]   ;;  %v2805_v30 = vld [vmem:[%s4338_s0 + $0x10] ss:$8 sps:$4 sm:$0xff]   ;;  %v3286_v32 = vld [vmem:[%s4345_s7 + $0x40] sm:$0xff] }
  0x32   :  { %2595 = vmatprep.subr.bf16.mxu0 %v2790_v6  ;;  %1291 = vrot.lane.b32.xlu0 %v3234_v19, %s3143_s29  ;;  %v2806_v31 = vld [vmem:[%s4338_s0 + $0x24] ss:$8 sps:$4 sm:$0xff]   ;;  %v3300_v34 = vld [vmem:[%s4345_s7 + $0x50] sm:$0xff]  ;;  %v3307_v35 = vld [vmem:[%s4345_s7 + $0x58] sm:$0xff] }
  0x33   :  { %2687 = vmatprep.subr.bf16.mxu1 %v2825_v26  ;;  %v3293_v33 = vld [vmem:[%s4345_s7 + $0x48] sm:$0xff]  ;;  %v2809_v37 = vld [vmem:[%s4338_s0 + $0x34] ss:$8 sps:$4 sm:$0xff]   ;;  %v3320_v38 = vld [vmem:[%s4345_s7 + $0x60] sm:$0xff] }
  0x34   :  { %2688 = vmatpush3.bf16.msra.mxu1 %v2825_v26  ;;  %v2808_v36 = vld [vmem:[%s4338_s0 + $0x20] ss:$8 sps:$4 sm:$0xff]   ;;  %v3334_v40 = vld [vmem:[%s4345_s7 + $0x70] sm:$0xff]  ;;  %v3341_v41 = vld [vmem:[%s4345_s7 + $0x78] sm:$0xff] }
  0x35   :  { %2596 = vmatpush3.bf16.msra.mxu0 %v2791_v7  ;;  %1299 = vrot.lane.b32.xlu1 %v3259_v24, %s3143_s29  ;;  %v3327_v39 = vld [vmem:[%s4345_s7 + $0x68] sm:$0xff]  ;;  %v2811_v42 = vld [vmem:[%s4338_s0 + $0x30] ss:$8 sps:$4 sm:$0xff]   ;;  %v2815_v45 = vld [vmem:[%s4338_s0 + $0x54] ss:$8 sps:$4 sm:$0xff]  }
  0x36   :  { %2597 = vmatprep.subr.bf16.mxu0 %v2792_v8  ;;  %1297 = vrot.lane.b32.xlu0 %v3254_v23, %s3143_s29  ;;  %v2812_v43 = vld [vmem:[%s4338_s0 + $0x44] ss:$8 sps:$4 sm:$0xff]   ;;  %v2814_v44 = vld [vmem:[%s4338_s0 + $0x40] ss:$8 sps:$4 sm:$0xff]   ;;  %v2817_v46 = vld [vmem:[%s4338_s0 + $0x50] ss:$8 sps:$4 sm:$0xff]  }
  0x37   :  { %2689 = vmatprep.subr.bf16.mxu1 %v2826_v29  ;;  %v2818_v47 = vld [vmem:[%s4338_s0 + $0x64] ss:$8 sps:$4 sm:$0xff]   ;;  %v2820_v48 = vld [vmem:[%s4338_s0 + $0x60] ss:$8 sps:$4 sm:$0xff]   ;;  %v2821_v49 = vld [vmem:[%s4338_s0 + $0x74] ss:$8 sps:$4 sm:$0xff]  }
  0x38   :  { %2690 = vmatpush3.bf16.msra.mxu1 %v2826_v29  ;;  %v2823_v50 = vld [vmem:[%s4338_s0 + $0x70] ss:$8 sps:$4 sm:$0xff]   ;;  %v2827_v51 = vld [vmem:[#allocation5 + $0x20] sm:$0xff]   ;;  %v2830_v54 = vld [vmem:[#allocation5 + $0x8] sm:$0xff]   ;;  %s3146_s0 = smov 126  }
  0x39   :  { %2598 = vmatpush3.bf16.msra.mxu0 %v2793_v9  ;;  %1303 = vrot.lane.b32.xlu1 %v3273_v28, %s3143_s29  ;;  %v2828_v52 = vld [vmem:[#allocation5 + $0x18] sm:$0xff]   ;;  %v2829_v53 = vld [vmem:[#allocation5 + $0x10] sm:$0xff]   ;;  %v2831_v55 = vld [vmem:[#allocation5] sm:$0xff]  }
  0x3a   :  { %2599 = vmatprep.subr.bf16.mxu0 %v2794_v10  ;;  %1301 = vrot.lane.b32.xlu0 %v3266_v27, %s3143_s29  ;;  %v2855_v56 = vld [vmem:[#allocation7 + $0xac] ss:$20 sps:$4 sm:$0xff]  }
  0x3b   :  { %2691 = vmatprep.subr.bf16.mxu1 %v2827_v51 }
  0x3c   :  { %2692 = vmatpush3.bf16.msra.mxu1 %v2827_v51  ;;  %v2849_v51 = vld [vmem:[#allocation7 + $0xd4] ss:$20 sps:$4 sm:$0xff]  }
  0x3d   :  { %2600 = vmatpush3.bf16.msra.mxu0 %v2795_v12  ;;  %1307 = vrot.lane.b32.xlu1 %v3293_v33, %s3143_s29 }
  0x3e   :  { %2601 = vmatprep.subr.bf16.mxu0 %v2796_v13  ;;  %1305 = vrot.lane.b32.xlu0 %v3286_v32, %s3143_s29 }
  0x3f   :  { %2693 = vmatprep.subr.bf16.mxu1 %v2828_v52 }
  0x40   :  { %2694 = vmatpush3.bf16.msra.mxu1 %v2828_v52 }
  0x41   :  { %2602 = vmatpush3.bf16.msra.mxu0 %v2797_v14  ;;  %1311 = vrot.lane.b32.xlu1 %v3307_v35, %s3143_s29 }
  0x42   :  { %2603 = vmatprep.subr.bf16.mxu0 %v2798_v15  ;;  %1309 = vrot.lane.b32.xlu0 %v3300_v34, %s3143_s29 }
  0x43   :  { %2695 = vmatprep.subr.bf16.mxu1 %v2829_v53 }
  0x44   :  { %2696 = vmatpush3.bf16.msra.mxu1 %v2829_v53  ;;  %v3147_v53 = vmov 0  }
  0x45   :  { %2604 = vmatpush3.bf16.msra.mxu0 %v2799_v17  ;;  %1315 = vrot.lane.b32.xlu1 %v3327_v39, %s3143_s29 }
  0x46   :  { %1313 = vrot.lane.b32.xlu0 %v3320_v38, %s3143_s29  ;;  %2697 = vmatprep.subr.bf16.mxu1 %v2830_v54 }
  0x48   :  { %339 = vmatmul.mubr.bf16.vlgmr.msra.gmra.mxu0 %v2800_v21  ;;  %2698 = vmatpush3.bf16.msra.mxu1 %v2830_v54 }
  0x49   :  { %346 = vmatprep.mubr.bf16.mxu0 %v2803_v22  ;;  %1319 = vrot.lane.b32.xlu1 %v3341_v41, %s3143_s29 }
  0x4a   :  { %1317 = vrot.lane.b32.xlu0 %v3334_v40, %s3143_s29  ;;  %2699 = vmatprep.subr.bf16.mxu1 %v2831_v55 }
  0x4c   :  { %2700 = vmatpush3.bf16.msra.mxu1 %v2831_v55  ;;  %v2853_v55 = vld [vmem:[#allocation7 + $0xa8] ss:$20 sps:$4 sm:$0xff]  }
  0x50   :  { %347 = vmatmul.mubr.bf16.gmra.mxu0 %v2805_v30 }
  0x51   :  { %354 = vmatprep.mubr.bf16.mxu0 %v2806_v31 }
  0x58   :  { %355 = vmatmul.mubr.bf16.gmra.mxu0 %v2808_v36 }
  0x59   :  { %362 = vmatprep.mubr.bf16.mxu0 %v2809_v37  ;;  %v3145_v37 = vmov 3  }
  0x60   :  { %363 = vmatmul.mubr.bf16.gmra.mxu0 %v2811_v42  ;;  %v2834_v42 = vld [vmem:[#allocation7 + $0x11c] ss:$20 sps:$4 sm:$0xff]  }
  0x61   :  { %370 = vmatprep.mubr.bf16.mxu0 %v2812_v43  ;;  %902 = vmatprep.subr.bf16.mxu1 %v2834_v42  ;;  %v2835_v43 = vld [vmem:[#allocation7 + $0x120] ss:$20 sps:$4 sm:$0xff]  }
  0x68   :  { %371 = vmatmul.mubr.bf16.gmra.mxu0 %v2814_v44  ;;  %v2837_v44 = vld [vmem:[#allocation7 + $0x124] ss:$20 sps:$4 sm:$0xff]  }
  0x69   :  { %378 = vmatprep.mubr.bf16.mxu0 %v2815_v45  ;;  %1015 = vmatprep.subr.bf16.mxu0 %v2837_v44  ;;  %v3148_v44 = vmov 5  }
  0x6a   :  { %1016 = vmatpush1.bf16.msra.mxu0 %v2835_v43 }
  0x70   :  { %379 = vmatmul.mubr.bf16.gmra.mxu0 %v2817_v46  ;;  %v2841_v46 = vld [vmem:[#allocation7 + $0xf8] ss:$20 sps:$4 sm:$0xff]  }
  0x71   :  { %386 = vmatprep.mubr.bf16.mxu0 %v2818_v47  ;;  %v2843_v47 = vld [vmem:[#allocation7 + $0xfc] ss:$20 sps:$4 sm:$0xff]  }
  0x72   :  { %1017 = vmatprep.subr.bf16.mxu0 %v2843_v47 }
  0x73   :  { %1018 = vmatpush1.bf16.msra.mxu0 %v2841_v46 }
  0x74   :  { %1019 = vmatprep.subr.bf16.mxu0 %v2849_v51  ;;  %v2840_v51 = vld [vmem:[#allocation7 + $0xf4] ss:$20 sps:$4 sm:$0xff]  }
  0x78   :  { %387 = vmatmul.mubr.bf16.gmra.mxu0 %v2820_v48 }
  0x79   :  { %394 = vmatprep.mubr.bf16.mxu0 %v2821_v49 }
  0x80   :  { %395 = vmatmul.mubr.bf16.gmra.mxu0 %v2823_v50  ;;  %v2847_v50 = vld [vmem:[#allocation7 + $0xd0] ss:$20 sps:$4 sm:$0xff]  }
  0x81   :  { %1047 = vmatprep.mubr.bf16.mxu0 %v3147_v53  ;;  %1020 = vmatpush1.bf16.msra.mxu0 %v2847_v50 }
  0x82   :  { %1021 = vmatprep.subr.bf16.mxu0 %v2855_v56 }
  0x85   :  { %1022 = vmatpush1.bf16.msra.mxu0 %v2853_v55 }
  0x9f   :  { %v1294_v59 = vpop.permute.xlu1 %1293 }
  0xa0   :  { %v1290_v57 = vpop.permute.xlu0 %1289  ;;  %v3388_v0 = vsub.f32 %v3229_v18, %v1294_v59  ;;  %v2859_v59 = vld [vmem:[#allocation7 + $0x80] ss:$20 sps:$4 sm:$0xff]  }
  0xa1   :  { %v3377_v58 = vsub.f32 %v3222_v16, %v1290_v57 }
  0xa2   :  { %v1355_v48 = vmul.f32 0.5, %v3388_v0 }
  0xa3   :  { %1451 = vperm.xlu0 %2770, %v3377_v58   ;;  %v1296_v62 = vpop.permute.xlu1 %1295  ;;  %v1353_v45 = vmul.f32 0.5, %v3377_v58 }
  0xa4   :  { %v1292_v60 = vpop.permute.xlu0 %1291  ;;  %v3384_v63 = vsub.f32 %v3241_v20, %v1296_v62 }
  0xa5   :  { %v3381_v61 = vsub.f32 %v3234_v19, %v1292_v60  ;;  %v2861_v60 = vld [vmem:[#allocation7 + $0x84] ss:$20 sps:$4 sm:$0xff]  }
  0xa6   :  { %v1356_v54 = vmul.f32 0.5, %v3384_v63  ;;  %1023 = vmatprep.subr.bf16.mxu0 %v2861_v60 }
  0xa7   :  { %1456 = vperm.xlu1 %2771, %v3381_v61   ;;  %1466 = vperm.xlu0 %2770, %v3384_v63   ;;  %v1300_v2 = vpop.permute.xlu1 %1299  ;;  %v1354_v49 = vmul.f32 0.5, %v3381_v61 }
  0xa8   :  { %v1298_v1 = vpop.permute.xlu0 %1297  ;;  %v3392_v3 = vsub.f32 %v3259_v24, %v1300_v2  ;;  %1024 = vmatpush1.bf16.msra.mxu0 %v2859_v59  ;;  %v2846_v59 = vld [vmem:[#allocation7 + $0xcc] ss:$20 sps:$4 sm:$0xff]  }
  0xa9   :  { %v3396_v4 = vsub.f32 %v3254_v23, %v1298_v1 }
  0xab   :  { %1461 = vperm.xlu1 %2771, %v3388_v0   ;;  %1476 = vperm.xlu0 %2770, %v3392_v3   ;;  %v1304_v6 = vpop.permute.xlu1 %1303  ;;  %v1357_v52 = vmul.f32 0.5, %v3396_v4 }
  0xac   :  { %v1302_v5 = vpop.permute.xlu0 %1301  ;;  %v3400_v7 = vsub.f32 %v3273_v28, %v1304_v6 }
  0xad   :  { %v3404_v8 = vsub.f32 %v3266_v27, %v1302_v5 }
  0xae   :  { %v1360_v62 = vmul.f32 0.5, %v3400_v7 }
  0xaf   :  { %1471 = vperm.xlu1 %2771, %v3396_v4   ;;  %1486 = vperm.xlu0 %2770, %v3400_v7   ;;  %v1308_v10 = vpop.permute.xlu1 %1307  ;;  %v1359_v57 = vmul.f32 0.5, %v3404_v8 }
  0xb0   :  { %v1306_v9 = vpop.permute.xlu0 %1305  ;;  %v3408_v11 = vsub.f32 %v3293_v33, %v1308_v10 }
  0xb1   :  { %v3412_v12 = vsub.f32 %v3286_v32, %v1306_v9  ;;  %v3485_v9 = vld [vmem:[%s4340_s2] ss:$0 sm:$0xff] }
  0xb3   :  { %1481 = vperm.xlu1 %2771, %v3404_v8   ;;  %1496 = vperm.xlu0 %2770, %v3408_v11   ;;  %v1312_v14 = vpop.permute.xlu1 %1311 }
  0xb4   :  { %v1310_v13 = vpop.permute.xlu0 %1309  ;;  %v3416_v15 = vsub.f32 %v3307_v35, %v1312_v14 }
  0xb5   :  { %v3420_v17 = vsub.f32 %v3300_v34, %v1310_v13 }
  0xb6   :  { %v1364_v2 = vmul.f32 0.5, %v3416_v15 }
  0xb7   :  { %1491 = vperm.xlu1 %2771, %v3412_v12   ;;  %1506 = vperm.xlu0 %2770, %v3416_v15   ;;  %v1316_v22 = vpop.permute.xlu1 %1315 }
  0xb8   :  { %v1314_v21 = vpop.permute.xlu0 %1313  ;;  %v3424_v25 = vsub.f32 %v3327_v39, %v1316_v22 }
  0xb9   :  { %v3428_v26 = vsub.f32 %v3320_v38, %v1314_v21 }
  0xbb   :  { %1501 = vperm.xlu1 %2771, %v3420_v17   ;;  %1516 = vperm.xlu0 %2770, %v3424_v25   ;;  %v1320_v30 = vpop.permute.xlu1 %1319  ;;  %v1365_v1 = vmul.f32 0.5, %v3428_v26 }
  0xbc   :  { %v1318_v29 = vpop.permute.xlu0 %1317  ;;  %v3432_v31 = vsub.f32 %v3341_v41, %v1320_v30 }
  0xbd   :  { %v3436_v36 = vsub.f32 %v3334_v40, %v1318_v29 }
  0xbf   :  { %1511 = vperm.xlu1 %2771, %v3428_v26   ;;  %1526 = vperm.xlu0 %2770, %v3432_v31  }
  0xc3   :  { %1521 = vperm.xlu1 %2771, %v3436_v36   ;;  %2772 = vset.pattern.permute.xlu0 %v3145_v37 }
  0xc4   :  { %1642 = vperm.xlu0 %2772, %v3377_v58   ;;  %v1358_v58 = vmul.f32 0.5, %v3392_v3 }
  0xc7   :  { %2773 = vset.pattern.permute.xlu1 %v3145_v37 }
  0xc8   :  { %1646 = vperm.xlu1 %2773, %v3381_v61   ;;  %1654 = vperm.xlu0 %2772, %v3384_v63   ;;  %v1361_v61 = vmul.f32 0.5, %v3412_v12  ;;  %v1363_v63 = vmul.f32 0.5, %v3420_v17 }
  0xcc   :  { %1650 = vperm.xlu1 %2773, %v3388_v0   ;;  %1662 = vperm.xlu0 %2772, %v3392_v3   ;;  %v1362_v0 = vmul.f32 0.5, %v3408_v11 }
  0xd0   :  { %1658 = vperm.xlu1 %2773, %v3396_v4   ;;  %1670 = vperm.xlu0 %2772, %v3400_v7   ;;  %v1367_v4 = vmul.f32 0.5, %v3436_v36  ;;  %v1366_v7 = vmul.f32 0.5, %v3424_v25 }
  0xd4   :  { %1666 = vperm.xlu1 %2773, %v3404_v8   ;;  %1678 = vperm.xlu0 %2772, %v3408_v11  }
  0xd8   :  { %1674 = vperm.xlu1 %2773, %v3412_v12   ;;  %1686 = vperm.xlu0 %2772, %v3416_v15  }
  0xdc   :  { %1682 = vperm.xlu1 %2773, %v3420_v17   ;;  %1385 = vrot.lane.b32.xlu0 %v1353_v45, %s3146_s0 }
  0xe0   :  { %1690 = vperm.xlu1 %2773, %v3428_v26   ;;  %1389 = vrot.lane.b32.xlu0 %v1355_v48, %s3146_s0  ;;  %v1368_v26 = vmul.f32 0.5, %v3432_v31 }
  0xe4   :  { %1387 = vrot.lane.b32.xlu1 %v1354_v49, %s3146_s0  ;;  %1393 = vrot.lane.b32.xlu0 %v1357_v52, %s3146_s0  ;;  %v2832_v49 = vld [vmem:[#allocation7 + $0x118] ss:$20 sps:$4 sm:$0xff]  }
  0xe8   :  { %1391 = vrot.lane.b32.xlu1 %v1356_v54, %s3146_s0  ;;  %1397 = vrot.lane.b32.xlu0 %v1359_v57, %s3146_s0  ;;  %v2838_v57 = vld [vmem:[#allocation7 + $0xf0] ss:$20 sps:$4 sm:$0xff]  }
  0xec   :  { %1395 = vrot.lane.b32.xlu1 %v1358_v58, %s3146_s0  ;;  %1401 = vrot.lane.b32.xlu0 %v1361_v61, %s3146_s0 }
  0xf0   :  { %1399 = vrot.lane.b32.xlu1 %v1360_v62, %s3146_s0  ;;  %1405 = vrot.lane.b32.xlu0 %v1363_v63, %s3146_s0 }
  0xf4   :  { %1403 = vrot.lane.b32.xlu1 %v1362_v0, %s3146_s0  ;;  %1409 = vrot.lane.b32.xlu0 %v1365_v1, %s3146_s0  ;;  %v2844_v1 = vld [vmem:[#allocation7 + $0xc8] ss:$20 sps:$4 sm:$0xff]  }
  0xf8   :  { %1407 = vrot.lane.b32.xlu1 %v1364_v2, %s3146_s0  ;;  %1413 = vrot.lane.b32.xlu0 %v1367_v4, %s3146_s0 }
  0xfc   :  { %1411 = vrot.lane.b32.xlu1 %v1366_v7, %s3146_s0  ;;  %1694 = vperm.xlu0 %2772, %v3424_v25  }
 0x100   :  { %1698 = vperm.xlu1 %2773, %v3436_v36   ;;  %1702 = vperm.xlu0 %2772, %v3432_v31  }
 0x104   :  { %1415 = vrot.lane.b32.xlu1 %v1368_v26, %s3146_s0  ;;  %2774 = vset.pattern.permute.xlu0 %v3148_v44 }
 0x105   :  { %2775 = vset.pattern.permute.xlu1 %v3148_v44  ;;  %1946 = vperm.xlu0 %2774, %v3222_v16  }
 0x108   :  { %v2605_v3 = vpop.f32.mrf.mxu0  ;;  %1950 = vperm.xlu1 %2775, %v3234_v19  }
 0x109   :  { %1958 = vperm.xlu0 %2774, %v3241_v20  }
 0x10a   :  { %v2606_v5 = vpop.f32.mrf.mxu0 }
 0x10b   :  { %v2607_v6 = vadd.f32 %v2606_v5, %v2605_v3  ;;  %v2852_v3 = vld [vmem:[#allocation7 + $0xa4] ss:$20 sps:$4 sm:$0xff]  }
 0x10c   :  { %v2608_v8 = vpop.f32.mrf.mxu0  ;;  %1954 = vperm.xlu1 %2775, %v3229_v18  }
 0x10d   :  { %v341_v12 = vadd.f32 %v2607_v6, %v3485_v9  ;;  %1966 = vperm.xlu0 %2774, %v3259_v24  }
 0x10e   :  { %v2609_v10 = vpop.f32.mrf.mxu0 }
 0x10f   :  { %v2610_v11 = vadd.f32 %v2609_v10, %v2608_v8  ;;  %v403_v21 = vmax.f32 %v341_v12, 0.0  ;;  %v2850_v8 = vld [vmem:[#allocation7 + $0xa0] ss:$20 sps:$4 sm:$0xff]  }
 0x110   :  { %v2611_v13 = vpop.f32.mrf.mxu0  ;;  %1962 = vperm.xlu1 %2775, %v3254_v23  }
 0x111   :  { %v344_v14 = vadd.f32 %v2610_v11, %v3485_v9  ;;  %1974 = vperm.xlu0 %2774, %v3273_v28   ;;  %v2858_v11 = vld [vmem:[#allocation7 + $0x7c] ss:$20 sps:$4 sm:$0xff]  }
 0x112   :  { %v2612_v15 = vpop.f32.mrf.mxu0 }
 0x113   :  { %v2613_v17 = vadd.f32 %v2612_v15, %v2611_v13  ;;  %v404_v22 = vmax.f32 %v344_v14, 0.0 }
 0x114   :  { %v2614_v29 = vpop.f32.mrf.mxu0  ;;  %1970 = vperm.xlu1 %2775, %v3266_v27  }
 0x115   :  { %v419_v30 = vpack.c.bf16 %v404_v22, %v403_v21  ;;  %v349_v42 = vadd.f32 %v2613_v17, %v3485_v9  ;;  %1978 = vperm.xlu0 %2774, %v3286_v32   ;;  %v2856_v21 = vld [vmem:[#allocation7 + $0x78] ss:$20 sps:$4 sm:$0xff]  }
 0x116   :  { %v2615_v37 = vpop.f32.mrf.mxu0 }
 0x117   :  { %v2616_v43 = vadd.f32 %v2615_v37, %v2614_v29  ;;  %2701 = vmatprep.mubr.bf16.mxu1 %v419_v30  ;;  %v405_v31 = vmax.f32 %v349_v42, 0.0 }
 0x118   :  { %v2617_v25 = vpop.f32.mrf.mxu0  ;;  %1982 = vperm.xlu1 %2775, %v3293_v33  }
 0x119   :  { %v352_v36 = vadd.f32 %v2616_v43, %v3485_v9  ;;  %1990 = vperm.xlu0 %2774, %v3307_v35  }
 0x11a   :  { %v2618_v45 = vpop.f32.mrf.mxu0 }
 0x11b   :  { %v406_v46 = vmax.f32 %v352_v36, 0.0  ;;  %v2619_v47 = vadd.f32 %v2618_v45, %v2617_v25 }
 0x11c   :  { %v2620_v48 = vpop.f32.mrf.mxu0  ;;  %1986 = vperm.xlu1 %2775, %v3300_v34  }
 0x11d   :  { %v420_v50 = vpack.c.bf16 %v406_v46, %v405_v31  ;;  %v357_v54 = vadd.f32 %v2619_v47, %v3485_v9  ;;  %2777 = vset.pattern.permute.xlu0 %v3147_v53 }
 0x11e   :  { %v2621_v52 = vpop.f32.mrf.mxu0  ;;  %v3518_v43 = vpop.permute.xlu0 %1451 }
 0x11f   :  { %v2622_v55 = vadd.f32 %v2621_v52, %v2620_v48  ;;  %2702 = vmatmul.mubr.bf16.vlgmr.msra.gmra.mxu1 %v420_v50  ;;  %v407_v61 = vmax.f32 %v357_v54, 0.0 }
 0x120   :  { %v2623_v56 = vpop.f32.mrf.mxu0  ;;  %903 = vmatpush1.bf16.msra.mxu1 %v2832_v49  ;;  %1994 = vperm.xlu1 %2775, %v3320_v38  }
 0x121   :  { %v360_v58 = vadd.f32 %v2622_v55, %v3485_v9  ;;  %904 = vmatprep.subr.bf16.mxu1 %v2840_v51 }
 0x122   :  { %v2624_v60 = vpop.f32.mrf.mxu0  ;;  %v3522_v48 = vpop.permute.xlu1 %1456 }
 0x123   :  { %v408_v62 = vmax.f32 %v360_v58, 0.0  ;;  %v2625_v63 = vadd.f32 %v2624_v60, %v2623_v56  ;;  %v3524_v50 = vpop.permute.xlu0 %1466 }
 0x124   :  { %v2626_v0 = vpop.f32.mrf.mxu0  ;;  %905 = vmatpush1.bf16.msra.mxu1 %v2838_v57  ;;  %2776 = vset.pattern.permute.xlu1 %v3147_v53 }
 0x125   :  { %v421_v2 = vpack.c.bf16 %v408_v62, %v407_v61  ;;  %906 = vmatprep.subr.bf16.mxu1 %v2846_v59  ;;  %v365_v5 = vadd.f32 %v2625_v63, %v3485_v9 }
 0x126   :  { %v2627_v4 = vpop.f32.mrf.mxu0  ;;  %v3529_v56 = vpop.permute.xlu1 %1461 }
 0x127   :  { %v2628_v6 = vadd.f32 %v2627_v4, %v2626_v0  ;;  %2705 = vmatprep.mubr.bf16.mxu1 %v421_v2  ;;  %v409_v13 = vmax.f32 %v365_v5, 0.0  ;;  %v3531_v58 = vpop.permute.xlu0 %1476 }
 0x128   :  { %v2629_v7 = vpop.f32.mrf.mxu0  ;;  %907 = vmatpush1.bf16.msra.mxu1 %v2844_v1 }
 0x129   :  { %v368_v10 = vadd.f32 %v2628_v6, %v3485_v9  ;;  %908 = vmatprep.subr.bf16.mxu1 %v2852_v3 }
 0x12a   :  { %v2630_v12 = vpop.f32.mrf.mxu0  ;;  %v3533_v0 = vpop.permute.xlu1 %1471 }
 0x12b   :  { %v410_v14 = vmax.f32 %v368_v10, 0.0  ;;  %v2631_v15 = vadd.f32 %v2630_v12, %v2629_v7  ;;  %v3535_v2 = vpop.permute.xlu0 %1486 }
 0x12c   :  { %v2632_v17 = vpop.f32.mrf.mxu0  ;;  %909 = vmatpush1.bf16.msra.mxu1 %v2850_v8 }
 0x12d   :  { %v422_v22 = vpack.c.bf16 %v410_v14, %v409_v13  ;;  %910 = vmatprep.subr.bf16.mxu1 %v2858_v11  ;;  %v373_v29 = vadd.f32 %v2631_v15, %v3485_v9 }
 0x12e   :  { %v2633_v26 = vpop.f32.mrf.mxu0  ;;  %v3539_v7 = vpop.permute.xlu1 %1481 }
 0x12f   :  { %v2634_v30 = vadd.f32 %v2633_v26, %v2632_v17  ;;  %2706 = vmatmul.mubr.bf16.gmra.mxu1 %v422_v22  ;;  %v411_v36 = vmax.f32 %v373_v29, 0.0  ;;  %v3541_v10 = vpop.permute.xlu0 %1496 }
 0x130   :  { %v2635_v37 = vpop.f32.mrf.mxu0  ;;  %911 = vmatpush1.bf16.msra.mxu1 %v2856_v21  ;;  %4388 = vst [vmem:[#allocation15_spill] sm:$0xff] %v3541_v10 }
 0x131   :  { %v376_v42 = vadd.f32 %v2634_v30, %v3485_v9 }
 0x132   :  { %v2636_v25 = vpop.f32.mrf.mxu0  ;;  %v3543_v17 = vpop.permute.xlu1 %1491 }
 0x133   :  { %v412_v45 = vmax.f32 %v376_v42, 0.0  ;;  %v2637_v31 = vadd.f32 %v2636_v25, %v2635_v37  ;;  %v3545_v22 = vpop.permute.xlu0 %1506 }
 0x134   :  { %v2638_v46 = vpop.f32.mrf.mxu0  ;;  %4389 = vst [vmem:[#allocation16_spill] sm:$0xff] %v3545_v22 }
 0x135   :  { %v423_v47 = vpack.c.bf16 %v412_v45, %v411_v36  ;;  %v381_v51 = vadd.f32 %v2637_v31, %v3485_v9 }
 0x136   :  { %v2639_v49 = vpop.f32.mrf.mxu0  ;;  %v3549_v37 = vpop.permute.xlu1 %1501 }
 0x137   :  { %v2640_v52 = vadd.f32 %v2639_v49, %v2638_v46  ;;  %2709 = vmatprep.mubr.bf16.mxu1 %v423_v47  ;;  %v413_v59 = vmax.f32 %v381_v51, 0.0  ;;  %4390 = vst [vmem:[#allocation17_spill] sm:$0xff] %v3549_v37  ;;  %v3551_v42 = vpop.permute.xlu0 %1516 }
 0x138   :  { %v2641_v54 = vpop.f32.mrf.mxu0  ;;  %4391 = vst [vmem:[#allocation18_spill] sm:$0xff] %v3551_v42 }
 0x139   :  { %v384_v55 = vadd.f32 %v2640_v52, %v3485_v9 }
 0x13a   :  { %v2642_v57 = vpop.f32.mrf.mxu0  ;;  %v3553_v31 = vpop.permute.xlu1 %1511 }
 0x13b   :  { %v414_v60 = vmax.f32 %v384_v55, 0.0  ;;  %v2643_v61 = vadd.f32 %v2642_v57, %v2641_v54  ;;  %4392 = vst [vmem:[#allocation19_spill] sm:$0xff] %v3553_v31  ;;  %v3555_v46 = vpop.permute.xlu0 %1526  ;;  %v2864_v57 = vld [vmem:[#allocation7 + $0x54] ss:$20 sps:$4 sm:$0xff]  }
 0x13c   :  { %v2644_v62 = vpop.f32.mrf.mxu0  ;;  %4393 = vst [vmem:[#allocation20_spill] sm:$0xff] %v3555_v46  ;;  %912 = vmatprep.subr.bf16.mxu1 %v2864_v57 }
 0x13d   :  { %v424_v63 = vpack.c.bf16 %v414_v60, %v413_v59  ;;  %v389_v3 = vadd.f32 %v2643_v61, %v3485_v9  ;;  %v2867_v59 = vld [vmem:[#allocation7 + $0x5c] ss:$20 sps:$4 sm:$0xff]  }
 0x13e   :  { %v2645_v1 = vpop.f32.mrf.mxu0  ;;  %v3558_v47 = vpop.permute.xlu1 %1521  ;;  %v2862_v61 = vld [vmem:[#allocation7 + $0x50] ss:$20 sps:$4 sm:$0xff]   ;;  %1025 = vmatprep.subr.bf16.mxu0 %v2867_v59 }
 0x13f   :  { %v2646_v4 = vadd.f32 %v2645_v1, %v2644_v62  ;;  %2710 = vmatmul.mubr.bf16.gmra.mxu1 %v424_v63  ;;  %v415_v11 = vmax.f32 %v389_v3, 0.0  ;;  %4394 = vst [vmem:[#allocation21_spill] sm:$0xff] %v3558_v47  ;;  %v3560_v49 = vpop.permute.xlu0 %1642  ;;  %v2865_v62 = vld [vmem:[#allocation7 + $0x58] ss:$20 sps:$4 sm:$0xff]   ;;  %v2873_v3 = vld [vmem:[#allocation7 + $0x34] ss:$20 sps:$4 sm:$0xff]  }
 0x140   :  { %v2647_v5 = vpop.f32.mrf.mxu0  ;;  %4395 = vst [vmem:[#allocation22_spill] sm:$0xff] %v3560_v49  ;;  %913 = vmatpush1.bf16.msra.mxu1 %v2862_v61  ;;  %1026 = vmatpush1.bf16.msra.mxu0 %v2865_v62  ;;  %v2870_v1 = vld [vmem:[#allocation7 + $0x2c] ss:$20 sps:$4 sm:$0xff]  }
 0x141   :  { %v392_v6 = vadd.f32 %v2646_v4, %v3485_v9  ;;  %914 = vmatprep.subr.bf16.mxu1 %v2870_v1  ;;  %1027 = vmatprep.subr.bf16.mxu0 %v2873_v3 }
 0x142   :  { %v2648_v8 = vpop.f32.mrf.mxu0 }
 0x143   :  { %v416_v12 = vmax.f32 %v392_v6, 0.0  ;;  %v2649_v13 = vadd.f32 %v2648_v8, %v2647_v5  ;;  %v3562_v51 = vpop.permute.xlu1 %1646  ;;  %v2868_v5 = vld [vmem:[#allocation7 + $0x28] ss:$20 sps:$4 sm:$0xff]   ;;  %v2871_v6 = vld [vmem:[#allocation7 + $0x30] ss:$20 sps:$4 sm:$0xff]  }
 0x144   :  { %v2650_v14 = vpop.f32.mrf.mxu0  ;;  %4396 = vst [vmem:[#allocation23_spill] sm:$0xff] %v3562_v51  ;;  %915 = vmatpush1.bf16.msra.mxu1 %v2868_v5  ;;  %1028 = vmatpush1.bf16.msra.mxu0 %v2871_v6 }
 0x145   :  { %v425_v15 = vpack.c.bf16 %v416_v12, %v415_v11  ;;  %v397_v26 = vadd.f32 %v2649_v13, %v3485_v9  ;;  %v2876_v11 = vld [vmem:[#allocation7 + $0x4] ss:$20 sps:$4 sm:$0xff]   ;;  %v2879_v12 = vld [vmem:[#allocation7 + $0xc] ss:$20 sps:$4 sm:$0xff]  }
 0x146   :  { %v2651_v21 = vpop.f32.mrf.mxu0  ;;  %916 = vmatprep.subr.bf16.mxu1 %v2876_v11  ;;  %1029 = vmatprep.subr.bf16.mxu0 %v2879_v12 }
 0x147   :  { %v2652_v29 = vadd.f32 %v2651_v21, %v2650_v14  ;;  %2713 = vmatprep.mubr.bf16.mxu1 %v425_v15  ;;  %v417_v25 = vmax.f32 %v397_v26, 0.0  ;;  %v3566_v52 = vpop.permute.xlu1 %1650  ;;  %v2874_v14 = vld [vmem:[#allocation7] ss:$20 sps:$4 sm:$0xff]   ;;  %v2877_v15 = vld [vmem:[#allocation7 + $0x8] ss:$20 sps:$4 sm:$0xff]  }
 0x148   :  { %4397 = vst [vmem:[#allocation24_spill] sm:$0xff] %v3566_v52  ;;  %917 = vmatpush1.bf16.msra.mxu1 %v2874_v14  ;;  %1030 = vmatpush1.bf16.msra.mxu0 %v2877_v15 }
 0x149   :  { %v400_v30 = vadd.f32 %v2652_v29, %v3485_v9  ;;  %v3564_v9 = vpop.permute.xlu0 %1654 }
 0x14b   :  { %v418_v36 = vmax.f32 %v400_v30, 0.0  ;;  %v3570_v55 = vpop.permute.xlu1 %1658 }
 0x14d   :  { %v426_v45 = vpack.c.bf16 %v418_v36, %v417_v25  ;;  %v3568_v54 = vpop.permute.xlu0 %1662 }
 0x14f   :  { %2714 = vmatmul.mubr.bf16.gmra.mxu1 %v426_v45  ;;  %v3574_v63 = vpop.permute.xlu1 %1666 }
 0x150   :  { %934 = vmatprep.mubr.bf16.mxu1 %v3147_v53 }
 0x151   :  { %v3572_v60 = vpop.permute.xlu0 %1670 }
 0x153   :  { %v3578_v8 = vpop.permute.xlu1 %1674 }
 0x155   :  { %v3576_v4 = vpop.permute.xlu0 %1678 }
 0x157   :  { %v3582_v21 = vpop.permute.xlu1 %1682 }
 0x158   :  { %4399 = vst [vmem:[#allocation26_spill] sm:$0xff] %v3582_v21 }
 0x159   :  { %v3580_v13 = vpop.permute.xlu0 %1686 }
 0x15a   :  { %4398 = vst [vmem:[#allocation25_spill] sm:$0xff] %v3580_v13 }
 0x15b   :  { %v3585_v30 = vpop.permute.xlu1 %1690 }
 0x15c   :  { %4400 = vst [vmem:[#allocation27_spill] sm:$0xff] %v3585_v30 }
 0x15d   :  { %v1386_v26 = vpop.permute.xlu0 %1385 }
 0x15e   :  { %v1433_v29 = vadd.f32 %v1386_v26, %v3222_v16 }
 0x15f   :  { %v1388_v45 = vpop.permute.xlu1 %1387 }
 0x160   :  { %1547 = vperm.xlu1 %2776, %v1433_v29   ;;  %v1434_v57 = vadd.f32 %v1388_v45, %v3234_v19 }
 0x161   :  { %v1390_v25 = vpop.permute.xlu0 %1389 }
 0x162   :  { %v1435_v36 = vadd.f32 %v1390_v25, %v3229_v18  ;;  %1552 = vperm.xlu0 %2777, %v1434_v57  }
 0x163   :  { %v1392_v62 = vpop.permute.xlu1 %1391 }
 0x164   :  { %1557 = vperm.xlu1 %2776, %v1435_v36   ;;  %v1436_v1 = vadd.f32 %v1392_v62, %v3241_v20  ;;  %v3600_v62 = vld [vmem:[#allocation7 + $0x128] ss:$20 sps:$4 sm:$0xff]  }
 0x165   :  { %v1394_v59 = vpop.permute.xlu0 %1393  ;;  %2717 = vmatprep.subr.bf16.mxu1 %v3600_v62 }
 0x166   :  { %v1437_v61 = vadd.f32 %v1394_v59, %v3254_v23 }
 0x167   :  { %v1396_v5 = vpop.permute.xlu1 %1395 }
 0x168   :  { %1562 = vperm.xlu1 %2776, %v1436_v1   ;;  %1567 = vperm.xlu0 %2777, %v1437_v61   ;;  %v1438_v6 = vadd.f32 %v1396_v5, %v3259_v24 }
 0x169   :  { %v1398_v3 = vpop.permute.xlu0 %1397 }
 0x16a   :  { %v1439_v16 = vadd.f32 %v1398_v3, %v3266_v27 }
 0x16b   :  { %v1400_v11 = vpop.permute.xlu1 %1399 }
 0x16c   :  { %1572 = vperm.xlu1 %2776, %v1438_v6   ;;  %1577 = vperm.xlu0 %2777, %v1439_v16   ;;  %v1440_v12 = vadd.f32 %v1400_v11, %v3273_v28 }
 0x16d   :  { %v1402_v18 = vpop.permute.xlu0 %1401 }
 0x16e   :  { %v1441_v19 = vadd.f32 %v1402_v18, %v3286_v32 }
 0x16f   :  { %v1404_v14 = vpop.permute.xlu1 %1403 }
 0x170   :  { %1582 = vperm.xlu1 %2776, %v1440_v12   ;;  %1587 = vperm.xlu0 %2777, %v1441_v19   ;;  %v1442_v15 = vadd.f32 %v1404_v14, %v3293_v33 }
 0x171   :  { %v1406_v23 = vpop.permute.xlu0 %1405 }
 0x172   :  { %v1443_v20 = vadd.f32 %v1406_v23, %v3300_v34 }
 0x173   :  { %v1408_v26 = vpop.permute.xlu1 %1407 }
 0x174   :  { %1592 = vperm.xlu1 %2776, %v1442_v15   ;;  %1597 = vperm.xlu0 %2777, %v1443_v20   ;;  %v1444_v25 = vadd.f32 %v1408_v26, %v3307_v35 }
 0x175   :  { %v1410_v27 = vpop.permute.xlu0 %1409 }
 0x176   :  { %v1445_v24 = vadd.f32 %v1410_v27, %v3320_v38  ;;  %v3149_v38 = vmov 1  }
 0x177   :  { %v1412_v59 = vpop.permute.xlu1 %1411 }
 0x178   :  { %1602 = vperm.xlu1 %2776, %v1444_v25   ;;  %1607 = vperm.xlu0 %2777, %v1445_v24   ;;  %v1446_v3 = vadd.f32 %v1412_v59, %v3327_v39 }
 0x179   :  { %v1414_v45 = vpop.permute.xlu0 %1413 }
 0x17a   :  { %v1447_v28 = vadd.f32 %v1414_v45, %v3334_v40 }
 0x17b   :  { %v3604_v5 = vpop.permute.xlu1 %1698 }
 0x17c   :  { %1612 = vperm.xlu1 %2776, %v1446_v3   ;;  %1617 = vperm.xlu0 %2777, %v1447_v28   ;;  %4401 = vst [vmem:[#allocation28_spill] sm:$0xff] %v3604_v5 }
 0x17f   :  { %v1416_v18 = vpop.permute.xlu1 %1415 }
 0x180   :  { %2779 = vset.pattern.permute.xlu0 %v3149_v38  ;;  %v1448_v11 = vadd.f32 %v1416_v18, %v3341_v41 }
 0x181   :  { %1726 = vperm.xlu0 %2779, %v1434_v57   ;;  %v3021_v57 = vld [vmem:[%s4345_s7 + $0x30] sm:$0xff] }
 0x182   :  { %1622 = vperm.xlu1 %2776, %v1448_v11  }
 0x185   :  { %1738 = vperm.xlu0 %2779, %v1437_v61   ;;  %v3022_v61 = vld [vmem:[%s4345_s7 + $0x28] sm:$0xff] }
 0x186   :  { %2778 = vset.pattern.permute.xlu1 %v3149_v38  ;;  %v2883_v38 = vld [vmem:[#allocation7 + $0xb0] ss:$20 sps:$4 sm:$0xff]  }
 0x187   :  { %1722 = vperm.xlu1 %2778, %v1433_v29   ;;  %v3150_v29 = vmov 4  }
 0x189   :  { %1746 = vperm.xlu0 %2779, %v1439_v16  }
 0x18b   :  { %1730 = vperm.xlu1 %2778, %v1435_v36   ;;  %v3016_v36 = vld [vmem:[%s4345_s7] sm:$0xff] }
 0x18d   :  { %1754 = vperm.xlu0 %2779, %v1441_v19   ;;  %v3643_v19 = vld [vmem:[%s4342_s4] ss:$0 sm:$0xff] }
 0x18f   :  { %1734 = vperm.xlu1 %2778, %v1436_v1   ;;  %v3023_v1 = vld [vmem:[%s4345_s7 + $0x38] sm:$0xff] }
 0x191   :  { %1762 = vperm.xlu0 %2779, %v1443_v20  }
 0x193   :  { %1742 = vperm.xlu1 %2778, %v1438_v6  }
 0x195   :  { %1770 = vperm.xlu0 %2779, %v1445_v24  }
 0x197   :  { %1750 = vperm.xlu1 %2778, %v1440_v12  }
 0x199   :  { %1778 = vperm.xlu0 %2779, %v1447_v28  }
 0x19b   :  { %1758 = vperm.xlu1 %2778, %v1442_v15  }
 0x19d   :  { %2780 = vset.pattern.permute.xlu0 %v3148_v44 }
 0x19e   :  { %1998 = vperm.xlu0 %2780, %v3327_v39   ;;  %v3017_v39 = vld [vmem:[%s4345_s7 + $0x8] sm:$0xff] }
 0x19f   :  { %1766 = vperm.xlu1 %2778, %v1444_v25   ;;  %v2882_v25 = vld [vmem:[#allocation7 + $0xd8] ss:$20 sps:$4 sm:$0xff]  }
 0x1a2   :  { %2002 = vperm.xlu0 %2780, %v3334_v40   ;;  %v3018_v40 = vld [vmem:[%s4345_s7 + $0x10] sm:$0xff] }
 0x1a3   :  { %1774 = vperm.xlu1 %2778, %v1446_v3  }
 0x1a6   :  { %2783 = vset.pattern.permute.xlu0 %v3150_v29 }
 0x1a7   :  { %1782 = vperm.xlu1 %2778, %v1448_v11   ;;  %2094 = vperm.xlu0 %2783, %v3017_v39  }
 0x1ab   :  { %2781 = vset.pattern.permute.xlu1 %v3148_v44  ;;  %v3020_v44 = vld [vmem:[%s4345_s7 + $0x18] sm:$0xff] }
 0x1ac   :  { %2006 = vperm.xlu1 %2781, %v3341_v41   ;;  %v3019_v41 = vld [vmem:[%s4345_s7 + $0x20] sm:$0xff] }
 0x1ad   :  { %2106 = vperm.xlu0 %2783, %v3019_v41  }
 0x1b0   :  { %2782 = vset.pattern.permute.xlu1 %v3150_v29  ;;  %v2884_v29 = vld [vmem:[#allocation7 + $0x88] ss:$20 sps:$4 sm:$0xff]  }
 0x1b1   :  { %2090 = vperm.xlu1 %2782, %v3016_v36   ;;  %2114 = vperm.xlu0 %2783, %v3021_v57  }
 0x1b5   :  { %2098 = vperm.xlu1 %2782, %v3018_v40   ;;  %2122 = vperm.xlu0 %2783, %v3286_v32  }
 0x1b9   :  { %2102 = vperm.xlu1 %2782, %v3020_v44   ;;  %2130 = vperm.xlu0 %2783, %v3300_v34   ;;  %v2885_v44 = vld [vmem:[#allocation7 + $0x60] ss:$20 sps:$4 sm:$0xff]  }
 0x1bd   :  { %2110 = vperm.xlu1 %2782, %v3022_v61  }
 0x1c1   :  { %2118 = vperm.xlu1 %2782, %v3023_v1  }
 0x1c5   :  { %2126 = vperm.xlu1 %2782, %v3293_v33  }
 0x1c9   :  { %2134 = vperm.xlu1 %2782, %v3307_v35   ;;  %v2881_v35 = vld [vmem:[#allocation7 + $0x100] ss:$20 sps:$4 sm:$0xff]  }
 0x1df   :  { %v2703_v16 = vpop.f32.mrf.mxu1 }
 0x1e0   :  { %v541_v27 = vadd.f32 %v2703_v16, %v3643_v19  ;;  %v2886_v16 = vld [vmem:[#allocation7 + $0x38] ss:$20 sps:$4 sm:$0xff]  }
 0x1e1   :  { %v532_v6 = vpop.f32.mrf.mxu1 }
 0x1e2   :  { %v533_v32 = vadd.f32 %v3643_v19, %v532_v6  ;;  %v597_v45 = vmax.f32 %v541_v27, 0.0 }
 0x1e3   :  { %v2704_v12 = vpop.f32.mrf.mxu1 }
 0x1e4   :  { %v595_v14 = vmax.f32 %v533_v32, 0.0  ;;  %v544_v34 = vadd.f32 %v2704_v12, %v3643_v19 }
 0x1e5   :  { %v535_v23 = vpop.f32.mrf.mxu1 }
 0x1e6   :  { %v536_v20 = vadd.f32 %v3643_v19, %v535_v23  ;;  %v598_v24 = vmax.f32 %v544_v34, 0.0 }
 0x1e8   :  { %v596_v15 = vmax.f32 %v536_v20, 0.0  ;;  %v3656_v59 = vpack.c.bf16 %v598_v24, %v597_v45  ;;  %v2887_v20 = vld [vmem:[#allocation7 + $0x10] ss:$20 sps:$4 sm:$0xff]  }
 0x1ea   :  { %v3648_v33 = vpack.c.bf16 %v596_v15, %v595_v14 }
 0x1ec   :  { %935 = vmatmul.mubr.bf16.vlgmr.msra.gmra.mxu1 %v3648_v33  ;;  %1048 = vmatmul.mubr.bf16.vlgmr.msra.gmra.mxu0 %v3648_v33 }
 0x1ed   :  { %944 = vmatprep.mubr.bf16.mxu1 %v3147_v53  ;;  %1057 = vmatprep.mubr.bf16.mxu0 %v3147_v53 }
 0x1ee   :  { %2718 = vmatpush3.bf16.msra.mxu1 %v3600_v62 }
 0x1ef   :  { %v2707_v26 = vpop.f32.mrf.mxu1  ;;  %2719 = vmatprep.subr.bf16.mxu1 %v2881_v35 }
 0x1f0   :  { %v557_v57 = vadd.f32 %v2707_v26, %v3643_v19 }
 0x1f1   :  { %v548_v28 = vpop.f32.mrf.mxu1 }
 0x1f2   :  { %2720 = vmatpush3.bf16.msra.mxu1 %v2881_v35  ;;  %v549_v18 = vadd.f32 %v3643_v19, %v548_v28  ;;  %v601_v6 = vmax.f32 %v557_v57, 0.0 }
 0x1f3   :  { %v2708_v3 = vpop.f32.mrf.mxu1  ;;  %2721 = vmatprep.subr.bf16.mxu1 %v2882_v25 }
 0x1f4   :  { %945 = vmatmul.mubr.bf16.gmra.mxu1 %v3656_v59  ;;  %1058 = vmatmul.mubr.bf16.gmra.mxu0 %v3656_v59  ;;  %v599_v36 = vmax.f32 %v549_v18, 0.0  ;;  %v560_v40 = vadd.f32 %v2708_v3, %v3643_v19 }
 0x1f5   :  { %v551_v11 = vpop.f32.mrf.mxu1  ;;  %954 = vmatprep.mubr.bf16.mxu1 %v3147_v53  ;;  %1067 = vmatprep.mubr.bf16.mxu0 %v3147_v53 }
 0x1f6   :  { %v552_v62 = vadd.f32 %v3643_v19, %v551_v11  ;;  %2722 = vmatpush3.bf16.msra.mxu1 %v2882_v25  ;;  %v602_v61 = vmax.f32 %v560_v40, 0.0 }
 0x1f7   :  { %2723 = vmatprep.subr.bf16.mxu1 %v2883_v38 }
 0x1f8   :  { %v600_v39 = vmax.f32 %v552_v62, 0.0  ;;  %v614_v32 = vpack.c.bf16 %v602_v61, %v601_v6 }
 0x1fa   :  { %v3665_v41 = vpack.c.bf16 %v600_v39, %v599_v36  ;;  %2724 = vmatpush3.bf16.msra.mxu1 %v2883_v38 }
 0x1fb   :  { %2725 = vmatprep.subr.bf16.mxu1 %v2884_v29 }
 0x1fc   :  { %955 = vmatmul.mubr.bf16.gmra.mxu1 %v3665_v41  ;;  %1068 = vmatmul.mubr.bf16.gmra.mxu0 %v3665_v41 }
 0x1fd   :  { %964 = vmatprep.mubr.bf16.mxu1 %v3147_v53  ;;  %1077 = vmatprep.mubr.bf16.mxu0 %v3147_v53 }
 0x1fe   :  { %2726 = vmatpush3.bf16.msra.mxu1 %v2884_v29 }
 0x1ff   :  { %v2711_v1 = vpop.f32.mrf.mxu1  ;;  %2727 = vmatprep.subr.bf16.mxu1 %v2885_v44 }
 0x200   :  { %v573_v25 = vadd.f32 %v2711_v1, %v3643_v19 }
 0x201   :  { %v564_v12 = vpop.f32.mrf.mxu1 }
 0x202   :  { %2728 = vmatpush3.bf16.msra.mxu1 %v2885_v44  ;;  %v565_v14 = vadd.f32 %v3643_v19, %v564_v12  ;;  %v605_v3 = vmax.f32 %v573_v25, 0.0 }
 0x203   :  { %v2712_v23 = vpop.f32.mrf.mxu1  ;;  %2729 = vmatprep.subr.bf16.mxu1 %v2886_v16 }
 0x204   :  { %965 = vmatmul.mubr.bf16.gmra.mxu1 %v614_v32  ;;  %1078 = vmatmul.mubr.bf16.gmra.mxu0 %v614_v32  ;;  %v603_v35 = vmax.f32 %v565_v14, 0.0  ;;  %v576_v24 = vadd.f32 %v2712_v23, %v3643_v19  ;;  %v3697_v23 = vpop.permute.xlu0 %1694 }
 0x205   :  { %v567_v15 = vpop.f32.mrf.mxu1  ;;  %974 = vmatprep.mubr.bf16.mxu1 %v3147_v53  ;;  %1087 = vmatprep.mubr.bf16.mxu0 %v3147_v53  ;;  %4402 = vst [vmem:[#allocation29_spill] sm:$0xff] %v3697_v23 }
 0x206   :  { %v568_v34 = vadd.f32 %v3643_v19, %v567_v15  ;;  %2730 = vmatpush3.bf16.msra.mxu1 %v2886_v16  ;;  %v606_v45 = vmax.f32 %v576_v24, 0.0 }
 0x207   :  { %2731 = vmatprep.subr.bf16.mxu1 %v2887_v20 }
 0x208   :  { %v604_v27 = vmax.f32 %v568_v34, 0.0  ;;  %v616_v18 = vpack.c.bf16 %v606_v45, %v605_v3 }
 0x20a   :  { %v615_v26 = vpack.c.bf16 %v604_v27, %v603_v35  ;;  %2732 = vmatpush3.bf16.msra.mxu1 %v2887_v20 }
 0x20c   :  { %975 = vmatmul.mubr.bf16.gmra.mxu1 %v615_v26  ;;  %1088 = vmatmul.mubr.bf16.gmra.mxu0 %v615_v26 }
 0x20d   :  { %984 = vmatprep.mubr.bf16.mxu1 %v3147_v53  ;;  %1097 = vmatprep.mubr.bf16.mxu0 %v3147_v53 }
 0x20f   :  { %v2715_v28 = vpop.f32.mrf.mxu1 }
 0x210   :  { %v589_v61 = vadd.f32 %v2715_v28, %v3643_v19 }
 0x211   :  { %v580_v38 = vpop.f32.mrf.mxu1 }
 0x212   :  { %v581_v62 = vadd.f32 %v3643_v19, %v580_v38  ;;  %v609_v16 = vmax.f32 %v589_v61, 0.0 }
 0x213   :  { %v2716_v11 = vpop.f32.mrf.mxu1 }
 0x214   :  { %985 = vmatmul.mubr.bf16.gmra.mxu1 %v616_v18  ;;  %1098 = vmatmul.mubr.bf16.gmra.mxu0 %v616_v18  ;;  %v607_v39 = vmax.f32 %v581_v62, 0.0  ;;  %v592_v44 = vadd.f32 %v2716_v11, %v3643_v19  ;;  %v669_v11 = vlaneseq }
 0x215   :  { %v583_v29 = vpop.f32.mrf.mxu1  ;;  %994 = vmatprep.mubr.bf16.mxu1 %v3147_v53  ;;  %1107 = vmatprep.mubr.bf16.mxu0 %v3147_v53 }
 0x216   :  { %v584_v36 = vadd.f32 %v3643_v19, %v583_v29  ;;  %v610_v1 = vmax.f32 %v592_v44, 0.0  ;;  %v3691_v19 = vpop.permute.xlu1 %1950  ;;  %v3737_v29 = vshrl.u32 %v669_v11, 7 }
 0x218   :  { %v608_v40 = vmax.f32 %v584_v36, 0.0  ;;  %v618_v6 = vpack.c.bf16 %v610_v1, %v609_v16  ;;  %v679_v47 = vsub.s32 2, %v3737_v29 }
 0x21a   :  { %v617_v57 = vpack.c.bf16 %v608_v40, %v607_v39  ;;  %v3693_v12 = vpop.permute.xlu1 %1954  ;;  %v671_v39 = vsub.s32 0, %v3737_v29  ;;  %v3745_v40 = vld [vmem:[%s4344_s6] sm:$0x1f] }
 0x21c   :  { %995 = vmatmul.mubr.bf16.gmra.mxu1 %v617_v57  ;;  %1108 = vmatmul.mubr.bf16.gmra.mxu0 %v617_v57  ;;  %v3753_v1 = vrot.slane %v3745_v40, %v671_v39 }
 0x21d   :  { %1004 = vmatprep.mubr.bf16.mxu1 %v3147_v53  ;;  %1117 = vmatprep.mubr.bf16.mxu0 %v3147_v53 }
 0x21e   :  { %v3695_v53 = vpop.permute.xlu1 %1962 }
 0x222   :  { %v3699_v20 = vpop.permute.xlu1 %1970 }
 0x223   :  { %4403 = vst [vmem:[#allocation30_spill] sm:$0xff] %v3699_v20 }
 0x224   :  { %1005 = vmatmul.mubr.bf16.gmra.mxu1 %v618_v6  ;;  %1118 = vmatmul.mubr.bf16.gmra.mxu0 %v618_v6 }
 0x225   :  { %2733 = vmatprep.mubr.bf16.mxu1 %v3648_v33  ;;  %v3701_v33 = vpop.permute.xlu0 %1702 }
 0x226   :  { %4404 = vst [vmem:[#allocation31_spill] sm:$0xff] %v3701_v33 }
 0x22c   :  { %2734 = vmatmul.mubr.bf16.vlgmr.msra.gmra.mxu1 %v3656_v59  ;;  %v3703_v59 = vpop.permute.xlu1 %1982 }
 0x22d   :  { %2737 = vmatprep.mubr.bf16.mxu1 %v3665_v41  ;;  %4405 = vst [vmem:[#allocation32_spill] sm:$0xff] %v3703_v59  ;;  %v3705_v41 = vpop.permute.xlu0 %1946 }
 0x231   :  { %v3709_v14 = vpop.permute.xlu0 %1958 }
 0x234   :  { %2738 = vmatmul.mubr.bf16.gmra.mxu1 %v614_v32  ;;  %v3707_v32 = vpop.permute.xlu1 %1986 }
 0x235   :  { %2741 = vmatprep.mubr.bf16.mxu1 %v615_v26  ;;  %4406 = vst [vmem:[#allocation33_spill] sm:$0xff] %v3707_v32  ;;  %v3713_v34 = vpop.permute.xlu0 %1966 }
 0x236   :  { %4408 = vst [vmem:[#allocation35_spill] sm:$0xff] %v3713_v34 }
 0x238   :  { %v3711_v15 = vpop.permute.xlu1 %1994 }
 0x239   :  { %4407 = vst [vmem:[#allocation34_spill] sm:$0xff] %v3711_v15  ;;  %v3717_v27 = vpop.permute.xlu0 %1974 }
 0x23a   :  { %4409 = vst [vmem:[#allocation36_spill] sm:$0xff] %v3717_v27  ;;  %v3782_v27 = vrot.slane %v3745_v40, %v679_v47 }
 0x23c   :  { %2742 = vmatmul.mubr.bf16.gmra.mxu1 %v616_v18  ;;  %v3715_v35 = vpop.permute.xlu1 %1547 }
 0x23d   :  { %2745 = vmatprep.mubr.bf16.mxu1 %v617_v57  ;;  %v3721_v26 = vpop.permute.xlu0 %1978  ;;  %v683_v57 = vsub.s32 3, %v3737_v29 }
 0x23e   :  { %4410 = vst [vmem:[#allocation37_spill] sm:$0xff] %v3721_v26 }
 0x23f   :  { %v3756_v16 = vrot.slane %v3745_v40, %v683_v57 }
 0x240   :  { %v3719_v24 = vpop.permute.xlu1 %1557 }
 0x241   :  { %v3725_v45 = vpop.permute.xlu0 %1990 }
 0x242   :  { %4411 = vst [vmem:[#allocation38_spill] sm:$0xff] %v3725_v45 }
 0x244   :  { %2746 = vmatmul.mubr.bf16.gmra.mxu1 %v618_v6  ;;  %v3723_v25 = vpop.permute.xlu1 %1562 }
 0x245   :  { %v3729_v3 = vpop.permute.xlu0 %1552 }
 0x248   :  { %v3727_v28 = vpop.permute.xlu1 %1572 }
 0x249   :  { %v3733_v18 = vpop.permute.xlu0 %1567 }
 0x24c   :  { %v3731_v38 = vpop.permute.xlu1 %1582 }
 0x24d   :  { %v3739_v36 = vpop.permute.xlu0 %1577 }
 0x250   :  { %v3735_v62 = vpop.permute.xlu1 %1592 }
 0x251   :  { %4412 = vst [vmem:[#allocation39_spill] sm:$0xff] %v3735_v62  ;;  %v3750_v61 = vpop.permute.xlu0 %1587 }
 0x254   :  { %v3747_v44 = vpop.permute.xlu1 %1602 }
 0x255   :  { %4413 = vst [vmem:[#allocation40_spill] sm:$0xff] %v3747_v44  ;;  %v3763_v32 = vpop.permute.xlu0 %1597 }
 0x256   :  { %4416 = vst [vmem:[#allocation43_spill] sm:$0xff] %v3763_v32 }
 0x258   :  { %v3758_v23 = vpop.permute.xlu1 %1612 }
 0x259   :  { %4414 = vst [vmem:[#allocation41_spill] sm:$0xff] %v3758_v23  ;;  %v675_v23 = vsub.s32 1, %v3737_v29  ;;  %v3776_v31 = vpop.permute.xlu0 %1607 }
 0x25a   :  { %4419 = vst [vmem:[#allocation46_spill] sm:$0xff] %v3776_v31 }
 0x25b   :  { %v3785_v32 = vrot.slane %v3745_v40, %v675_v23 }
 0x25c   :  { %v3772_v42 = vpop.permute.xlu1 %1622 }
 0x25d   :  { %4418 = vst [vmem:[#allocation45_spill] sm:$0xff] %v3772_v42  ;;  %v3795_v21 = vpop.permute.xlu0 %1617 }
 0x25e   :  { %4422 = vst [vmem:[#allocation49_spill] sm:$0xff] %v3795_v21 }
 0x2ac   :  { %v936_v6 = vpop.f32.mrf.mxu1  ;;  %v1049_v11 = vpop.f32.mrf.mxu0 }
 0x2ad   :  { %v3761_v33 = vadd.f32 %v936_v6, %v3753_v1  ;;  %v1050_v47 = vadd.f32 %v1049_v11, %v3782_v27 }
 0x2ae   :  { %v938_v15 = vpop.f32.mrf.mxu1  ;;  %v1051_v45 = vpop.f32.mrf.mxu0 }
 0x2af   :  { %4415 = vst [vmem:[#allocation42_spill] sm:$0xff] %v3761_v33  ;;  %v1052_v59 = vadd.f32 %v1051_v45, %v3756_v16  ;;  %2313 = vmax.xlane.f32.xlu1 %v3761_v33  ;;  %v939_v23 = vadd.f32 %v938_v15, %v3785_v32  ;;  %v687_v15 = vsub.s32 4, %v3737_v29 }
 0x2b0   :  { %v940_v39 = vpop.f32.mrf.mxu1  ;;  %v1053_v46 = vpop.f32.mrf.mxu0 }
 0x2b1   :  { %v1225_v5 = vmin.f32 %v1052_v59, 4.1351666  ;;  %v3768_v57 = vadd.f32 %v940_v39, %v3753_v1  ;;  %v1054_v13 = vadd.f32 %v1053_v46, %v3782_v27 }
 0x2b2   :  { %v942_v6 = vpop.f32.mrf.mxu1  ;;  %v1055_v26 = vpop.f32.mrf.mxu0 }
 0x2b3   :  { %4417 = vst [vmem:[#allocation44_spill] sm:$0xff] %v3768_v57  ;;  %v1801_v30 = vmul.f32 1.442695, %v1225_v5  ;;  %v1056_v44 = vadd.f32 %v1055_v26, %v3756_v16  ;;  %2315 = vmax.xlane.f32.xlu0 %v3768_v57 }
 0x2b4   :  { %v946_v45 = vpop.f32.mrf.mxu1  ;;  %v1059_v33 = vpop.f32.mrf.mxu0 }
 0x2b5   :  { %2888 = vpow2.f32 %v1801_v30  ;;  %v1226_v59 = vmin.f32 %v1056_v44, 4.1351666  ;;  %v3779_v39 = vadd.f32 %v946_v45, %v3753_v1  ;;  %v1723_v30 = vpop.permute.xlu1 %1722 }
 0x2b6   :  { %v948_v5 = vpop.f32.mrf.mxu1  ;;  %v1061_v42 = vpop.f32.mrf.mxu0 }
 0x2b7   :  { %4420 = vst [vmem:[#allocation47_spill] sm:$0xff] %v3779_v39  ;;  %v1803_v26 = vmul.f32 1.442695, %v1226_v59  ;;  %v1062_v57 = vadd.f32 %v1061_v42, %v3756_v16  ;;  %2317 = vmax.xlane.f32.xlu0 %v3779_v39  ;;  %v943_v42 = vadd.f32 %v942_v6, %v3785_v32 }
 0x2b8   :  { %v950_v22 = vpop.f32.mrf.mxu1  ;;  %v1063_v31 = vpop.f32.mrf.mxu0 }
 0x2b9   :  { %2890 = vpow2.f32 %v1803_v26  ;;  %v1227_v44 = vmin.f32 %v1062_v57, 4.1351666  ;;  %v3790_v45 = vadd.f32 %v950_v22, %v3753_v1  ;;  %v1060_v22 = vadd.f32 %v1059_v33, %v3782_v27  ;;  %v1731_v46 = vpop.permute.xlu1 %1730 }
 0x2ba   :  { %v952_v37 = vpop.f32.mrf.mxu1  ;;  %v1065_v59 = vpop.f32.mrf.mxu0  ;;  %v949_v57 = vadd.f32 %v948_v5, %v3785_v32  ;;  %v1064_v20 = vadd.f32 %v1063_v31, %v3782_v27  ;;  %v1706_v33 = vmul.f32 %v3562_v51, %v1054_v13  ;;  %v1530_v29 = vmul.f32 %v3522_v48, %v943_v42 }
 0x2bb   :  { %4421 = vst [vmem:[#allocation48_spill] sm:$0xff] %v3790_v45  ;;  %v1805_v39 = vmul.f32 1.442695, %v1227_v44  ;;  %v1066_v62 = vadd.f32 %v1065_v59, %v3756_v16  ;;  %2319 = vmax.xlane.f32.xlu1 %v3790_v45  ;;  %v1705_v44 = vmul.f32 %v3560_v49, %v1050_v47  ;;  %v1529_v59 = vmul.f32 %v3518_v43, %v939_v23 }
 0x2bc   :  { %v956_v11 = vpop.f32.mrf.mxu1  ;;  %v1069_v26 = vpop.f32.mrf.mxu0  ;;  %v953_v5 = vadd.f32 %v952_v37, %v3785_v32  ;;  %v1707_v31 = vmul.f32 %v3566_v52, %v1060_v22  ;;  %v3818_v13 = vrot.slane %v3745_v40, %v687_v15  ;;  %v1708_v51 = vmul.f32 %v3564_v9, %v1064_v20 }
 0x2bd   :  { %2892 = vpow2.f32 %v1805_v39  ;;  %v1228_v21 = vmin.f32 %v1066_v62, 4.1351666  ;;  %v3805_v6 = vadd.f32 %v956_v11, %v3753_v1  ;;  %v1531_v62 = vmul.f32 %v3529_v56, %v949_v57  ;;  %v1727_v37 = vpop.permute.xlu0 %1726  ;;  %v1735_v15 = vpop.permute.xlu1 %1734 }
 0x2be   :  { %v958_v45 = vpop.f32.mrf.mxu1  ;;  %v1071_v34 = vpop.f32.mrf.mxu0  ;;  %v1070_v47 = vadd.f32 %v1069_v26, %v3782_v27  ;;  %v1625_v22 = vadd.f32 %v3715_v35, %v1529_v59  ;;  %v3827_v57 = vadd.f32 %v1727_v37, %v1706_v33  ;;  %v1532_v26 = vmul.f32 %v3524_v50, %v953_v5 }
 0x2bf   :  { %4423 = vst [vmem:[#allocation50_spill] sm:$0xff] %v3805_v6  ;;  %v1807_v10 = vmul.f32 1.442695, %v1228_v21  ;;  %v1072_v39 = vadd.f32 %v1071_v34, %v3756_v16  ;;  %2321 = vmax.xlane.f32.xlu0 %v3805_v6  ;;  %v3824_v6 = vadd.f32 %v1723_v30, %v1705_v44  ;;  %v959_v20 = vadd.f32 %v958_v45, %v3785_v32 }
 0x2c0   :  { %v960_v23 = vpop.f32.mrf.mxu1  ;;  %v1073_v11 = vpop.f32.mrf.mxu0  ;;  %v3834_v30 = vadd.f32 %v1731_v46, %v1707_v31  ;;  %v3837_v35 = vadd.f32 %v3719_v24, %v1531_v62  ;;  %v1709_v44 = vmul.f32 %v3570_v55, %v1070_v47  ;;  %v3847_v46 = vadd.f32 %v3723_v25, %v1532_v26 }
 0x2c1   :  { %2894 = vpow2.f32 %v1807_v10  ;;  %v1229_v21 = vmin.f32 %v1072_v39, 4.1351666  ;;  %v3822_v34 = vadd.f32 %v960_v23, %v3753_v1  ;;  %v1626_v10 = vadd.f32 %v3729_v3, %v1530_v29  ;;  %v1739_v37 = vpop.permute.xlu0 %1738 }
 0x2c2   :  { %v2889_v42 = vpop.eup %2888  ;;  %v962_v49 = vpop.f32.mrf.mxu1  ;;  %v1074_v24 = vadd.f32 %v1073_v11, %v3782_v27 }
 0x2c3   :  { %4424 = vst [vmem:[#allocation51_spill] sm:$0xff] %v3822_v34  ;;  %v1075_v40 = vpop.f32.mrf.mxu0  ;;  %v1833_v52 = vmul.f32 %v2889_v42, %v3518_v43  ;;  %v1809_v39 = vmul.f32 1.442695, %v1229_v21  ;;  %2323 = vmax.xlane.f32.xlu1 %v3822_v34  ;;  %v3841_v43 = vadd.f32 %v1735_v15, %v1708_v51  ;;  %v963_v29 = vadd.f32 %v962_v49, %v3785_v32 }
 0x2c4   :  { %v1076_v59 = vadd.f32 %v1075_v40, %v3756_v16  ;;  %v966_v33 = vpop.f32.mrf.mxu1  ;;  %v1533_v42 = vmul.f32 %v3533_v0, %v959_v20  ;;  %v3854_v40 = vadd.f32 %v1739_v37, %v1709_v44  ;;  %v1710_v20 = vmul.f32 %v3568_v54, %v1074_v24 }
 0x2c5   :  { %v1079_v5 = vpop.f32.mrf.mxu0  ;;  %v1897_v23 = vmul.f32 0.5, %v1833_v52  ;;  %2896 = vpow2.f32 %v1809_v39  ;;  %v3844_v3 = vadd.f32 %v966_v33, %v3753_v1 }
 0x2c6   :  { %v2891_v45 = vpop.eup %2890  ;;  %v1230_v31 = vmin.f32 %v1076_v59, 4.1351666  ;;  %v968_v62 = vpop.f32.mrf.mxu1  ;;  %v1080_v26 = vadd.f32 %v1079_v5, %v3782_v27 }
 0x2c7   :  { %4425 = vst [vmem:[#allocation52_spill] sm:$0xff] %v3844_v3  ;;  %v1081_v47 = vpop.f32.mrf.mxu0  ;;  %v1913_v21 = vsub.f32 %v1625_v22, %v1897_v23  ;;  %v2185_v52 = vadd.f32 %v1897_v23, %v1625_v22  ;;  %v1834_v51 = vmul.f32 %v2891_v45, %v3522_v48  ;;  %2325 = vmax.xlane.f32.xlu0 %v3844_v3 }
 0x2c8   :  { %v1811_v25 = vmul.f32 1.442695, %v1230_v31  ;;  %v1082_v11 = vadd.f32 %v1081_v47, %v3756_v16  ;;  %v970_v49 = vpop.f32.mrf.mxu1  ;;  %v1534_v23 = vmul.f32 %v3531_v58, %v963_v29  ;;  %v1711_v24 = vmul.f32 %v3574_v63, %v1080_v26 }
 0x2c9   :  { %v1083_v15 = vpop.f32.mrf.mxu0  ;;  %v1929_v39 = vmax.f32 %v1913_v21, 0.0  ;;  %v2201_v59 = vmax.f32 %v2185_v52, 0.0  ;;  %v1898_v33 = vmul.f32 0.5, %v1834_v51  ;;  %v3859_v22 = vadd.f32 %v970_v49, %v3753_v1  ;;  %v1743_v49 = vpop.permute.xlu1 %1742 }
 0x2ca   :  { %v2893_v48 = vpop.eup %2892  ;;  %2898 = vpow2.f32 %v1811_v25  ;;  %v1231_v44 = vmin.f32 %v1082_v11, 4.1351666  ;;  %v972_v45 = vpop.f32.mrf.mxu1  ;;  %v3868_v51 = vadd.f32 %v3733_v18, %v1533_v42 }
 0x2cb   :  { %4426 = vst [vmem:[#allocation53_spill] sm:$0xff] %v3859_v22  ;;  %v1085_v31 = vpop.f32.mrf.mxu0  ;;  %v2009_v5 = vmin.f32 %v3705_v41, %v1929_v39  ;;  %v2217_v47 = vmin.f32 %v3705_v41, %v2201_v59  ;;  %v1914_v37 = vsub.f32 %v1626_v10, %v1898_v33  ;;  %v2186_v21 = vadd.f32 %v1898_v33, %v1626_v10 }
 0x2cc   :  { %2327 = vmax.xlane.f32.xlu1 %v3859_v22  ;;  %v1835_v52 = vmul.f32 %v2893_v48, %v3529_v56  ;;  %v1813_v29 = vmul.f32 1.442695, %v1231_v44  ;;  %v976_v25 = vpop.f32.mrf.mxu1  ;;  %v969_v41 = vadd.f32 %v968_v62, %v3785_v32  ;;  %v1086_v10 = vadd.f32 %v1085_v31, %v3756_v16  ;;  %v1747_v48 = vpop.permute.xlu0 %1746 }
 0x2cd   :  { %v1089_v11 = vpop.f32.mrf.mxu0  ;;  %2025 = vst [vmem:[#allocation9] sm:$0xff] %v2009_v5  ;;  %2233 = vst [vmem:[#allocation9 + $0x10] sm:$0xff] %v2217_v47  ;;  %v1930_v39 = vmax.f32 %v1914_v37, 0.0  ;;  %v2202_v3 = vmax.f32 %v2186_v21, 0.0  ;;  %v3873_v56 = vadd.f32 %v1743_v49, %v1710_v20  ;;  %v3876_v18 = vadd.f32 %v976_v25, %v3753_v1 }
 0x2ce   :  { %v2895_v59 = vpop.eup %2894  ;;  %v1899_v33 = vmul.f32 0.5, %v1835_v52  ;;  %2900 = vpow2.f32 %v1813_v29  ;;  %v978_v42 = vpop.f32.mrf.mxu1  ;;  %v3882_v62 = vadd.f32 %v3727_v28, %v1534_v23  ;;  %v3886_v37 = vadd.f32 %v1747_v48, %v1711_v24 }
 0x2cf   :  { %4427 = vst [vmem:[#allocation54_spill] sm:$0xff] %v3876_v18  ;;  %v1091_v26 = vpop.f32.mrf.mxu0  ;;  %v2010_v44 = vmin.f32 %v3691_v19, %v1930_v39  ;;  %v2218_v5 = vmin.f32 %v3691_v19, %v2202_v3  ;;  %v1836_v47 = vmul.f32 %v2895_v59, %v3524_v50  ;;  %v1232_v21 = vmin.f32 %v1086_v10, 4.1351666  ;;  %2329 = vmax.xlane.f32.xlu0 %v3876_v18 }
 0x2d0   :  { %v1915_v31 = vsub.f32 %v3837_v35, %v1899_v33  ;;  %v2187_v20 = vadd.f32 %v1899_v33, %v3837_v35  ;;  %v980_v52 = vpop.f32.mrf.mxu1  ;;  %v1535_v19 = vmul.f32 %v3539_v7, %v969_v41  ;;  %v1084_v50 = vadd.f32 %v1083_v15, %v3782_v27 }
 0x2d1   :  { %v1093_v29 = vpop.f32.mrf.mxu0  ;;  %2026 = vst [vmem:[#allocation9 + $0x20] sm:$0xff] %v2010_v44  ;;  %2234 = vst [vmem:[#allocation9 + $0x30] sm:$0xff] %v2218_v5  ;;  %v1900_v25 = vmul.f32 0.5, %v1836_v47  ;;  %v973_v28 = vadd.f32 %v972_v45, %v3785_v32  ;;  %v1815_v35 = vmul.f32 1.442695, %v1232_v21  ;;  %v1092_v24 = vadd.f32 %v1091_v26, %v3756_v16 }
 0x2d2   :  { %v2897_v3 = vpop.eup %2896  ;;  %v1931_v23 = vmax.f32 %v1915_v31, 0.0  ;;  %v2203_v49 = vmax.f32 %v2187_v20, 0.0  ;;  %v982_v39 = vpop.f32.mrf.mxu1  ;;  %v1090_v41 = vadd.f32 %v1089_v11, %v3782_v27  ;;  %v979_v44 = vadd.f32 %v978_v42, %v3785_v32 }
 0x2d3   :  { %v1095_v10 = vpop.f32.mrf.mxu0  ;;  %v1916_v59 = vsub.f32 %v3847_v46, %v1900_v25  ;;  %v2188_v33 = vadd.f32 %v1900_v25, %v3847_v46  ;;  %v1837_v48 = vmul.f32 %v2897_v3, %v3533_v0  ;;  %2902 = vpow2.f32 %v1815_v35 }
 0x2d4   :  { %v2011_v15 = vmin.f32 %v3693_v12, %v1931_v23  ;;  %v2219_v45 = vmin.f32 %v3693_v12, %v2203_v49  ;;  %v986_v5 = vpop.f32.mrf.mxu1  ;;  %v3903_v21 = vadd.f32 %v3739_v36, %v1535_v19  ;;  %v1712_v0 = vmul.f32 %v3572_v60, %v1084_v50 }
 0x2d5   :  { %v3900_v47 = vpop.f32.mrf.mxu0  ;;  %v1932_v26 = vmax.f32 %v1916_v59, 0.0  ;;  %v2204_v31 = vmax.f32 %v2188_v33, 0.0  ;;  %v1901_v20 = vmul.f32 0.5, %v1837_v48  ;;  %v1536_v46 = vmul.f32 %v3535_v2, %v973_v28  ;;  %v1751_v33 = vpop.permute.xlu1 %1750 }
 0x2d6   :  { %2027 = vst [vmem:[#allocation9 + $0x40] sm:$0xff] %v2011_v15  ;;  %2235 = vst [vmem:[#allocation9 + $0x50] sm:$0xff] %v2219_v45  ;;  %v1233_v11 = vmin.f32 %v1092_v24, 4.1351666  ;;  %v3908_v12 = vadd.f32 %v980_v52, %v3753_v1  ;;  %v3910_v42 = vpop.f32.mrf.mxu1  ;;  %v1713_v28 = vmul.f32 %v3578_v8, %v1090_v41  ;;  %v1537_v35 = vmul.f32 %v3543_v17, %v979_v44 }
 0x2d7   :  { %v1101_v25 = vpop.f32.mrf.mxu0  ;;  %v2899_v3 = vpop.eup %2898  ;;  %v2012_v23 = vmin.f32 %v3709_v14, %v1932_v26  ;;  %v2220_v49 = vmin.f32 %v3709_v14, %v2204_v31  ;;  %v1917_v36 = vsub.f32 %v3868_v51, %v1901_v20  ;;  %v2189_v19 = vadd.f32 %v1901_v20, %v3868_v51 }
 0x2d8   :  { %4428 = vst [vmem:[#allocation55_spill] sm:$0xff] %v3908_v12  ;;  %v1838_v50 = vmul.f32 %v2899_v3, %v3531_v58  ;;  %v1817_v52 = vmul.f32 1.442695, %v1233_v11  ;;  %2331 = vmax.xlane.f32.xlu1 %v3908_v12  ;;  %v990_v24 = vpop.f32.mrf.mxu1  ;;  %v1096_v15 = vadd.f32 %v1095_v10, %v3756_v16  ;;  %v3922_v51 = vadd.f32 %v986_v5, %v3753_v1  ;;  %v1755_v20 = vpop.permute.xlu0 %1754  ;;  %v4441_v12 = vld [vmem:[#allocation43_spill] sm:$0xff] }
 0x2d9   :  { %v1103_v59 = vpop.f32.mrf.mxu0  ;;  %2028 = vst [vmem:[#allocation9 + $0x60] sm:$0xff] %v2012_v23  ;;  %2236 = vst [vmem:[#allocation9 + $0x70] sm:$0xff] %v2220_v49  ;;  %v1933_v48 = vmax.f32 %v1917_v36, 0.0  ;;  %v2205_v14 = vmax.f32 %v2189_v19, 0.0  ;;  %v3924_v45 = vadd.f32 %v1751_v33, %v1712_v0  ;;  %v1094_v41 = vadd.f32 %v1093_v29, %v3782_v27 }
 0x2da   :  { %4429 = vst [vmem:[#allocation56_spill] sm:$0xff] %v3922_v51  ;;  %v1902_v58 = vmul.f32 0.5, %v1838_v50  ;;  %2904 = vpow2.f32 %v1817_v52  ;;  %v992_v44 = vpop.f32.mrf.mxu1  ;;  %v983_v23 = vadd.f32 %v982_v39, %v3785_v32  ;;  %v1234_v10 = vmin.f32 %v1096_v15, 4.1351666  ;;  %2333 = vmax.xlane.f32.xlu0 %v3922_v51  ;;  %v4431_v15 = vld [vmem:[#allocation15_spill] sm:$0xff] }
 0x2db   :  { %v1105_v26 = vpop.f32.mrf.mxu0  ;;  %v2901_v31 = vpop.eup %2900  ;;  %v2013_v11 = vmin.f32 %v3695_v53, %v1933_v48  ;;  %v2221_v3 = vmin.f32 %v3695_v53, %v2205_v14  ;;  %v3935_v29 = vadd.f32 %v3731_v38, %v1536_v46  ;;  %v3939_v53 = vadd.f32 %v1755_v20, %v1713_v28 }
 0x2dc   :  { %v1918_v5 = vsub.f32 %v3882_v62, %v1902_v58  ;;  %v2190_v0 = vadd.f32 %v1902_v58, %v3882_v62  ;;  %v1839_v49 = vmul.f32 %v2901_v31, %v3539_v7  ;;  %v996_v36 = vpop.f32.mrf.mxu1  ;;  %v3942_v39 = vadd.f32 %v3750_v61, %v1537_v35  ;;  %v4432_v31 = vld [vmem:[#allocation35_spill] sm:$0xff] }
 0x2dd   :  { %v3937_v19 = vpop.f32.mrf.mxu0  ;;  %2029 = vst [vmem:[#allocation9 + $0x80] sm:$0xff] %v2013_v11  ;;  %2237 = vst [vmem:[#allocation9 + $0x90] sm:$0xff] %v2221_v3  ;;  %v1819_v50 = vmul.f32 1.442695, %v1234_v10  ;;  %v1102_v52 = vadd.f32 %v1101_v25, %v3756_v16  ;;  %v3946_v7 = vadd.f32 %v990_v24, %v3753_v1  ;;  %v1714_v14 = vmul.f32 %v3576_v4, %v1094_v41  ;;  %v1759_v10 = vpop.permute.xlu1 %1758 }
 0x2de   :  { %v1934_v33 = vmax.f32 %v1918_v5, 0.0  ;;  %v2206_v62 = vmax.f32 %v2190_v0, 0.0  ;;  %v1903_v48 = vmul.f32 0.5, %v1839_v49  ;;  %v998_v38 = vpop.f32.mrf.mxu1  ;;  %v1538_v58 = vmul.f32 %v4431_v15, %v983_v23 }
 0x2df   :  { %4430 = vst [vmem:[#allocation57_spill] sm:$0xff] %v3946_v7  ;;  %v1111_v46 = vpop.f32.mrf.mxu0  ;;  %2906 = vpow2.f32 %v1819_v50  ;;  %v1235_v28 = vmin.f32 %v1102_v52, 4.1351666  ;;  %2335 = vmax.xlane.f32.xlu1 %v3946_v7  ;;  %v1100_v41 = vadd.f32 %v3900_v47, %v3782_v27  ;;  %v989_v23 = vadd.f32 %v3910_v42, %v3785_v32 }
 0x2e0   :  { %v2014_v61 = vmin.f32 %v4432_v31, %v1934_v33  ;;  %v2222_v35 = vmin.f32 %v4432_v31, %v2206_v62  ;;  %v1919_v25 = vsub.f32 %v3903_v21, %v1903_v48  ;;  %v2191_v20 = vadd.f32 %v1903_v48, %v3903_v21  ;;  %v1000_v24 = vpop.f32.mrf.mxu1  ;;  %v2903_v3 = vpop.eup %2902 }
 0x2e1   :  { %v3955_v11 = vpop.f32.mrf.mxu0  ;;  %v1821_v5 = vmul.f32 1.442695, %v1235_v28  ;;  %v1104_v0 = vadd.f32 %v1103_v59, %v3782_v27  ;;  %v1840_v50 = vmul.f32 %v2903_v3, %v3535_v2  ;;  %v1106_v52 = vadd.f32 %v1105_v26, %v3756_v16  ;;  %v4434_v28 = vld [vmem:[#allocation30_spill] sm:$0xff]  ;;  %v4435_v26 = vld [vmem:[#allocation39_spill] sm:$0xff] }
 0x2e2   :  { %2030 = vst [vmem:[#allocation9 + $0xa0] sm:$0xff] %v2014_v61  ;;  %2238 = vst [vmem:[#allocation9 + $0xb0] sm:$0xff] %v2222_v35  ;;  %v1935_v49 = vmax.f32 %v1919_v25, 0.0  ;;  %v2207_v21 = vmax.f32 %v2191_v20, 0.0  ;;  %v1002_v33 = vpop.f32.mrf.mxu1  ;;  %v3964_v48 = vadd.f32 %v1759_v10, %v1714_v14  ;;  %v993_v47 = vadd.f32 %v992_v44, %v3785_v32  ;;  %v4436_v14 = vld [vmem:[#allocation26_spill] sm:$0xff]  ;;  %v4437_v10 = vld [vmem:[#allocation17_spill] sm:$0xff] }
 0x2e3   :  { %v1115_v62 = vpop.f32.mrf.mxu0  ;;  %2908 = vpow2.f32 %v1821_v5  ;;  %v3968_v42 = vadd.f32 %v996_v36, %v3753_v1  ;;  %v1904_v61 = vmul.f32 0.5, %v1840_v50  ;;  %v1236_v35 = vmin.f32 %v1106_v52, 4.1351666  ;;  %v4438_v44 = vld [vmem:[#allocation25_spill] sm:$0xff] }
 0x2e4   :  { %v2015_v59 = vmin.f32 %v4434_v28, %v1935_v49  ;;  %v2223_v31 = vmin.f32 %v4434_v28, %v2207_v21  ;;  %v1006_v25 = vpop.f32.mrf.mxu1  ;;  %v3975_v20 = vadd.f32 %v4435_v26, %v1538_v58  ;;  %v1715_v3 = vmul.f32 %v4436_v14, %v1100_v41  ;;  %v1763_v28 = vpop.permute.xlu0 %1762  ;;  %v4439_v41 = vld [vmem:[#allocation16_spill] sm:$0xff] }
 0x2e5   :  { %4433 = vst [vmem:[#allocation15_spill] sm:$0xff] %v3968_v42  ;;  %v3972_v2 = vpop.f32.mrf.mxu0  ;;  %v1539_v5 = vmul.f32 %v4437_v10, %v989_v23  ;;  %v1716_v7 = vmul.f32 %v4438_v44, %v1104_v0  ;;  %2337 = vmax.xlane.f32.xlu0 %v3968_v42  ;;  %v1920_v36 = vsub.f32 %v3935_v29, %v1904_v61  ;;  %v1823_v21 = vmul.f32 1.442695, %v1236_v35  ;;  %v1767_v26 = vpop.permute.xlu1 %1766 }
 0x2e6   :  { %2031 = vst [vmem:[#allocation9 + $0xc0] sm:$0xff] %v2015_v59  ;;  %2239 = vst [vmem:[#allocation9 + $0xd0] sm:$0xff] %v2223_v31  ;;  %v2192_v49 = vadd.f32 %v1904_v61, %v3935_v29  ;;  %v1112_v50 = vadd.f32 %v1111_v46, %v3756_v16  ;;  %v1008_v52 = vpop.f32.mrf.mxu1  ;;  %v1540_v51 = vmul.f32 %v4439_v41, %v993_v47 }
 0x2e7   :  { %v2905_v58 = vpop.eup %2904  ;;  %v1110_v23 = vadd.f32 %v3937_v19, %v3782_v27  ;;  %v999_v0 = vadd.f32 %v998_v38, %v3785_v32  ;;  %v3989_v59 = vadd.f32 %v1000_v24, %v3753_v1  ;;  %v1936_v31 = vmax.f32 %v1920_v36, 0.0  ;;  %v1121_v46 = vpop.f32.mrf.mxu0  ;;  %v4442_v38 = vld [vmem:[#allocation36_spill] sm:$0xff] }
 0x2e8   :  { %v2208_v42 = vmax.f32 %v2192_v49, 0.0  ;;  %v1841_v29 = vmul.f32 %v2905_v58, %v3543_v17  ;;  %2910 = vpow2.f32 %v1823_v21  ;;  %v1010_v61 = vpop.f32.mrf.mxu1  ;;  %v3992_v35 = vadd.f32 %v1763_v28, %v1715_v3  ;;  %v4443_v58 = vld [vmem:[#allocation19_spill] sm:$0xff] }
 0x2e9   :  { %4440 = vst [vmem:[#allocation35_spill] sm:$0xff] %v3989_v59  ;;  %v3995_v18 = vadd.f32 %v4441_v12, %v1539_v5  ;;  %v3997_v47 = vadd.f32 %v1767_v26, %v1716_v7  ;;  %v1237_v19 = vmin.f32 %v1112_v50, 4.1351666  ;;  %2339 = vmax.xlane.f32.xlu1 %v3989_v59  ;;  %v2016_v24 = vmin.f32 %v4442_v38, %v1936_v31 }
 0x2ea   :  { %v2224_v36 = vmin.f32 %v4442_v38, %v2208_v42  ;;  %v1905_v49 = vmul.f32 0.5, %v1841_v29  ;;  %v1003_v17 = vadd.f32 %v1002_v33, %v3785_v32  ;;  %v1012_v21 = vpop.f32.mrf.mxu1  ;;  %v1541_v22 = vmul.f32 %v4443_v58, %v999_v0  ;;  %v4445_v42 = vld [vmem:[#allocation40_spill] sm:$0xff]  ;;  %v4446_v33 = vld [vmem:[#allocation27_spill] sm:$0xff]  ;;  %v4016_v0 = vpop.f32.mrf.mxu0 }
 0x2eb   :  { %v1825_v3 = vmul.f32 1.442695, %v1237_v19  ;;  %v1116_v28 = vadd.f32 %v1115_v62, %v3756_v16  ;;  %v4006_v12 = vadd.f32 %v1006_v25, %v3753_v1  ;;  %2032 = vst [vmem:[#allocation9 + $0xe0] sm:$0xff] %v2016_v24  ;;  %v4011_v26 = vadd.f32 %v4445_v42, %v1540_v51  ;;  %v4447_v25 = vld [vmem:[#allocation18_spill] sm:$0xff] }
 0x2ec   :  { %v2907_v7 = vpop.eup %2906  ;;  %2240 = vst [vmem:[#allocation9 + $0xf0] sm:$0xff] %v2224_v36  ;;  %v1921_v5 = vsub.f32 %v3942_v39, %v1905_v49  ;;  %v2193_v50 = vadd.f32 %v1905_v49, %v3942_v39  ;;  %v4014_v31 = vmul.f32 %v4446_v33, %v1110_v23  ;;  %v2735_v29 = vpop.f32.mrf.mxu1  ;;  %v1542_v19 = vmul.f32 %v4447_v25, %v1003_v17  ;;  %v4449_v42 = vld [vmem:[#allocation46_spill] sm:$0xff] }
 0x2ed   :  { %4444 = vst [vmem:[#allocation30_spill] sm:$0xff] %v4006_v12  ;;  %v1842_v62 = vmul.f32 %v2907_v7, %v4431_v15  ;;  %2912 = vpow2.f32 %v1825_v3  ;;  %v1238_v38 = vmin.f32 %v1116_v28, 4.1351666  ;;  %2341 = vmax.xlane.f32.xlu0 %v4006_v12  ;;  %v4023_v51 = vadd.f32 %v3955_v11, %v3782_v27  ;;  %v4450_v28 = vld [vmem:[#allocation37_spill] sm:$0xff] }
 0x2ee   :  { %v1937_v24 = vmax.f32 %v1921_v5, 0.0  ;;  %v2209_v36 = vmax.f32 %v2193_v50, 0.0  ;;  %v1009_v39 = vadd.f32 %v1008_v52, %v3785_v32  ;;  %v1162_v23 = vpop.f32.mrf.mxu1  ;;  %v4027_v59 = vadd.f32 %v4449_v42, %v1541_v22  ;;  %v1125_v52 = vpop.f32.mrf.mxu0 }
 0x2ef   :  { %4448 = vst [vmem:[#allocation39_spill] sm:$0xff] %v4023_v51  ;;  %v1906_v49 = vmul.f32 0.5, %v1842_v62  ;;  %v1827_v15 = vmul.f32 1.442695, %v1238_v38  ;;  %v1122_v3 = vadd.f32 %v1121_v46, %v3756_v16  ;;  %v1120_v50 = vadd.f32 %v3972_v2, %v3782_v27  ;;  %v4452_v46 = vld [vmem:[#allocation41_spill] sm:$0xff] }
 0x2f0   :  { %v2909_v17 = vpop.eup %2908  ;;  %v2017_v7 = vmin.f32 %v4450_v28, %v1937_v24  ;;  %v2225_v5 = vmin.f32 %v4450_v28, %v2209_v36  ;;  %v4035_v11 = vadd.f32 %v1010_v61, %v3753_v1  ;;  %v2736_v12 = vpop.f32.mrf.mxu1  ;;  %v4041_v42 = vadd.f32 %v4452_v46, %v1542_v19  ;;  %v4454_v2 = vld [vmem:[#allocation21_spill] sm:$0xff]  ;;  %v4455_v19 = vld [vmem:[#allocation28_spill] sm:$0xff] }
 0x2f1   :  { %v1922_v62 = vsub.f32 %v3975_v20, %v1906_v49  ;;  %v2194_v22 = vadd.f32 %v1906_v49, %v3975_v20  ;;  %v1843_v38 = vmul.f32 %v2909_v17, %v4437_v10  ;;  %v4043_v24 = vpop.permute.xlu1 %1774  ;;  %2914 = vpow2.f32 %v1827_v15 }
 0x2f2   :  { %4451 = vst [vmem:[#allocation26_spill] sm:$0xff] %v4035_v11  ;;  %4453 = vst [vmem:[#allocation17_spill] sm:$0xff] %v4043_v24  ;;  %v1543_v36 = vmul.f32 %v4454_v2, %v1009_v39  ;;  %v1239_v1 = vmin.f32 %v1122_v3, 4.1351666  ;;  %v1013_v61 = vadd.f32 %v1012_v21, %v3785_v32  ;;  %2343 = vmax.xlane.f32.xlu1 %v4035_v11  ;;  %v1165_v28 = vpop.f32.mrf.mxu1  ;;  %v4457_v24 = vld [vmem:[#allocation32_spill] sm:$0xff] }
 0x2f3   :  { %2033 = vst [vmem:[#allocation9 + $0x100] sm:$0xff] %v2017_v7  ;;  %2241 = vst [vmem:[#allocation9 + $0x110] sm:$0xff] %v2225_v5  ;;  %v1938_v34 = vmax.f32 %v1922_v62, 0.0  ;;  %v2210_v20 = vmax.f32 %v2194_v22, 0.0  ;;  %v1907_v49 = vmul.f32 0.5, %v1843_v38  ;;  %v1126_v10 = vadd.f32 %v1125_v52, %v3756_v16  ;;  %v4456_v7 = vld [vmem:[#allocation20_spill] sm:$0xff] }
 0x2f4   :  { %v4050_v17 = vmul.f32 %v4455_v19, %v1120_v50  ;;  %v1829_v46 = vmul.f32 1.442695, %v1239_v1  ;;  %v1544_v5 = vmul.f32 %v4456_v7, %v1013_v61  ;;  %v1171_v15 = vadd.f32 %v2735_v29, %v3818_v13  ;;  %v2739_v39 = vpop.f32.mrf.mxu1  ;;  %v4458_v52 = vld [vmem:[#allocation49_spill] sm:$0xff] }
 0x2f5   :  { %v2911_v3 = vpop.eup %2910  ;;  %v2018_v32 = vmin.f32 %v4457_v24, %v1938_v34  ;;  %v2226_v21 = vmin.f32 %v4457_v24, %v2210_v20  ;;  %v1923_v62 = vsub.f32 %v3995_v18, %v1907_v49  ;;  %v2195_v22 = vadd.f32 %v1907_v49, %v3995_v18  ;;  %v4459_v38 = vld [vmem:[#allocation45_spill] sm:$0xff]  ;;  %v4065_v20 = vpop.permute.xlu1 %1782 }
 0x2f6   :  { %v1844_v16 = vmul.f32 %v2911_v3, %v4439_v41  ;;  %v4060_v50 = vadd.f32 %v4458_v52, %v1543_v36  ;;  %2916 = vpow2.f32 %v1829_v46  ;;  %v4063_v1 = vadd.f32 %v4459_v38, %v1544_v5  ;;  %v1178_v29 = vpop.f32.mrf.mxu1  ;;  %4460 = vst [vmem:[#allocation25_spill] sm:$0xff] %v4065_v20  ;;  %v4461_v46 = vld [vmem:[#allocation33_spill] sm:$0xff] }
 0x2f7   :  { %2034 = vst [vmem:[#allocation9 + $0x120] sm:$0xff] %v2018_v32  ;;  %2242 = vst [vmem:[#allocation9 + $0x130] sm:$0xff] %v2226_v21  ;;  %v1939_v61 = vmax.f32 %v1923_v62, 0.0  ;;  %v2211_v34 = vmax.f32 %v2195_v22, 0.0  ;;  %v1240_v11 = vmin.f32 %v1126_v10, 4.1351666  ;;  %v1163_v18 = vadd.f32 %v1162_v23, %v3818_v13  ;;  %v4072_v22 = vpop.permute.xlu0 %1770 }
 0x2f8   :  { %v1243_v24 = vmin.f32 %v1171_v15, 4.1351666  ;;  %v1908_v51 = vmul.f32 0.5, %v1844_v16  ;;  %v1174_v41 = vadd.f32 %v2736_v12, %v3818_v13  ;;  %v1166_v36 = vadd.f32 %v1165_v28, %v3818_v13  ;;  %v2740_v49 = vpop.f32.mrf.mxu1 }
 0x2f9   :  { %v2019_v5 = vmin.f32 %v4461_v46, %v1939_v61  ;;  %v2227_v3 = vmin.f32 %v4461_v46, %v2211_v34  ;;  %v1831_v32 = vmul.f32 1.442695, %v1240_v11  ;;  %v1241_v16 = vmin.f32 %v1163_v18, 4.1351666 }
 0x2fa   :  { %v1853_v21 = vmul.f32 1.442695, %v1243_v24  ;;  %v2913_v62 = vpop.eup %2912  ;;  %v1924_v10 = vsub.f32 %v4011_v26, %v1908_v51  ;;  %v2196_v15 = vadd.f32 %v1908_v51, %v4011_v26  ;;  %v1244_v23 = vmin.f32 %v1174_v41, 4.1351666  ;;  %v1181_v52 = vpop.f32.mrf.mxu1  ;;  %v4462_v41 = vld [vmem:[#allocation38_spill] sm:$0xff] }
 0x2fb   :  { %2035 = vst [vmem:[#allocation9 + $0x140] sm:$0xff] %v2019_v5  ;;  %2243 = vst [vmem:[#allocation9 + $0x150] sm:$0xff] %v2227_v3  ;;  %v1845_v12 = vmul.f32 %v2913_v62, %v4443_v58  ;;  %2918 = vpow2.f32 %v1831_v32  ;;  %v1242_v28 = vmin.f32 %v1166_v36, 4.1351666  ;;  %v1187_v38 = vadd.f32 %v2739_v39, %v3818_v13  ;;  %v4078_v24 = vpop.permute.xlu1 %2006 }
 0x2fc   :  { %v1940_v11 = vmax.f32 %v1924_v10, 0.0  ;;  %v2212_v61 = vmax.f32 %v2196_v15, 0.0  ;;  %2920 = vpow2.f32 %v1853_v21  ;;  %v1849_v34 = vmul.f32 1.442695, %v1241_v16  ;;  %v2743_v46 = vpop.f32.mrf.mxu1  ;;  %v4085_v10 = vpop.permute.xlu0 %1778 }
 0x2fd   :  { %v1909_v20 = vmul.f32 0.5, %v1845_v12  ;;  %v1855_v26 = vmul.f32 1.442695, %v1244_v23  ;;  %v1851_v51 = vmul.f32 1.442695, %v1242_v28  ;;  %v1179_v18 = vadd.f32 %v1178_v29, %v3818_v13 }
 0x2fe   :  { %v2020_v5 = vmin.f32 %v4462_v41, %v1940_v11  ;;  %v2228_v58 = vmin.f32 %v4462_v41, %v2212_v61  ;;  %2922 = vpow2.f32 %v1849_v34  ;;  %v1247_v36 = vmin.f32 %v1187_v38, 4.1351666  ;;  %v1194_v3 = vpop.f32.mrf.mxu1  ;;  %v2915_v39 = vpop.eup %2914 }
 0x2ff   :  { %v1925_v32 = vsub.f32 %v4027_v59, %v1909_v20  ;;  %v2197_v21 = vadd.f32 %v1909_v20, %v4027_v59  ;;  %2924 = vpow2.f32 %v1855_v26  ;;  %v1245_v62 = vmin.f32 %v1179_v18, 4.1351666  ;;  %v4090_v59 = vpop.permute.xlu1 %2090  ;;  %v4463_v18 = vld [vmem:[#allocation34_spill] sm:$0xff] }
 0x300   :  { %2036 = vst [vmem:[#allocation9 + $0x160] sm:$0xff] %v2020_v5  ;;  %2244 = vst [vmem:[#allocation9 + $0x170] sm:$0xff] %v2228_v58  ;;  %2926 = vpow2.f32 %v1851_v51  ;;  %v1861_v29 = vmul.f32 1.442695, %v1247_v36  ;;  %v1190_v15 = vadd.f32 %v2740_v49, %v3818_v13  ;;  %v1182_v16 = vadd.f32 %v1181_v52, %v3818_v13  ;;  %v2744_v23 = vpop.f32.mrf.mxu1  ;;  %v3024_v5 = vld [vmem:[%s4345_s7 + $0x68] sm:$0xff]  ;;  %v1999_v36 = vpop.permute.xlu0 %1998 }
 0x301   :  { %v1941_v12 = vmax.f32 %v1925_v32, 0.0  ;;  %v2213_v28 = vmax.f32 %v2197_v21, 0.0  ;;  %v1857_v38 = vmul.f32 1.442695, %v1245_v62  ;;  %v1203_v11 = vadd.f32 %v2743_v46, %v3818_v13  ;;  %v3025_v46 = vld [vmem:[%s4345_s7 + $0x60] sm:$0xff] }
 0x302   :  { %2928 = vpow2.f32 %v1861_v29  ;;  %v1248_v20 = vmin.f32 %v1190_v15, 4.1351666  ;;  %v1246_v61 = vmin.f32 %v1182_v16, 4.1351666  ;;  %v1846_v34 = vmul.f32 %v2915_v39, %v4447_v25  ;;  %v1197_v26 = vpop.f32.mrf.mxu1 }
 0x303   :  { %v2917_v51 = vpop.eup %2916  ;;  %v2021_v41 = vmin.f32 %v4463_v18, %v1941_v12  ;;  %v2229_v49 = vmin.f32 %v4463_v18, %v2213_v28  ;;  %2930 = vpow2.f32 %v1857_v38  ;;  %v1251_v52 = vmin.f32 %v1203_v11, 4.1351666  ;;  %2142 = vperm.xlu1 %2782, %v3024_v5   ;;  %2138 = vperm.xlu0 %2783, %v3025_v46  }
 0x304   :  { %v1863_v58 = vmul.f32 1.442695, %v1248_v20  ;;  %v1859_v25 = vmul.f32 1.442695, %v1246_v61  ;;  %v1910_v39 = vmul.f32 0.5, %v1846_v34  ;;  %v1195_v32 = vadd.f32 %v1194_v3, %v3818_v13  ;;  %v4107_v61 = vpop.permute.xlu1 %2098 }
 0x305   :  { %2037 = vst [vmem:[#allocation9 + $0x180] sm:$0xff] %v2021_v41  ;;  %2245 = vst [vmem:[#allocation9 + $0x190] sm:$0xff] %v2229_v49  ;;  %v1869_v21 = vmul.f32 1.442695, %v1251_v52  ;;  %v1206_v62 = vadd.f32 %v2744_v23, %v3818_v13  ;;  %v1847_v29 = vmul.f32 %v2917_v51, %v4454_v2  ;;  %v1198_v15 = vadd.f32 %v1197_v26, %v3818_v13  ;;  %v2747_v2 = vpop.f32.mrf.mxu1  ;;  %v4464_v52 = vld [vmem:[#allocation24_spill] sm:$0xff] }
 0x306   :  { %2932 = vpow2.f32 %v1863_v58  ;;  %v1926_v16 = vsub.f32 %v4041_v42, %v1910_v39  ;;  %v2198_v12 = vadd.f32 %v1910_v39, %v4041_v42  ;;  %v1249_v28 = vmin.f32 %v1195_v32, 4.1351666 }
 0x307   :  { %2934 = vpow2.f32 %v1859_v25  ;;  %v1252_v38 = vmin.f32 %v1206_v62, 4.1351666  ;;  %v1911_v11 = vmul.f32 0.5, %v1847_v29  ;;  %v1250_v20 = vmin.f32 %v1198_v15, 4.1351666  ;;  %v2003_v25 = vpop.permute.xlu0 %2002  ;;  %v4465_v15 = vld [vmem:[#allocation22_spill] sm:$0xff] }
 0x308   :  { %v2919_v3 = vpop.eup %2918  ;;  %2936 = vpow2.f32 %v1869_v21  ;;  %v1942_v34 = vmax.f32 %v1926_v16, 0.0  ;;  %v2214_v23 = vmax.f32 %v2198_v12, 0.0  ;;  %v1865_v18 = vmul.f32 1.442695, %v1249_v28  ;;  %v1210_v28 = vpop.f32.mrf.mxu1 }
 0x309   :  { %v2921_v51 = vpop.eup %2920  ;;  %v1848_v26 = vmul.f32 %v2919_v3, %v4456_v7  ;;  %v1871_v41 = vmul.f32 1.442695, %v1252_v38  ;;  %v1927_v49 = vsub.f32 %v4060_v50, %v1911_v11  ;;  %v2199_v42 = vadd.f32 %v1911_v11, %v4060_v50 }
 0x30a   :  { %v1883_v5 = vmul.f32 %v2921_v51, %v4464_v52  ;;  %v2022_v46 = vmin.f32 %v1999_v36, %v1942_v34  ;;  %v2230_v58 = vmin.f32 %v1999_v36, %v2214_v23  ;;  %2938 = vpow2.f32 %v1865_v18 }
 0x30b   :  { %v2923_v39 = vpop.eup %2922  ;;  %v1912_v32 = vmul.f32 0.5, %v1848_v26  ;;  %2940 = vpow2.f32 %v1871_v41  ;;  %v1943_v21 = vmax.f32 %v1927_v49, 0.0  ;;  %v2215_v62 = vmax.f32 %v2199_v42, 0.0  ;;  %v2103_v26 = vpop.permute.xlu1 %2102 }
 0x30c   :  { %v2925_v29 = vpop.eup %2924  ;;  %v1881_v16 = vmul.f32 %v2923_v39, %v4465_v15  ;;  %v2043_v7 = vmul.f32 0.5, %v1883_v5  ;;  %2038 = vst [vmem:[#allocation9 + $0x1a0] sm:$0xff] %v2022_v46  ;;  %2246 = vst [vmem:[#allocation9 + $0x1b0] sm:$0xff] %v2230_v58  ;;  %v1867_v12 = vmul.f32 1.442695, %v1250_v20  ;;  %v1219_v50 = vadd.f32 %v2747_v2, %v3818_v13  ;;  %v2748_v58 = vpop.f32.mrf.mxu1 }
 0x30d   :  { %v2927_v38 = vpop.eup %2926  ;;  %v1928_v36 = vsub.f32 %v4063_v1, %v1912_v32  ;;  %v2200_v11 = vadd.f32 %v1912_v32, %v4063_v1  ;;  %v1884_v3 = vmul.f32 %v2925_v29, %v3564_v9  ;;  %v2023_v34 = vmin.f32 %v2003_v25, %v1943_v21  ;;  %v4128_v21 = vpop.permute.xlu0 %2094 }
 0x30e   :  { %v2041_v23 = vmul.f32 0.5, %v1881_v16  ;;  %v2059_v18 = vsub.f32 %v3834_v30, %v2043_v7  ;;  %v2251_v51 = vadd.f32 %v2043_v7, %v3834_v30  ;;  %v2231_v41 = vmin.f32 %v2003_v25, %v2215_v62 }
 0x30f   :  { %v4120_v49 = vpop.eup %2928  ;;  %v1944_v20 = vmax.f32 %v1928_v36, 0.0  ;;  %v2216_v2 = vmax.f32 %v2200_v11, 0.0  ;;  %v2044_v42 = vmul.f32 0.5, %v1884_v3  ;;  %2039 = vst [vmem:[#allocation9 + $0x1c0] sm:$0xff] %v2023_v34  ;;  %2942 = vpow2.f32 %v1867_v12  ;;  %v2111_v34 = vpop.permute.xlu1 %2110 }
 0x310   :  { %v2931_v52 = vpop.eup %2930  ;;  %v2057_v1 = vsub.f32 %v3824_v6, %v2041_v23  ;;  %v2249_v9 = vadd.f32 %v2041_v23, %v3824_v6  ;;  %v2075_v5 = vmax.f32 %v2059_v18, 0.0  ;;  %v2267_v46 = vmax.f32 %v2251_v51, 0.0  ;;  %2247 = vst [vmem:[#allocation9 + $0x1d0] sm:$0xff] %v2231_v41  ;;  %v4466_v18 = vld [vmem:[#allocation23_spill] sm:$0xff]  ;;  %v1213_v51 = vpop.f32.mrf.mxu1 }
 0x311   :  { %v2024_v30 = vmin.f32 %v4078_v24, %v1944_v20  ;;  %v2232_v25 = vmin.f32 %v4078_v24, %v2216_v2  ;;  %v2060_v39 = vsub.f32 %v3841_v43, %v2044_v42  ;;  %v2252_v32 = vadd.f32 %v2044_v42, %v3841_v43 }
 0x312   :  { %v2073_v62 = vmax.f32 %v2057_v1, 0.0  ;;  %v2265_v29 = vmax.f32 %v2249_v9, 0.0  ;;  %v2155_v15 = vmin.f32 %v4107_v61, %v2075_v5  ;;  %v2283_v6 = vmin.f32 %v4107_v61, %v2267_v46  ;;  %v4140_v46 = vpop.permute.xlu0 %2106 }
 0x313   :  { %v2933_v16 = vpop.eup %2932  ;;  %2040 = vst [vmem:[#allocation9 + $0x1e0] sm:$0xff] %v2024_v30  ;;  %2248 = vst [vmem:[#allocation9 + $0x1f0] sm:$0xff] %v2232_v25  ;;  %v2076_v7 = vmax.f32 %v2060_v39, 0.0  ;;  %v2268_v12 = vmax.f32 %v2252_v32, 0.0  ;;  %v1255_v36 = vmin.f32 %v1219_v50, 4.1351666  ;;  %v1211_v24 = vadd.f32 %v1210_v28, %v3818_v13 }
 0x314   :  { %v2935_v11 = vpop.eup %2934  ;;  %v2153_v3 = vmin.f32 %v4090_v59, %v2073_v62  ;;  %v2281_v43 = vmin.f32 %v4090_v59, %v2265_v29  ;;  %2171 = vst [vmem:[#allocation9 + $0x48] sm:$0xff] %v2155_v15  ;;  %2299 = vst [vmem:[#allocation9 + $0x58] sm:$0xff] %v2283_v6  ;;  %v1888_v23 = vmul.f32 %v2933_v16, %v3572_v60 }
 0x315   :  { %v1882_v61 = vmul.f32 %v2927_v38, %v4466_v18  ;;  %v2937_v41 = vpop.eup %2936  ;;  %v2156_v20 = vmin.f32 %v2103_v26, %v2076_v7  ;;  %v2284_v2 = vmin.f32 %v2103_v26, %v2268_v12  ;;  %v1886_v50 = vmul.f32 %v2935_v11, %v3568_v54 }
 0x316   :  { %v1877_v42 = vmul.f32 1.442695, %v1255_v36  ;;  %2169 = vst [vmem:[#allocation9 + $0x8] sm:$0xff] %v2153_v3  ;;  %2297 = vst [vmem:[#allocation9 + $0x18] sm:$0xff] %v2281_v43  ;;  %v2048_v28 = vmul.f32 0.5, %v1888_v23  ;;  %v1222_v59 = vadd.f32 %v2748_v58, %v3818_v13  ;;  %v1214_v38 = vadd.f32 %v1213_v51, %v3818_v13  ;;  %v2119_v13 = vpop.permute.xlu1 %2118  ;;  %v4151_v18 = vpop.permute.xlu0 %2114 }
 0x317   :  { %v1253_v1 = vmin.f32 %v1211_v24, 4.1351666  ;;  %v2042_v9 = vmul.f32 0.5, %v1882_v61  ;;  %v2939_v5 = vpop.eup %2938  ;;  %2172 = vst [vmem:[#allocation9 + $0x68] sm:$0xff] %v2156_v20  ;;  %2300 = vst [vmem:[#allocation9 + $0x78] sm:$0xff] %v2284_v2  ;;  %v2046_v60 = vmul.f32 0.5, %v1886_v50  ;;  %v1885_v26 = vmul.f32 %v2931_v52, %v3570_v55 }
 0x318   :  { %2944 = vpow2.f32 %v1877_v42  ;;  %v2941_v54 = vpop.eup %2940  ;;  %v2064_v30 = vsub.f32 %v3924_v45, %v2048_v28  ;;  %v2256_v25 = vadd.f32 %v2048_v28, %v3924_v45  ;;  %v1256_v15 = vmin.f32 %v1222_v59, 4.1351666 }
 0x319   :  { %v1873_v39 = vmul.f32 1.442695, %v1253_v1  ;;  %v2058_v32 = vsub.f32 %v3827_v57, %v2042_v9  ;;  %v2062_v58 = vsub.f32 %v3873_v56, %v2046_v60  ;;  %v2254_v62 = vadd.f32 %v2046_v60, %v3873_v56 }
 0x31a   :  { %v2250_v29 = vadd.f32 %v2042_v9, %v3827_v57  ;;  %v2080_v6 = vmax.f32 %v2064_v30, 0.0  ;;  %v2272_v16 = vmax.f32 %v2256_v25, 0.0  ;;  %v1879_v36 = vmul.f32 1.442695, %v1256_v15  ;;  %v2127_v28 = vpop.permute.xlu1 %2126 }
 0x31b   :  { %2946 = vpow2.f32 %v1873_v39  ;;  %v2074_v55 = vmax.f32 %v2058_v32, 0.0  ;;  %v2078_v52 = vmax.f32 %v2062_v58, 0.0  ;;  %v2270_v7 = vmax.f32 %v2254_v62, 0.0 }
 0x31c   :  { %v2266_v12 = vmax.f32 %v2250_v29, 0.0  ;;  %v2943_v45 = vpop.eup %2942  ;;  %v2160_v24 = vmin.f32 %v2119_v13, %v2080_v6  ;;  %v2288_v11 = vmin.f32 %v2119_v13, %v2272_v16  ;;  %v1254_v43 = vmin.f32 %v1214_v38, 4.1351666 }
 0x31d   :  { %v2154_v3 = vmin.f32 %v4128_v21, %v2074_v55  ;;  %v2158_v23 = vmin.f32 %v2111_v34, %v2078_v52  ;;  %v2286_v56 = vmin.f32 %v2111_v34, %v2270_v7  ;;  %2948 = vpow2.f32 %v1879_v36 }
 0x31e   :  { %v2282_v57 = vmin.f32 %v4128_v21, %v2266_v12  ;;  %2176 = vst [vmem:[#allocation9 + $0xe8] sm:$0xff] %v2160_v24  ;;  %2304 = vst [vmem:[#allocation9 + $0xf8] sm:$0xff] %v2288_v11  ;;  %v1890_v61 = vmul.f32 %v2943_v45, %v3576_v4  ;;  %v1875_v51 = vmul.f32 1.442695, %v1254_v43  ;;  %v2045_v20 = vmul.f32 0.5, %v1885_v26  ;;  %v2123_v26 = vpop.permute.xlu0 %2122 }
 0x31f   :  { %2170 = vst [vmem:[#allocation9 + $0x28] sm:$0xff] %v2154_v3  ;;  %v1892_v2 = vmul.f32 %v2941_v54, %v4438_v44  ;;  %v1124_v50 = vadd.f32 %v4016_v0, %v3782_v27  ;;  %2174 = vst [vmem:[#allocation9 + $0xa8] sm:$0xff] %v2158_v23  ;;  %v1887_v21 = vmul.f32 %v4120_v49, %v3574_v63 }
 0x320   :  { %2302 = vst [vmem:[#allocation9 + $0xb8] sm:$0xff] %v2286_v56  ;;  %2298 = vst [vmem:[#allocation9 + $0x38] sm:$0xff] %v2282_v57  ;;  %v1889_v34 = vmul.f32 %v2939_v5, %v3578_v8  ;;  %v1891_v42 = vmul.f32 %v2937_v41, %v4436_v14  ;;  %v2050_v1 = vmul.f32 0.5, %v1890_v61  ;;  %2950 = vpow2.f32 %v1875_v51 }
 0x321   :  { %v2061_v4 = vsub.f32 %v3854_v40, %v2045_v20  ;;  %v2253_v44 = vadd.f32 %v2045_v20, %v3854_v40  ;;  %v2052_v9 = vmul.f32 0.5, %v1892_v2  ;;  %v2047_v59 = vmul.f32 0.5, %v1887_v21  ;;  %v4468_v2 = vld [vmem:[#allocation39_spill] sm:$0xff] }
 0x322   :  { %v2049_v27 = vmul.f32 0.5, %v1889_v34  ;;  %v2051_v0 = vmul.f32 0.5, %v1891_v42  ;;  %v2066_v60 = vsub.f32 %v3964_v48, %v2050_v1  ;;  %v2258_v38 = vadd.f32 %v2050_v1, %v3964_v48  ;;  %v2131_v3 = vpop.permute.xlu0 %2130  ;;  %v4470_v1 = vld [vmem:[#allocation25_spill] sm:$0xff] }
 0x323   :  { %v2077_v63 = vmax.f32 %v2061_v4, 0.0  ;;  %v2269_v49 = vmax.f32 %v2253_v44, 0.0  ;;  %v2068_v8 = vsub.f32 %v3997_v47, %v2052_v9  ;;  %v2260_v14 = vadd.f32 %v2052_v9, %v3997_v47  ;;  %v2135_v47 = vpop.permute.xlu1 %2134 }
 0x324   :  { %v2063_v41 = vsub.f32 %v3886_v37, %v2047_v59  ;;  %v2255_v5 = vadd.f32 %v2047_v59, %v3886_v37  ;;  %v2082_v54 = vmax.f32 %v2066_v60, 0.0  ;;  %v2274_v30 = vmax.f32 %v2258_v38, 0.0  ;;  %v4471_v59 = vld [vmem:[#allocation17_spill] sm:$0xff] }
 0x325   :  { %v2945_v40 = vpop.eup %2944  ;;  %v2157_v25 = vmin.f32 %v4140_v46, %v2077_v63  ;;  %v2285_v39 = vmin.f32 %v4140_v46, %v2269_v49  ;;  %v2084_v32 = vmax.f32 %v2068_v8, 0.0  ;;  %v2276_v48 = vmax.f32 %v2260_v14, 0.0  ;;  %v4472_v14 = vld [vmem:[#allocation42_spill] sm:$0xff] }
 0x326   :  { %v2079_v58 = vmax.f32 %v2063_v41, 0.0  ;;  %v2271_v62 = vmax.f32 %v2255_v5, 0.0  ;;  %v2162_v29 = vmin.f32 %v2127_v28, %v2082_v54  ;;  %v2290_v15 = vmin.f32 %v2127_v28, %v2274_v30 }
 0x327   :  { %2173 = vst [vmem:[#allocation9 + $0x88] sm:$0xff] %v2157_v25  ;;  %2301 = vst [vmem:[#allocation9 + $0x98] sm:$0xff] %v2285_v39  ;;  %v2065_v13 = vsub.f32 %v3939_v53, %v2049_v27  ;;  %v2257_v37 = vadd.f32 %v2049_v27, %v3939_v53  ;;  %v2164_v16 = vmin.f32 %v2135_v47, %v2084_v32  ;;  %v4467_v53 = vld [vmem:[#allocation31_spill] sm:$0xff] }
 0x328   :  { %v2947_v6 = vpop.eup %2946  ;;  %v2292_v55 = vmin.f32 %v2135_v47, %v2276_v48  ;;  %v2159_v52 = vmin.f32 %v4151_v18, %v2079_v58  ;;  %v2287_v46 = vmin.f32 %v4151_v18, %v2271_v62  ;;  %2178 = vst [vmem:[#allocation9 + $0x128] sm:$0xff] %v2162_v29  ;;  %2306 = vst [vmem:[#allocation9 + $0x138] sm:$0xff] %v2290_v15  ;;  %v4474_v39 = vld [vmem:[#allocation47_spill] sm:$0xff]  ;;  %v4475_v62 = vld [vmem:[#allocation48_spill] sm:$0xff] }
 0x329   :  { %v2081_v7 = vmax.f32 %v2065_v13, 0.0  ;;  %v2273_v12 = vmax.f32 %v2257_v37, 0.0  ;;  %v2067_v36 = vsub.f32 %v3992_v35, %v2051_v0  ;;  %v2259_v45 = vadd.f32 %v2051_v0, %v3992_v35  ;;  %2180 = vst [vmem:[#allocation9 + $0x168] sm:$0xff] %v2164_v16  ;;  %v4476_v13 = vld [vmem:[#allocation50_spill] sm:$0xff] }
 0x32a   :  { %v4179_v24 = vadd.f32 %v4072_v22, %v4014_v31  ;;  %v1720_v11 = vmul.f32 %v4467_v53, %v1124_v50  ;;  %2308 = vst [vmem:[#allocation9 + $0x178] sm:$0xff] %v2292_v55  ;;  %2175 = vst [vmem:[#allocation9 + $0xc8] sm:$0xff] %v2159_v52  ;;  %v1893_v43 = vmul.f32 %v2947_v6, %v4446_v33  ;;  %v2949_v56 = vpop.eup %2948  ;;  %v4469_v50 = vld [vmem:[#allocation29_spill] sm:$0xff]  ;;  %v4477_v52 = vld [vmem:[#allocation51_spill] sm:$0xff] }
 0x32b   :  { %2303 = vst [vmem:[#allocation9 + $0xd8] sm:$0xff] %v2287_v46  ;;  %v1895_v23 = vmul.f32 %v2945_v40, %v4455_v19  ;;  %v2161_v57 = vmin.f32 %v2123_v26, %v2081_v7  ;;  %v2289_v18 = vmin.f32 %v2123_v26, %v2273_v12  ;;  %v2083_v61 = vmax.f32 %v2067_v36, 0.0  ;;  %v4473_v40 = vld [vmem:[#allocation44_spill] sm:$0xff] }
 0x32c   :  { %v2275_v35 = vmax.f32 %v2259_v45, 0.0  ;;  %v4186_v31 = vadd.f32 %v4085_v10, %v4050_v17  ;;  %v4188_v22 = vmul.f32 0.5, %v1893_v43  ;;  %v1896_v20 = vmul.f32 %v2949_v56, %v4467_v53  ;;  %v4478_v45 = vld [vmem:[#allocation52_spill] sm:$0xff] }
 0x32d   :  { %v4190_v51 = vmul.f32 0.5, %v1895_v23  ;;  %v1718_v33 = vmul.f32 %v4469_v50, %v4468_v2  ;;  %2177 = vst [vmem:[#allocation9 + $0x108] sm:$0xff] %v2161_v57  ;;  %2305 = vst [vmem:[#allocation9 + $0x118] sm:$0xff] %v2289_v18  ;;  %v2163_v19 = vmin.f32 %v2131_v3, %v2083_v61  ;;  %v2951_v34 = vpop.eup %2950  ;;  %v4208_v4 = vadd.f32 %v4470_v1, %v1720_v11  ;;  %v4479_v23 = vld [vmem:[#allocation53_spill] sm:$0xff] }
 0x32e   :  { %v2291_v21 = vmin.f32 %v2131_v3, %v2275_v35  ;;  %v2069_v42 = vsub.f32 %v4179_v24, %v4188_v22  ;;  %v4199_v17 = vadd.f32 %v4188_v22, %v4179_v24  ;;  %v1894_v44 = vmul.f32 %v2951_v34, %v4469_v50  ;;  %v4481_v34 = vld [vmem:[#allocation55_spill] sm:$0xff] }
 0x32f   :  { %v2071_v10 = vsub.f32 %v4186_v31, %v4190_v51  ;;  %v4205_v28 = vadd.f32 %v4190_v51, %v4186_v31  ;;  %2179 = vst [vmem:[#allocation9 + $0x148] sm:$0xff] %v2163_v19  ;;  %v4211_v9 = vmul.f32 0.5, %v1896_v20  ;;  %v4214_v27 = vadd.f32 %v4471_v59, %v1718_v33  ;;  %v4480_v20 = vld [vmem:[#allocation54_spill] sm:$0xff] }
 0x330   :  { %2307 = vst [vmem:[#allocation9 + $0x158] sm:$0xff] %v2291_v21  ;;  %v4216_v0 = vmul.f32 0.5, %v1894_v44 }
 0x331   :  { %v2072_v60 = vsub.f32 %v4208_v4, %v4211_v9  ;;  %v4222_v38 = vadd.f32 %v4211_v9, %v4208_v4 }
 0x332   :  { %v2070_v63 = vsub.f32 %v4214_v27, %v4216_v0  ;;  %v4228_v49 = vadd.f32 %v4216_v0, %v4214_v27  ;;  %v3027_v27 = vld [vmem:[%s4345_s7 + $0x70] sm:$0xff] }
 0x338   :  { %v2314_v8 = vpop.xlane.xlu1 %2313 }
 0x339   :  { %v2345_v41 = vsub.f32 %v4472_v14, %v2314_v8  ;;  %v4482_v8 = vld [vmem:[#allocation56_spill] sm:$0xff] }
 0x33b   :  { %v2361_v5 = vmul.f32 1.442695, %v2345_v41 }
 0x33c   :  { %v2316_v26 = vpop.xlane.xlu0 %2315 }
 0x33d   :  { %2952 = vpow2.f32 %v2361_v5  ;;  %v2346_v54 = vsub.f32 %v4473_v40, %v2316_v26  ;;  %v4483_v40 = vld [vmem:[#allocation57_spill] sm:$0xff] }
 0x33f   :  { %v2363_v30 = vmul.f32 1.442695, %v2346_v54 }
 0x340   :  { %v2318_v25 = vpop.xlane.xlu0 %2317 }
 0x341   :  { %2954 = vpow2.f32 %v2363_v30  ;;  %v2347_v32 = vsub.f32 %v4474_v39, %v2318_v25 }
 0x343   :  { %v2365_v48 = vmul.f32 1.442695, %v2347_v32  ;;  %v4484_v32 = vld [vmem:[#allocation15_spill] sm:$0xff] }
 0x344   :  { %v2320_v58 = vpop.xlane.xlu1 %2319 }
 0x345   :  { %2956 = vpow2.f32 %v2365_v48  ;;  %v2348_v29 = vsub.f32 %v4475_v62, %v2320_v58 }
 0x347   :  { %v2367_v15 = vmul.f32 1.442695, %v2348_v29 }
 0x348   :  { %v2322_v47 = vpop.xlane.xlu0 %2321 }
 0x349   :  { %2958 = vpow2.f32 %v2367_v15  ;;  %v2349_v37 = vsub.f32 %v4476_v13, %v2322_v47  ;;  %v4485_v15 = vld [vmem:[#allocation35_spill] sm:$0xff] }
 0x34a   :  { %v4235_v6 = vpop.eup %2952 }
 0x34b   :  { %v2369_v16 = vmul.f32 1.442695, %v2349_v37  ;;  %2393 = vadd.xlane.f32.xlu1 %v4235_v6 }
 0x34c   :  { %v2324_v55 = vpop.xlane.xlu1 %2323 }
 0x34d   :  { %2960 = vpow2.f32 %v2369_v16  ;;  %v2350_v46 = vsub.f32 %v4477_v52, %v2324_v55  ;;  %v4486_v55 = vld [vmem:[#allocation30_spill] sm:$0xff] }
 0x34e   :  { %v4239_v7 = vpop.eup %2954 }
 0x34f   :  { %v2371_v12 = vmul.f32 1.442695, %v2350_v46  ;;  %2395 = vadd.xlane.f32.xlu0 %v4239_v7 }
 0x350   :  { %v2326_v36 = vpop.xlane.xlu0 %2325 }
 0x351   :  { %2962 = vpow2.f32 %v2371_v12  ;;  %v2351_v53 = vsub.f32 %v4478_v45, %v2326_v36  ;;  %v4487_v45 = vld [vmem:[#allocation26_spill] sm:$0xff] }
 0x352   :  { %v4243_v11 = vpop.eup %2956 }
 0x353   :  { %v2373_v3 = vmul.f32 1.442695, %v2351_v53  ;;  %2397 = vadd.xlane.f32.xlu0 %v4243_v11 }
 0x355   :  { %v2328_v43 = vpop.xlane.xlu1 %2327  ;;  %2964 = vpow2.f32 %v2373_v3  ;;  %v2085_v3 = vmax.f32 %v2069_v42, 0.0 }
 0x356   :  { %v2352_v56 = vsub.f32 %v4479_v23, %v2328_v43  ;;  %v4247_v57 = vpop.eup %2958  ;;  %v2277_v43 = vmax.f32 %v4199_v17, 0.0  ;;  %v3026_v17 = vld [vmem:[%s4345_s7 + $0x78] sm:$0xff]  ;;  %s3151_s7 = smov [#allocation9]  }
 0x357   :  { %2399 = vadd.xlane.f32.xlu1 %v4247_v57  ;;  %s2490_s2 = sshll.u32 %s3151_s7, 4  ;;  %s2491_s2 = int_to_ptr.vmem [resolvable:$true] %s2490_s2 }
 0x358   :  { %v2375_v18 = vmul.f32 1.442695, %v2352_v56  ;;  %v2330_v61 = vpop.xlane.xlu0 %2329  ;;  %s3088_s3 = scalar_lea.vmem %s2491_s2, 8192  ;;  %p3093_p2 = scmp.lt.s32.totalorder %s2491_s2, %s2491_s2 }
 0x359   :  { %v2353_v2 = vsub.f32 %v4480_v20, %v2330_v61  ;;  %v2278_v61 = vmax.f32 %v4228_v49, 0.0  ;;  %p3089_p1 = scmp.ne.s32.totalorder %s2491_s2, %s3088_s3  ;;  %p3094_p3 = scmp.lt.s32.totalorder %s3088_s3, %s3088_s3 }
 0x35a   :  { %2966 = vpow2.f32 %v2375_v18  ;;  %v4250_v35 = vpop.eup %2960  ;;  %v2086_v18 = vmax.f32 %v2070_v63, 0.0 }
 0x35b   :  { %2401 = vadd.xlane.f32.xlu0 %v4250_v35  ;;  %v2377_v50 = vmul.f32 1.442695, %v2353_v2  ;;  %p3095_p4 = por %p3094_p3, %p3093_p2 }
 0x35d   :  { %2968 = vpow2.f32 %v2377_v50  ;;  %p3096_p5 = pnand %p3095_p4, %p3089_p1 }
 0x35e   :  { %v4254_v33 = vpop.eup %2962 }
 0x35f   :  { %2403 = vadd.xlane.f32.xlu1 %v4254_v33 }
 0x361   :  { %v2332_v19 = vpop.xlane.xlu1 %2331 }
 0x362   :  { %v4257_v21 = vpop.eup %2964  ;;  %v2354_v1 = vsub.f32 %v4481_v34, %v2332_v19 }
 0x363   :  { %2405 = vadd.xlane.f32.xlu0 %v4257_v21  ;;  %v2334_v59 = vpop.xlane.xlu0 %2333 }
 0x364   :  { %v2379_v44 = vmul.f32 1.442695, %v2354_v1  ;;  %v2355_v14 = vsub.f32 %v4482_v8, %v2334_v59 }
 0x366   :  { %2970 = vpow2.f32 %v2379_v44  ;;  %v2381_v5 = vmul.f32 1.442695, %v2355_v14 }
 0x367   :  { %v4262_v41 = vpop.eup %2966 }
 0x368   :  { %2407 = vadd.xlane.f32.xlu1 %v4262_v41  ;;  %2972 = vpow2.f32 %v2381_v5  ;;  %v2336_v26 = vpop.xlane.xlu1 %2335 }
 0x369   :  { %v2356_v54 = vsub.f32 %v4483_v40, %v2336_v26 }
 0x36a   :  { %v4266_v30 = vpop.eup %2968 }
 0x36b   :  { %v2383_v25 = vmul.f32 1.442695, %v2356_v54  ;;  %2409 = vadd.xlane.f32.xlu0 %v4266_v30 }
 0x36d   :  { %2974 = vpow2.f32 %v2383_v25 }
 0x36e   :  { %v2338_v39 = vpop.xlane.xlu0 %2337 }
 0x36f   :  { %v2357_v48 = vsub.f32 %v4484_v32, %v2338_v39 }
 0x371   :  { %v2385_v58 = vmul.f32 1.442695, %v2357_v48 }
 0x372   :  { %v2340_v62 = vpop.xlane.xlu1 %2339 }
 0x373   :  { %v4270_v29 = vpop.eup %2970  ;;  %2976 = vpow2.f32 %v2385_v58  ;;  %v2358_v47 = vsub.f32 %v4485_v15, %v2340_v62 }
 0x374   :  { %2411 = vadd.xlane.f32.xlu1 %v4270_v29 }
 0x375   :  { %v2387_v13 = vmul.f32 1.442695, %v2358_v47  ;;  %v4274_v37 = vpop.eup %2972 }
 0x376   :  { %v2342_v16 = vpop.xlane.xlu0 %2341  ;;  %2413 = vadd.xlane.f32.xlu0 %v4274_v37 }
 0x377   :  { %2978 = vpow2.f32 %v2387_v13  ;;  %v2359_v52 = vsub.f32 %v4486_v55, %v2342_v16 }
 0x379   :  { %v2389_v46 = vmul.f32 1.442695, %v2359_v52 }
 0x37a   :  { %v4278_v12 = vpop.eup %2974 }
 0x37b   :  { %2980 = vpow2.f32 %v2389_v46  ;;  %v2344_v36 = vpop.xlane.xlu1 %2343  ;;  %2415 = vadd.xlane.f32.xlu1 %v4278_v12 }
 0x37c   :  { %v2360_v53 = vsub.f32 %v4487_v45, %v2344_v36 }
 0x37e   :  { %v2391_v23 = vmul.f32 1.442695, %v2360_v53  ;;  %v2139_v56 = vpop.permute.xlu0 %2138 }
 0x37f   :  { %v2165_v20 = vmin.f32 %v2139_v56, %v2085_v3  ;;  %v2293_v2 = vmin.f32 %v2139_v56, %v2277_v43  ;;  %v2143_v50 = vpop.permute.xlu1 %2142 }
 0x380   :  { %v4290_v19 = vpop.eup %2976  ;;  %2982 = vpow2.f32 %v2391_v23  ;;  %v2166_v34 = vmin.f32 %v2143_v50, %v2086_v18  ;;  %v2294_v1 = vmin.f32 %v2143_v50, %v2278_v61 }
 0x381   :  { %2181 = vst [vmem:[#allocation9 + $0x188] sm:$0xff] %v2165_v20  ;;  %2309 = vst [vmem:[#allocation9 + $0x198] sm:$0xff] %v2293_v2  ;;  %2417 = vadd.xlane.f32.xlu0 %v4290_v19  ;;  %v2279_v20 = vmax.f32 %v4205_v28, 0.0  ;;  %v2088_v2 = vmax.f32 %v2072_v60, 0.0 }
 0x382   :  { %2182 = vst [vmem:[#allocation9 + $0x1a8] sm:$0xff] %v2166_v34  ;;  %2310 = vst [vmem:[#allocation9 + $0x1b8] sm:$0xff] %v2294_v1 }
 0x384   :  { %v4293_v24 = vpop.eup %2978 }
 0x385   :  { %2419 = vadd.xlane.f32.xlu1 %v4293_v24 }
 0x388   :  { %v4296_v22 = vpop.eup %2980 }
 0x389   :  { %2421 = vadd.xlane.f32.xlu0 %v4296_v22 }
 0x38d   :  { %v4299_v42 = vpop.eup %2982 }
 0x38e   :  { %2423 = vadd.xlane.f32.xlu1 %v4299_v42 }
 0x39f   :  { %2150 = vperm.xlu1 %2782, %v3026_v17   ;;  %2146 = vperm.xlu0 %2783, %v3027_v27  }
 0x3d4   :  { %v2394_v0 = vpop.xlane.xlu1 %2393 }
 0x3d5   :  { %2984 = vrcp.f32 %v2394_v0 }
 0x3d8   :  { %v2396_v63 = vpop.xlane.xlu0 %2395 }
 0x3d9   :  { %2986 = vrcp.f32 %v2396_v63 }
 0x3dc   :  { %v2398_v49 = vpop.xlane.xlu0 %2397 }
 0x3dd   :  { %2988 = vrcp.f32 %v2398_v49 }
 0x3e0   :  { %v2400_v44 = vpop.xlane.xlu1 %2399 }
 0x3e1   :  { %2990 = vrcp.f32 %v2400_v44 }
 0x3e2   :  { %v2985_v59 = vpop.eup %2984 }
 0x3e3   :  { %v2426_v8 = vmul.f32 %v2985_v59, %v4235_v6 }
 0x3e4   :  { %v2402_v14 = vpop.xlane.xlu0 %2401 }
 0x3e5   :  { %2457 = vst [vmem:[#allocation8] sm:$0xff] %v2426_v8  ;;  %2992 = vrcp.f32 %v2402_v14 }
 0x3e6   :  { %v2987_v5 = vpop.eup %2986 }
 0x3e7   :  { %v2428_v26 = vmul.f32 %v2987_v5, %v4239_v7 }
 0x3e8   :  { %v2404_v40 = vpop.xlane.xlu1 %2403 }
 0x3e9   :  { %2458 = vst [vmem:[#allocation8 + $0x8] sm:$0xff] %v2428_v26  ;;  %2994 = vrcp.f32 %v2404_v40 }
 0x3ea   :  { %v2989_v54 = vpop.eup %2988 }
 0x3eb   :  { %v2430_v25 = vmul.f32 %v2989_v54, %v4243_v11 }
 0x3ec   :  { %v2406_v39 = vpop.xlane.xlu0 %2405 }
 0x3ed   :  { %2459 = vst [vmem:[#allocation8 + $0x10] sm:$0xff] %v2430_v25  ;;  %2996 = vrcp.f32 %v2406_v39 }
 0x3ee   :  { %v2991_v32 = vpop.eup %2990 }
 0x3ef   :  { %v2432_v48 = vmul.f32 %v2991_v32, %v4247_v57 }
 0x3f1   :  { %v2408_v58 = vpop.xlane.xlu1 %2407  ;;  %2460 = vst [vmem:[#allocation8 + $0x18] sm:$0xff] %v2432_v48 }
 0x3f2   :  { %2998 = vrcp.f32 %v2408_v58  ;;  %v2993_v6 = vpop.eup %2992 }
 0x3f3   :  { %v2434_v62 = vmul.f32 %v2993_v6, %v4250_v35 }
 0x3f4   :  { %v2410_v7 = vpop.xlane.xlu0 %2409 }
 0x3f5   :  { %2461 = vst [vmem:[#allocation8 + $0x20] sm:$0xff] %v2434_v62  ;;  %3000 = vrcp.f32 %v2410_v7 }
 0x3f6   :  { %v2995_v15 = vpop.eup %2994 }
 0x3f7   :  { %v2436_v47 = vmul.f32 %v2995_v15, %v4254_v33 }
 0x3f9   :  { %2462 = vst [vmem:[#allocation8 + $0x28] sm:$0xff] %v2436_v47 }
 0x3fa   :  { %v2997_v11 = vpop.eup %2996 }
 0x3fb   :  { %v2438_v13 = vmul.f32 %v2997_v11, %v4257_v21 }
 0x3fd   :  { %2463 = vst [vmem:[#allocation8 + $0x30] sm:$0xff] %v2438_v13  ;;  %v2412_v16 = vpop.xlane.xlu1 %2411 }
 0x3fe   :  { %3002 = vrcp.f32 %v2412_v16 }
 0x3ff   :  { %v2999_v55 = vpop.eup %2998  ;;  %v2414_v52 = vpop.xlane.xlu0 %2413 }
 0x400   :  { %v2440_v57 = vmul.f32 %v2999_v55, %v4262_v41  ;;  %3004 = vrcp.f32 %v2414_v52 }
 0x402   :  { %2464 = vst [vmem:[#allocation8 + $0x38] sm:$0xff] %v2440_v57  ;;  %v3001_v35 = vpop.eup %3000 }
 0x403   :  { %v2442_v46 = vmul.f32 %v3001_v35, %v4266_v30 }
 0x404   :  { %v2416_v36 = vpop.xlane.xlu1 %2415 }
 0x405   :  { %2465 = vst [vmem:[#allocation8 + $0x40] sm:$0xff] %v2442_v46  ;;  %3006 = vrcp.f32 %v2416_v36 }
 0x40a   :  { %v2418_v33 = vpop.xlane.xlu0 %2417 }
 0x40b   :  { %v3003_v45 = vpop.eup %3002  ;;  %3008 = vrcp.f32 %v2418_v33 }
 0x40c   :  { %v2444_v21 = vmul.f32 %v3003_v45, %v4270_v29  ;;  %v2087_v29 = vmax.f32 %v2071_v10, 0.0 }
 0x40d   :  { %v3005_v53 = vpop.eup %3004 }
 0x40e   :  { %2466 = vst [vmem:[#allocation8 + $0x48] sm:$0xff] %v2444_v21  ;;  %v2420_v3 = vpop.xlane.xlu1 %2419  ;;  %v2446_v43 = vmul.f32 %v3005_v53, %v4274_v37 }
 0x40f   :  { %3010 = vrcp.f32 %v2420_v3 }
 0x410   :  { %2467 = vst [vmem:[#allocation8 + $0x50] sm:$0xff] %v2446_v43 }
 0x412   :  { %v2422_v41 = vpop.xlane.xlu0 %2421  ;;  %v3007_v23 = vpop.eup %3006 }
 0x413   :  { %3012 = vrcp.f32 %v2422_v41  ;;  %v2448_v30 = vmul.f32 %v3007_v23, %v4278_v12  ;;  %v2280_v12 = vmax.f32 %v4222_v38, 0.0 }
 0x415   :  { %2468 = vst [vmem:[#allocation8 + $0x58] sm:$0xff] %v2448_v30 }
 0x417   :  { %v2424_v56 = vpop.xlane.xlu1 %2423 }
 0x418   :  { %v3009_v18 = vpop.eup %3008  ;;  %3014 = vrcp.f32 %v2424_v56 }
 0x419   :  { %v2450_v61 = vmul.f32 %v3009_v18, %v4290_v19 }
 0x41a   :  { %v2147_v37 = vpop.permute.xlu0 %2146 }
 0x41b   :  { %2469 = vst [vmem:[#allocation8 + $0x60] sm:$0xff] %v2450_v61  ;;  %v2167_v50 = vmin.f32 %v2147_v37, %v2087_v29  ;;  %v2295_v34 = vmin.f32 %v2147_v37, %v2279_v20  ;;  %v2151_v1 = vpop.permute.xlu1 %2150 }
 0x41c   :  { %v3011_v19 = vpop.eup %3010  ;;  %v2168_v17 = vmin.f32 %v2151_v1, %v2088_v2  ;;  %v2296_v27 = vmin.f32 %v2151_v1, %v2280_v12 }
 0x41d   :  { %v2452_v31 = vmul.f32 %v3011_v19, %v4293_v24  ;;  %2183 = vst [vmem:[#allocation9 + $0x1c8] sm:$0xff] %v2167_v50  ;;  %2311 = vst [vmem:[#allocation9 + $0x1d8] sm:$0xff] %v2295_v34 }
 0x41e   :  { %2184 = vst [vmem:[#allocation9 + $0x1e8] sm:$0xff] %v2168_v17  ;;  %2312 = vst [vmem:[#allocation9 + $0x1f8] sm:$0xff] %v2296_v27 }
 0x41f   :  { %2470 = vst [vmem:[#allocation8 + $0x68] sm:$0xff] %v2452_v31 }
 0x420   :  { %3099 = shalt.err (!%p3096_p5)
}
 0x421   :  { %s3152_s24 = smov 512   ;;  %s3153_s25 = smov 32   ;;  %v3013_v51 = vpop.eup %3012 }
 0x422   :  { %2496 = dma.vmem_to_hbm [thread:$0]  %s2491_s2, 8192, %s4347_s9, [#allocation10], %s3152_s24, %s3152_s24, %s3153_s25   ;;  %v2454_v10 = vmul.f32 %v3013_v51, %v4296_v22 }
 0x423   :  { %s3154_s5 = smov [#allocation8]  }
 0x424   :  { %2471 = vst [vmem:[#allocation8 + $0x70] sm:$0xff] %v2454_v10  ;;  %s2478_s27 = sshll.u32 %s3154_s5, 4  ;;  %s2479_s27 = int_to_ptr.vmem [resolvable:$true] %s2478_s27 }
 0x425   :  { %v3015_v28 = vpop.eup %3014  ;;  %s3108_s28 = scalar_lea.vmem %s2479_s27, 2048  ;;  %p3113_p7 = scmp.lt.s32.totalorder %s2479_s27, %s2479_s27 }
 0x426   :  { %v2456_v4 = vmul.f32 %v3015_v28, %v4299_v42  ;;  %p3109_p6 = scmp.ne.s32.totalorder %s2479_s27, %s3108_s28  ;;  %p3114_p8 = scmp.lt.s32.totalorder %s3108_s28, %s3108_s28 }
 0x428   :  { %2472 = vst [vmem:[#allocation8 + $0x78] sm:$0xff] %v2456_v4  ;;  %p3115_p9 = por %p3114_p8, %p3113_p7 }
 0x42a   :  { %p3116_p10 = pnand %p3115_p9, %p3109_p6 }
 0x42c   :  { %3119 = shalt.err (!%p3116_p10)
}
 0x42d   :  { %s3155_s30 = smov 128   ;;  %s3156_s9 = smov 8  }
 0x42e   :  { %2484 = dma.vmem_to_hbm [thread:$0]  %s2479_s27, 2048, %s4346_s8, [#allocation4], %s3155_s30, %s3155_s30, %s3156_s9  }
 0x42f   :  { %3132 = dma.done.wait [#allocation4], 2048  }
 0x430   :  { %3133 = vsyncadd [#allocation4], 4294965248 }
 0x431   :  { %3134 = dma.done.wait [#allocation10], 8192  }
 0x432   :  { %3135 = vsyncadd [#allocation10], 4294959104 }
 0x433   :  { %2503 = vsyncpa [#allocation3], 1 }
 0x434   :  { %2504 = vsyncpa [#allocation6], 1 }
 0x435   :  { %2505 = vsyncpa [#allocation4], 1 }
 0x436   :  { %2506 = vsyncpa [#allocation10], 1 }

</bundles_post_ra>
